<compile_context>
chip_gen: v5e
topology: v5e:2x2
jax: 0.10.0
libtpu: 0.0.40
codegen_flags: <defaults>
</compile_context>

<pallas_src>
import functools

import jax
import jax.numpy as jnp
import numpy as np
from jax import lax
from jax.experimental import pallas as pl
from jax.experimental.pallas import tpu as pltpu

DIM = 4            # forced by the module definition (see note above)
HID = 2 * DIM      # MLP hidden
EPS = 1e-5         # nn.LayerNorm default eps
SCALE = DIM ** (-0.5)
KV_ROWS = 8        # [v0..v5, ones, pad] -- sublane-aligned slab
ROW_SUM = DIM + 2  # index of the ones row (softmax denominator) in the slab

# --------------------------- packed-parameter map ---------------------------
# One flat f32 vector in SMEM; offsets are Python ints so every read inside
# the kernel is a static scalar load.
_PACK_SPEC = (
    ("g1", DIM), ("b1", DIM),                       # norm1 gamma / beta
    ("wa", DIM), ("ba", 1),                         # folded rank-1 attn coeffs
    ("wp", (DIM + 2) * (DIM + 2)), ("bp", DIM + 2),  # output projection
    ("g2", DIM), ("b2", DIM),                       # norm2
    ("w1", DIM * HID), ("bm1", HID),                # mlp fc1
    ("w2", HID * DIM), ("bm2", DIM),                # mlp fc2
)
OFF = {}
_o = 0
for _name, _n in _PACK_SPEC:
    OFF[_name] = _o
    _o += _n
PACKED_SIZE = _o                                    # 139 floats -> <1 KiB SMEM


# ----------------------------- kernel helpers -------------------------------

def _erf(z):
    # Abramowitz & Stegun 7.1.26 (max abs error ~1.5e-7, f32-exact).
    a1, a2, a3, a4, a5 = 0.254829592, -0.284496736, 1.421413741, -1.453152027, 1.061405429
    p = 0.3275911
    az = jnp.abs(z)
    t = 1.0 / (1.0 + p * az)
    poly = t * (a1 + t * (a2 + t * (a3 + t * (a4 + t * a5))))
    y = 1.0 - poly * jnp.exp(-az * az)
    return jnp.where(z >= 0.0, y, -y)


def _gelu_exact(x):
    return 0.5 * x * (1.0 + _erf(x * (2.0 ** -0.5)))


def _ln_rows(rows, gname, bname, pget):
    # Channel LayerNorm in channel-major layout: reduce over the short channel
    # axis with unrolled adds (pure VPU, no cross-lane reduce). rows: (1,T) each.
    c_count = len(rows)
    inv_c = 1.0 / c_count
    mu = rows[0]
    for r in rows[1:]:
        mu = mu + r
    mu = mu * inv_c
    var = (rows[0] - mu) * (rows[0] - mu)
    for r in rows[1:]:
        var = var + (r - mu) * (r - mu)
    var = var * inv_c
    rstd = lax.rsqrt(var + EPS)
    return [(rows[c] - mu) * rstd * pget(gname, c) + pget(bname, c)
            for c in range(c_count)]


# --------------------------------- kernel -----------------------------------

def flow_attention_kernel(p_ref, mm_ref, qin_ref, kv_ref, tcol_ref, out_ref,
                          acc_ref, aux_ref, *, bf16_exp):
    f32 = jnp.float32
    bf16 = jnp.bfloat16
    b = pl.program_id(0)
    kvi = pl.program_id(2)
    n_kv = pl.num_programs(2)

    def pget(name, i=0):
        return p_ref[OFF[name] + i]            # static scalar load from SMEM

    def norm1_rows():
        qin = qin_ref[0]                        # (6, TQ): [x0..x3, gx, gy]
        rows = [qin[c:c + 1, :] for c in range(DIM)]
        return _ln_rows(rows, "g1", "b1", pget)

    # ---- per-(b, q-tile) prologue: zero accumulator, fold rank-1 attention
    #      coefficient a_i and the *exact* row max into scratch -------------
    @pl.when(kvi == 0)
    def _init():
        acc_ref[...] = jnp.zeros_like(acc_ref)
        xs = norm1_rows()
        a = xs[0] * pget("wa", 0)
        for k in range(1, DIM):
            a = a + xs[k] * pget("wa", k)
        a = a + pget("ba")                                       # (1, TQ)
        tmax = mm_ref[b, 0]
        tmin = mm_ref[b, 1]
        aux_ref[0:1, :] = a
        aux_ref[1:2, :] = jnp.maximum(a * tmax, a * tmin)        # exact row max

    a_row = aux_ref[0:1, :]                                      # (1, TQ)
    m_row = aux_ref[1:2, :]                                      # (1, TQ)

    # ---- streamed kv chunk: p[j,i] = exp(a_i*t_j - m_i);  acc += v_aug @ p --
    kvb = kv_ref[0]                         # (8, TJ) bf16: [v0..v5, ones, 0]
    tcol = tcol_ref[0][:, 0:1]              # (TJ, 1) f32, sublane-major tgt
    logits = tcol * a_row - m_row           # (TJ, TQ) f32, <= 0 (broadcasts)
    if bf16_exp:
        p = jnp.exp(logits.astype(bf16))    # bf16 EUP path (v6e / v7x)
    else:
        p = jnp.exp(logits).astype(bf16)    # f32 EUP path (v5e)
    acc_ref[...] += jnp.dot(kvb, p, preferred_element_type=f32)  # (8, TQ)

    # ---- epilogue on the last kv chunk ----
    @pl.when(kvi == n_kv - 1)
    def _finalize():
        xs = norm1_rows()
        qin = qin_ref[0]
        gq0 = qin[DIM:DIM + 1, :]
        gq1 = qin[DIM + 1:DIM + 2, :]

        acc = acc_ref[...]
        # deferred softmax normalization (EUP reciprocal, no NxN divide)
        inv_l = pl.reciprocal(acc[ROW_SUM:ROW_SUM + 1, :], approx=True)
        xo = [acc[c:c + 1, :] * inv_l for c in range(DIM + 2)]

        # output projection (6x6 scalar FMAs)
        y = []
        for c in range(DIM + 2):
            s = xo[0] * pget("wp", 0 * (DIM + 2) + c)
            for k in range(1, DIM + 2):
                s = s + xo[k] * pget("wp", k * (DIM + 2) + c)
            y.append(s + pget("bp", c))

        flow0 = y[DIM] - gq0
        flow1 = y[DIM + 1] - gq1
        xa = [xs[c] + y[c] for c in range(DIM)]

        # MLP block: x + fc2(gelu(fc1(norm2(x))))
        xn = _ln_rows(xa, "g2", "b2", pget)
        hid = []
        for m in range(HID):
            s = xn[0] * pget("w1", 0 * HID + m)
            for k in range(1, DIM):
                s = s + xn[k] * pget("w1", k * HID + m)
            hid.append(_gelu_exact(s + pget("bm1", m)))
        for c in range(DIM):
            s = hid[0] * pget("w2", 0 * DIM + c)
            for m in range(1, HID):
                s = s + hid[m] * pget("w2", m * DIM + c)
            xa[c] = xa[c] + s + pget("bm2", c)

        # per-row lane-dense stores: channels 0..3 = features, 4..5 = flow
        for c in range(DIM):
            out_ref[0, c:c + 1, :] = xa[c]
        out_ref[0, DIM:DIM + 1, :] = flow0
        out_ref[0, DIM + 1:DIM + 2, :] = flow1


# --------------------------------- wrapper ----------------------------------

PARAM_ORDER = ("g1", "b1", "wq", "bq", "wk", "bk", "wv", "bv",
               "wp", "bp", "g2", "b2", "w1", "bm1", "w2", "bm2")


def _make_grid_cm(B, H, W):
    # channel-major grid (B, 2, N), rows = [xx, yy], matching generate_grid().
    yy = (jnp.arange(H, dtype=jnp.float32) / (H - 1))[:, None]
    xx = (jnp.arange(W, dtype=jnp.float32) / (W - 1))[None, :]
    g = jnp.stack([jnp.broadcast_to(xx, (H, W)).reshape(-1),
                   jnp.broadcast_to(yy, (H, W)).reshape(-1)], axis=0)
    return jnp.broadcast_to(g[None], (B, 2, H * W))


def _pack_params(p):
    # Fold scale into the rank-1 attention coefficients and flatten the small
    # per-channel parameters into one f32 vector (order/sizes per _PACK_SPEC).
    wk = jnp.asarray(p["wk"], jnp.float32)[0]                     # (4,)
    pieces = {
        "g1": p["g1"], "b1": p["b1"],
        "wa": SCALE * (jnp.asarray(p["wq"], jnp.float32) @ wk),
        "ba": (SCALE * jnp.dot(jnp.asarray(p["bq"], jnp.float32)[0], wk))[None],
        "wp": p["wp"], "bp": p["bp"],
        "g2": p["g2"], "b2": p["b2"],
        "w1": p["w1"], "bm1": p["bm1"],
        "w2": p["w2"], "bm2": p["bm2"],
    }
    flat = [jnp.asarray(pieces[name], jnp.float32).reshape(-1)
            for name, _ in _PACK_SPEC]
    packed = jnp.concatenate(flat)
    assert packed.shape == (PACKED_SIZE,)
    return packed


def _default_bf16_exp():
    # bf16 EUP/VALU only pays off on v6e / v7x; keep f32 exp on v5e & unknown.
    try:
        kind = jax.devices()[0].device_kind.lower()
    except Exception:
        return False
    return any(t in kind for t in ("v6", "v7", "7x"))


def _pick_kv_tile(n, cap=1024):
    t = cap
    while t >= 128:
        if n % t == 0:
            return t
        t //= 2
    return n


def _pick_q_tile(n, batch, cap=512):
    cands = []
    t = cap
    while t >= 128:
        if n % t == 0:
            cands.append(t)
        t //= 2
    if not cands:
        return n
    if batch == 1:
        # keep both v7x TensorCores busy: prefer an even number of q tiles
        for t in cands:
            if (n // t) % 2 == 0:
                return t
    return cands[0]


@functools.partial(jax.jit, static_argnames=("q_tile", "kv_tile", "bf16_exp"))
def flow_attention(x, tgt, params, q_tile=None, kv_tile=None, bf16_exp=None):
    B, C, H, W = x.shape
    assert C == DIM and tgt.shape == (B, 1, H, W)
    assert H > 1 and W > 1
    N = H * W

    # channel-major views: NCHW flatten is a free reshape (no transposes).
    x_cm = x.reshape(B, C, N).astype(jnp.float32)
    t_cm = tgt.reshape(B, 1, N).astype(jnp.float32)
    g_cm = _make_grid_cm(B, H, W)
    packed = _pack_params(params)

    # ---- kv-side precompute, hoisted out of the kernel (O(N) wrapper work) --
    wv = jnp.asarray(params["wv"], jnp.float32)                    # (3, 6)
    bv = jnp.asarray(params["bv"], jnp.float32).reshape(-1)        # (6,)
    kv_feat = jnp.concatenate([t_cm, g_cm], axis=1)                # (B, 3, N)
    v_cm = jnp.einsum("bcn,cd->bdn", kv_feat, wv) + bv[None, :, None]
    kv_slab = jnp.concatenate(
        [v_cm,                                                     # rows 0..5
         jnp.ones((B, 1, N), jnp.float32),                         # rowsum row
         jnp.zeros((B, 1, N), jnp.float32)],                       # align pad
        axis=1).astype(jnp.bfloat16)                               # (B, 8, N)
    # tgt replicated on the lane axis so the kernel reads a (TJ,1) sublane-major
    # column directly -- no in-kernel (1,TJ)->(TJ,1) transpose needed.
    tgt_col = jnp.broadcast_to(t_cm.reshape(B, N, 1), (B, N, 8)).astype(jnp.float32)
    tminmax = jnp.stack([jnp.max(t_cm, axis=(1, 2)),
                         jnp.min(t_cm, axis=(1, 2))], axis=1)      # (B, 2)

    # q-side packing: x (4 rows) + query grid (2 rows) -> one lane-dense stream
    q_in = jnp.concatenate([x_cm, g_cm], axis=1)                   # (B, 6, N)

    TQ = q_tile if q_tile is not None else _pick_q_tile(N, B)
    TJ = kv_tile if kv_tile is not None else _pick_kv_tile(N)
    assert N % TQ == 0 and N % TJ == 0
    nq, nkv = N // TQ, N // TJ
    if bf16_exp is None:
        bf16_exp = _default_bf16_exp()

    kern = functools.partial(flow_attention_kernel, bf16_exp=bool(bf16_exp))

    out = pl.pallas_call(
        kern,
        out_shape=jax.ShapeDtypeStruct((B, DIM + 2, N), jnp.float32),
        grid_spec=pltpu.PrefetchScalarGridSpec(
            num_scalar_prefetch=0,
            grid=(B, nq, nkv),
            in_specs=[
                # all parameters in one SMEM vector (single tiny DMA)
                pl.BlockSpec(memory_space=pltpu.MemorySpace.SMEM),
                # per-batch tgt max/min scalars
                pl.BlockSpec(memory_space=pltpu.MemorySpace.SMEM),
                pl.BlockSpec((1, DIM + 2, TQ), lambda b, q, k: (b, 0, q)),   # x+grid (q)
                pl.BlockSpec((1, KV_ROWS, TJ), lambda b, q, k: (b, 0, k)),   # v slab (kv)
                pl.BlockSpec((1, TJ, 8), lambda b, q, k: (b, k, 0)),         # tgt col (kv)
            ],
            out_specs=pl.BlockSpec((1, DIM + 2, TQ), lambda b, q, k: (b, 0, q)),
            scratch_shapes=[
                pltpu.VMEM((KV_ROWS, TQ), jnp.float32),   # xo accumulator (+rowsum)
                pltpu.VMEM((2, TQ), jnp.float32),          # a_row, m_row stash
            ],
        ),
        compiler_params=pltpu.CompilerParams(
            dimension_semantics=("parallel", "parallel", "arbitrary")),
    )(packed, tminmax, q_in, kv_slab, tgt_col)

    # (B, 6, N) -> (B, 6, H, W): free reshape, identical to the module's
    # .view(B, H, W, -1).permute(0, 3, 1, 2).
    return out.reshape(B, DIM + 2, H, W)


# ------------------------------ plain-JAX reference -------------------------

def flow_attention_ref(x, tgt, p):
    B, C, H, W = x.shape
    N = H * W
    xf = x.reshape(B, C, N).transpose(0, 2, 1)
    tf = tgt.reshape(B, 1, N).transpose(0, 2, 1)
    grid = jnp.swapaxes(_make_grid_cm(B, H, W), 1, 2)

    def ln(z, g, b):
        mu = z.mean(-1, keepdims=True)
        var = ((z - mu) ** 2).mean(-1, keepdims=True)
        return (z - mu) / jnp.sqrt(var + EPS) * g + b

    xs = ln(xf, p["g1"], p["b1"])
    q = (xs @ p["wq"] + p["bq"]) * SCALE
    k = tf @ p["wk"] + p["bk"]
    v = jnp.concatenate([tf, grid], -1) @ p["wv"] + p["bv"]
    attn = jax.nn.softmax(q @ jnp.swapaxes(k, -1, -2), axis=-1)
    xo = attn @ v
    xo = xo @ p["wp"] + p["bp"]
    flow = xo[..., -2:] - grid
    xa = xs + xo[..., :C]
    h = ln(xa, p["g2"], p["b2"]) @ p["w1"] + p["bm1"]
    h = 0.5 * h * (1.0 + jax.scipy.special.erf(h / jnp.sqrt(2.0)))
    xa = xa + h @ p["w2"] + p["bm2"]
    out = jnp.concatenate([xa, flow], -1)
    return out.reshape(B, H, W, C + 2).transpose(0, 3, 1, 2)


# ---------------------------------- params -----------------------------------

def init_params(key):
    C = DIM
    shapes = {
        "g1": (1, C), "b1": (1, C),
        "wq": (C, C), "bq": (1, C),
        "wk": (1, C), "bk": (1, C),
        "wv": (C - 1, C + 2), "bv": (1, C + 2),
        "wp": (C + 2, C + 2), "bp": (1, C + 2),
        "g2": (1, C), "b2": (1, C),
        "w1": (C, 2 * C), "bm1": (1, 2 * C),
        "w2": (2 * C, C), "bm2": (1, C),
    }
    keys = jax.random.split(key, len(PARAM_ORDER))
    params = {}
    for k, name in zip(keys, PARAM_ORDER):
        s = shapes[name]
        if name in ("g1", "g2"):
            params[name] = 1.0 + 0.05 * jax.random.normal(k, s, jnp.float32)
        elif name.startswith("b"):
            params[name] = 0.05 * jax.random.normal(k, s, jnp.float32)
        else:
            params[name] = 0.3 * jax.random.normal(k, s, jnp.float32)
    return params


# ------------------------------------ main ------------------------------------

if __name__ == "__main__":
    B, H, W = 2, 16, 16
    key = jax.random.PRNGKey(0)
    kx, kt, kp = jax.random.split(key, 3)

    x = jax.random.normal(kx, (B, DIM, H, W), jnp.float32)
    tgt = jax.random.normal(kt, (B, 1, H, W), jnp.float32)
    params = init_params(kp)

    # small tiles so the q grid axis (2 tiles) and the kv reduction axis
    # (2 chunks, accumulator init + finalize) are both exercised at this size.
    out = flow_attention(x, tgt, params, q_tile=128, kv_tile=128)
    out = jax.block_until_ready(out)
    assert out.shape == (B, DIM + 2, H, W)

    ref = flow_attention_ref(x, tgt, params)
    # Tolerance is looser than pure-f32 because the attention weights / v slab
    # feed the MXU in bf16 (f32 accumulation) and exp may run in bf16 on
    # v6e/v7x; pass bf16_exp=False (and swap in approx=False) for tighter runs.
    np.testing.assert_allclose(np.asarray(out), np.asarray(ref),
                               rtol=1e-2, atol=1e-2)
    print("KERNEL_OK")
</pallas_src>

<mosaic_0001>
module attributes {stable_mosaic.version = 11 : i64} {
  func.func @flow_attention_kernel(%arg0: i32, %arg1: i32, %arg2: i32, %arg3: memref<139xf32, #tpu.memory_space<smem>>, %arg4: memref<2x2xf32, #tpu.memory_space<smem>>, %arg5: memref<1x6x128xf32, #tpu.memory_space<vmem>>, %arg6: memref<1x8x128xbf16, #tpu.memory_space<vmem>>, %arg7: memref<1x128x8xf32, #tpu.memory_space<vmem>>, %arg8: memref<1x6x128xf32, #tpu.memory_space<vmem>>, %arg9: memref<8x128xf32, #tpu.memory_space<vmem>>, %arg10: memref<2x128xf32, #tpu.memory_space<vmem>>) attributes {dimension_semantics = [#tpu.dimension_semantics<parallel>, #tpu.dimension_semantics<parallel>, #tpu.dimension_semantics<arbitrary>], iteration_bounds = array<i64: 2, 2, 2>, scalar_prefetch = 0 : i64, scratch_operands = 2 : i64, tpu.core_type = #tpu.core_type<tc>, window_params = [{transform_indices = @transform_0, window_bounds = array<i64: 139>}, {transform_indices = @transform_1, window_bounds = array<i64: 2, 2>}, {transform_indices = @transform_2, window_bounds = array<i64: 1, 6, 128>}, {transform_indices = @transform_3, window_bounds = array<i64: 1, 8, 128>}, {transform_indices = @transform_4, window_bounds = array<i64: 1, 128, 8>}, {transform_indices = @transform_5, window_bounds = array<i64: 1, 6, 128>}]} {
    %c0_i32 = arith.constant 0 : i32
    %0 = arith.cmpi eq, %arg2, %c0_i32 : i32
    %1 = arith.extui %0 : i1 to i32
    %c0_i32_0 = arith.constant 0 : i32
    %2 = arith.cmpi ne, %1, %c0_i32_0 : i32
    scf.if %2 {
      %cst_14 = arith.constant 0.000000e+00 : f32
      %24 = vector.broadcast %cst_14 : f32 to vector<8x128xf32>
      %c0_15 = arith.constant 0 : index
      %c0_16 = arith.constant 0 : index
      %25 = vector.load %arg9[%c0_15, %c0_16] : memref<8x128xf32, #tpu.memory_space<vmem>>, vector<8x128xf32>
      tpu.vector_store %arg9[%c0_15, %c0_16], %24 {strides = array<i32>} : memref<8x128xf32, #tpu.memory_space<vmem>>, vector<8x128xf32>,
      %c0_17 = arith.constant 0 : index
      %c0_18 = arith.constant 0 : index
      %c0_19 = arith.constant 0 : index
      %26 = vector.load %arg5[%c0_17, %c0_18, %c0_19] : memref<1x6x128xf32, #tpu.memory_space<vmem>>, vector<1x6x128xf32>
      %27 = vector.shape_cast %26 : vector<1x6x128xf32> to vector<6x128xf32>
      %28 = vector.extract_strided_slice %27 {offsets = [0, 0], sizes = [1, 128], strides = [1, 1]} : vector<6x128xf32> to vector<1x128xf32>
      %29 = vector.extract_strided_slice %27 {offsets = [1, 0], sizes = [1, 128], strides = [1, 1]} : vector<6x128xf32> to vector<1x128xf32>
      %30 = vector.extract_strided_slice %27 {offsets = [2, 0], sizes = [1, 128], strides = [1, 1]} : vector<6x128xf32> to vector<1x128xf32>
      %31 = vector.extract_strided_slice %27 {offsets = [3, 0], sizes = [1, 128], strides = [1, 1]} : vector<6x128xf32> to vector<1x128xf32>
      %32 = arith.addf %28, %29 : vector<1x128xf32>
      %33 = arith.addf %32, %30 : vector<1x128xf32>
      %34 = arith.addf %33, %31 : vector<1x128xf32>
      %cst_20 = arith.constant 2.500000e-01 : f32
      %35 = vector.broadcast %cst_20 : f32 to vector<1x128xf32>
      %36 = arith.mulf %34, %35 : vector<1x128xf32>
      %37 = arith.subf %28, %36 : vector<1x128xf32>
      %38 = arith.subf %28, %36 : vector<1x128xf32>
      %39 = arith.mulf %37, %38 : vector<1x128xf32>
      %40 = arith.subf %29, %36 : vector<1x128xf32>
      %41 = arith.subf %29, %36 : vector<1x128xf32>
      %42 = arith.mulf %40, %41 : vector<1x128xf32>
      %43 = arith.addf %39, %42 : vector<1x128xf32>
      %44 = arith.subf %30, %36 : vector<1x128xf32>
      %45 = arith.subf %30, %36 : vector<1x128xf32>
      %46 = arith.mulf %44, %45 : vector<1x128xf32>
      %47 = arith.addf %43, %46 : vector<1x128xf32>
      %48 = arith.subf %31, %36 : vector<1x128xf32>
      %49 = arith.subf %31, %36 : vector<1x128xf32>
      %50 = arith.mulf %48, %49 : vector<1x128xf32>
      %51 = arith.addf %47, %50 : vector<1x128xf32>
      %cst_21 = arith.constant 2.500000e-01 : f32
      %52 = vector.broadcast %cst_21 : f32 to vector<1x128xf32>
      %53 = arith.mulf %51, %52 : vector<1x128xf32>
      %cst_22 = arith.constant 9.99999974E-6 : f32
      %54 = vector.broadcast %cst_22 : f32 to vector<1x128xf32>
      %55 = arith.addf %53, %54 : vector<1x128xf32>
      %56 = math.rsqrt %55 : vector<1x128xf32>
      %57 = arith.subf %28, %36 : vector<1x128xf32>
      %58 = arith.mulf %57, %56 : vector<1x128xf32>
      %c0_23 = arith.constant 0 : index
      %59 = memref.load %arg3[%c0_23] : memref<139xf32, #tpu.memory_space<smem>>
      %60 = vector.broadcast %59 : f32 to vector<1x128xf32>
      %61 = arith.mulf %58, %60 : vector<1x128xf32>
      %c4 = arith.constant 4 : index
      %62 = memref.load %arg3[%c4] : memref<139xf32, #tpu.memory_space<smem>>
      %63 = vector.broadcast %62 : f32 to vector<1x128xf32>
      %64 = arith.addf %61, %63 : vector<1x128xf32>
      %65 = arith.subf %29, %36 : vector<1x128xf32>
      %66 = arith.mulf %65, %56 : vector<1x128xf32>
      %c1_24 = arith.constant 1 : index
      %67 = memref.load %arg3[%c1_24] : memref<139xf32, #tpu.memory_space<smem>>
      %68 = vector.broadcast %67 : f32 to vector<1x128xf32>
      %69 = arith.mulf %66, %68 : vector<1x128xf32>
      %c5 = arith.constant 5 : index
      %70 = memref.load %arg3[%c5] : memref<139xf32, #tpu.memory_space<smem>>
      %71 = vector.broadcast %70 : f32 to vector<1x128xf32>
      %72 = arith.addf %69, %71 : vector<1x128xf32>
      %73 = arith.subf %30, %36 : vector<1x128xf32>
      %74 = arith.mulf %73, %56 : vector<1x128xf32>
      %c2 = arith.constant 2 : index
      %75 = memref.load %arg3[%c2] : memref<139xf32, #tpu.memory_space<smem>>
      %76 = vector.broadcast %75 : f32 to vector<1x128xf32>
      %77 = arith.mulf %74, %76 : vector<1x128xf32>
      %c6 = arith.constant 6 : index
      %78 = memref.load %arg3[%c6] : memref<139xf32, #tpu.memory_space<smem>>
      %79 = vector.broadcast %78 : f32 to vector<1x128xf32>
      %80 = arith.addf %77, %79 : vector<1x128xf32>
      %81 = arith.subf %31, %36 : vector<1x128xf32>
      %82 = arith.mulf %81, %56 : vector<1x128xf32>
      %c3 = arith.constant 3 : index
      %83 = memref.load %arg3[%c3] : memref<139xf32, #tpu.memory_space<smem>>
      %84 = vector.broadcast %83 : f32 to vector<1x128xf32>
      %85 = arith.mulf %82, %84 : vector<1x128xf32>
      %c7 = arith.constant 7 : index
      %86 = memref.load %arg3[%c7] : memref<139xf32, #tpu.memory_space<smem>>
      %87 = vector.broadcast %86 : f32 to vector<1x128xf32>
      %88 = arith.addf %85, %87 : vector<1x128xf32>
      %c8 = arith.constant 8 : index
      %89 = memref.load %arg3[%c8] : memref<139xf32, #tpu.memory_space<smem>>
      %90 = vector.broadcast %89 : f32 to vector<1x128xf32>
      %91 = arith.mulf %64, %90 : vector<1x128xf32>
      %c9 = arith.constant 9 : index
      %92 = memref.load %arg3[%c9] : memref<139xf32, #tpu.memory_space<smem>>
      %93 = vector.broadcast %92 : f32 to vector<1x128xf32>
      %94 = arith.mulf %72, %93 : vector<1x128xf32>
      %95 = arith.addf %91, %94 : vector<1x128xf32>
      %c10 = arith.constant 10 : index
      %96 = memref.load %arg3[%c10] : memref<139xf32, #tpu.memory_space<smem>>
      %97 = vector.broadcast %96 : f32 to vector<1x128xf32>
      %98 = arith.mulf %80, %97 : vector<1x128xf32>
      %99 = arith.addf %95, %98 : vector<1x128xf32>
      %c11 = arith.constant 11 : index
      %100 = memref.load %arg3[%c11] : memref<139xf32, #tpu.memory_space<smem>>
      %101 = vector.broadcast %100 : f32 to vector<1x128xf32>
      %102 = arith.mulf %88, %101 : vector<1x128xf32>
      %103 = arith.addf %99, %102 : vector<1x128xf32>
      %c12 = arith.constant 12 : index
      %104 = memref.load %arg3[%c12] : memref<139xf32, #tpu.memory_space<smem>>
      %105 = vector.broadcast %104 : f32 to vector<1x128xf32>
      %106 = arith.addf %103, %105 : vector<1x128xf32>
      %107 = arith.index_cast %arg0 : i32 to index
      %c0_25 = arith.constant 0 : index
      %108 = memref.load %arg4[%107, %c0_25] : memref<2x2xf32, #tpu.memory_space<smem>>
      %109 = arith.index_cast %arg0 : i32 to index
      %c1_26 = arith.constant 1 : index
      %110 = memref.load %arg4[%109, %c1_26] : memref<2x2xf32, #tpu.memory_space<smem>>
      %c0_27 = arith.constant 0 : index
      %c0_28 = arith.constant 0 : index
      %111 = vector.load %arg10[%c0_27, %c0_28] : memref<2x128xf32, #tpu.memory_space<vmem>>, vector<1x128xf32>
      tpu.vector_store %arg10[%c0_27, %c0_28], %106 {strides = array<i32>} : memref<2x128xf32, #tpu.memory_space<vmem>>, vector<1x128xf32>,
      %112 = vector.broadcast %108 : f32 to vector<1x128xf32>
      %113 = arith.mulf %106, %112 : vector<1x128xf32>
      %114 = vector.broadcast %110 : f32 to vector<1x128xf32>
      %115 = arith.mulf %106, %114 : vector<1x128xf32>
      %116 = arith.maximumf %113, %115 : vector<1x128xf32>
      %c1_29 = arith.constant 1 : index
      %c0_30 = arith.constant 0 : index
      %117 = vector.load %arg10[%c1_29, %c0_30] : memref<2x128xf32, #tpu.memory_space<vmem>>, vector<1x128xf32>
      tpu.vector_store %arg10[%c1_29, %c0_30], %116 {strides = array<i32>} : memref<2x128xf32, #tpu.memory_space<vmem>>, vector<1x128xf32>,
    } else {
    }
    %c0 = arith.constant 0 : index
    %c0_1 = arith.constant 0 : index
    %3 = vector.load %arg10[%c0, %c0_1] : memref<2x128xf32, #tpu.memory_space<vmem>>, vector<1x128xf32>
    %c1 = arith.constant 1 : index
    %c0_2 = arith.constant 0 : index
    %4 = vector.load %arg10[%c1, %c0_2] : memref<2x128xf32, #tpu.memory_space<vmem>>, vector<1x128xf32>
    %c0_3 = arith.constant 0 : index
    %c0_4 = arith.constant 0 : index
    %c0_5 = arith.constant 0 : index
    %5 = vector.load %arg6[%c0_3, %c0_4, %c0_5] : memref<1x8x128xbf16, #tpu.memory_space<vmem>>, vector<1x8x128xbf16>
    %6 = vector.shape_cast %5 : vector<1x8x128xbf16> to vector<8x128xbf16>
    %c0_6 = arith.constant 0 : index
    %c0_7 = arith.constant 0 : index
    %c0_8 = arith.constant 0 : index
    %7 = vector.load %arg7[%c0_6, %c0_7, %c0_8] : memref<1x128x8xf32, #tpu.memory_space<vmem>>, vector<1x128x8xf32>
    %8 = vector.shape_cast %7 : vector<1x128x8xf32> to vector<128x8xf32>
    %9 = vector.extract_strided_slice %8 {offsets = [0, 0], sizes = [128, 1], strides = [1, 1]} : vector<128x8xf32> to vector<128x1xf32>
    %10 = vector.broadcast %9 : vector<128x1xf32> to vector<128x128xf32>
    %11 = vector.broadcast %3 : vector<1x128xf32> to vector<128x128xf32>
    %12 = arith.mulf %10, %11 : vector<128x128xf32>
    %13 = vector.broadcast %4 : vector<1x128xf32> to vector<128x128xf32>
    %14 = arith.subf %12, %13 : vector<128x128xf32>
    %15 = math.exp %14 : vector<128x128xf32>
    %16 = arith.truncf %15 : vector<128x128xf32> to vector<128x128xbf16>
    %c0_9 = arith.constant 0 : index
    %c0_10 = arith.constant 0 : index
    %17 = vector.load %arg9[%c0_9, %c0_10] : memref<8x128xf32, #tpu.memory_space<vmem>>, vector<8x128xf32>
    %cst = arith.constant dense<0.000000e+00> : vector<8x128xf32>
    %18 = tpu.matmul %6, %16, %cst {dimension_numbers = #tpu.dot_dimension_numbers<[1], [0], [0], [1], [0, 0, 1, 1], [], []>} : vector<8x128xbf16>, vector<128x128xbf16>, vector<8x128xf32> -> vector<8x128xf32>
    %19 = arith.addf %17, %18 : vector<8x128xf32>
    %c0_11 = arith.constant 0 : index
    %c0_12 = arith.constant 0 : index
    %20 = vector.load %arg9[%c0_11, %c0_12] : memref<8x128xf32, #tpu.memory_space<vmem>>, vector<8x128xf32>
    tpu.vector_store %arg9[%c0_11, %c0_12], %19 {strides = array<i32>} : memref<8x128xf32, #tpu.memory_space<vmem>>, vector<8x128xf32>,
    %c1_i32 = arith.constant 1 : i32
    %21 = arith.cmpi eq, %arg2, %c1_i32 : i32
    %22 = arith.extui %21 : i1 to i32
    %c0_i32_13 = arith.constant 0 : i32
    %23 = arith.cmpi ne, %22, %c0_i32_13 : i32
    scf.if %23 {
      %c0_14 = arith.constant 0 : index
      %c0_15 = arith.constant 0 : index
      %c0_16 = arith.constant 0 : index
      %24 = vector.load %arg5[%c0_14, %c0_15, %c0_16] : memref<1x6x128xf32, #tpu.memory_space<vmem>>, vector<1x6x128xf32>
      %25 = vector.shape_cast %24 : vector<1x6x128xf32> to vector<6x128xf32>
      %26 = vector.extract_strided_slice %25 {offsets = [0, 0], sizes = [1, 128], strides = [1, 1]} : vector<6x128xf32> to vector<1x128xf32>
      %27 = vector.extract_strided_slice %25 {offsets = [1, 0], sizes = [1, 128], strides = [1, 1]} : vector<6x128xf32> to vector<1x128xf32>
      %28 = vector.extract_strided_slice %25 {offsets = [2, 0], sizes = [1, 128], strides = [1, 1]} : vector<6x128xf32> to vector<1x128xf32>
      %29 = vector.extract_strided_slice %25 {offsets = [3, 0], sizes = [1, 128], strides = [1, 1]} : vector<6x128xf32> to vector<1x128xf32>
      %30 = arith.addf %26, %27 : vector<1x128xf32>
      %31 = arith.addf %30, %28 : vector<1x128xf32>
      %32 = arith.addf %31, %29 : vector<1x128xf32>
      %cst_17 = arith.constant 2.500000e-01 : f32
      %33 = vector.broadcast %cst_17 : f32 to vector<1x128xf32>
      %34 = arith.mulf %32, %33 : vector<1x128xf32>
      %35 = arith.subf %26, %34 : vector<1x128xf32>
      %36 = arith.subf %26, %34 : vector<1x128xf32>
      %37 = arith.mulf %35, %36 : vector<1x128xf32>
      %38 = arith.subf %27, %34 : vector<1x128xf32>
      %39 = arith.subf %27, %34 : vector<1x128xf32>
      %40 = arith.mulf %38, %39 : vector<1x128xf32>
      %41 = arith.addf %37, %40 : vector<1x128xf32>
      %42 = arith.subf %28, %34 : vector<1x128xf32>
      %43 = arith.subf %28, %34 : vector<1x128xf32>
      %44 = arith.mulf %42, %43 : vector<1x128xf32>
      %45 = arith.addf %41, %44 : vector<1x128xf32>
      %46 = arith.subf %29, %34 : vector<1x128xf32>
      %47 = arith.subf %29, %34 : vector<1x128xf32>
      %48 = arith.mulf %46, %47 : vector<1x128xf32>
      %49 = arith.addf %45, %48 : vector<1x128xf32>
      %cst_18 = arith.constant 2.500000e-01 : f32
      %50 = vector.broadcast %cst_18 : f32 to vector<1x128xf32>
      %51 = arith.mulf %49, %50 : vector<1x128xf32>
      %cst_19 = arith.constant 9.99999974E-6 : f32
      %52 = vector.broadcast %cst_19 : f32 to vector<1x128xf32>
      %53 = arith.addf %51, %52 : vector<1x128xf32>
      %54 = math.rsqrt %53 : vector<1x128xf32>
      %55 = arith.subf %26, %34 : vector<1x128xf32>
      %56 = arith.mulf %55, %54 : vector<1x128xf32>
      %c0_20 = arith.constant 0 : index
      %57 = memref.load %arg3[%c0_20] : memref<139xf32, #tpu.memory_space<smem>>
      %58 = vector.broadcast %57 : f32 to vector<1x128xf32>
      %59 = arith.mulf %56, %58 : vector<1x128xf32>
      %c4 = arith.constant 4 : index
      %60 = memref.load %arg3[%c4] : memref<139xf32, #tpu.memory_space<smem>>
      %61 = vector.broadcast %60 : f32 to vector<1x128xf32>
      %62 = arith.addf %59, %61 : vector<1x128xf32>
      %63 = arith.subf %27, %34 : vector<1x128xf32>
      %64 = arith.mulf %63, %54 : vector<1x128xf32>
      %c1_21 = arith.constant 1 : index
      %65 = memref.load %arg3[%c1_21] : memref<139xf32, #tpu.memory_space<smem>>
      %66 = vector.broadcast %65 : f32 to vector<1x128xf32>
      %67 = arith.mulf %64, %66 : vector<1x128xf32>
      %c5 = arith.constant 5 : index
      %68 = memref.load %arg3[%c5] : memref<139xf32, #tpu.memory_space<smem>>
      %69 = vector.broadcast %68 : f32 to vector<1x128xf32>
      %70 = arith.addf %67, %69 : vector<1x128xf32>
      %71 = arith.subf %28, %34 : vector<1x128xf32>
      %72 = arith.mulf %71, %54 : vector<1x128xf32>
      %c2 = arith.constant 2 : index
      %73 = memref.load %arg3[%c2] : memref<139xf32, #tpu.memory_space<smem>>
      %74 = vector.broadcast %73 : f32 to vector<1x128xf32>
      %75 = arith.mulf %72, %74 : vector<1x128xf32>
      %c6 = arith.constant 6 : index
      %76 = memref.load %arg3[%c6] : memref<139xf32, #tpu.memory_space<smem>>
      %77 = vector.broadcast %76 : f32 to vector<1x128xf32>
      %78 = arith.addf %75, %77 : vector<1x128xf32>
      %79 = arith.subf %29, %34 : vector<1x128xf32>
      %80 = arith.mulf %79, %54 : vector<1x128xf32>
      %c3 = arith.constant 3 : index
      %81 = memref.load %arg3[%c3] : memref<139xf32, #tpu.memory_space<smem>>
      %82 = vector.broadcast %81 : f32 to vector<1x128xf32>
      %83 = arith.mulf %80, %82 : vector<1x128xf32>
      %c7 = arith.constant 7 : index
      %84 = memref.load %arg3[%c7] : memref<139xf32, #tpu.memory_space<smem>>
      %85 = vector.broadcast %84 : f32 to vector<1x128xf32>
      %86 = arith.addf %83, %85 : vector<1x128xf32>
      %c0_22 = arith.constant 0 : index
      %c0_23 = arith.constant 0 : index
      %c0_24 = arith.constant 0 : index
      %87 = vector.load %arg5[%c0_22, %c0_23, %c0_24] : memref<1x6x128xf32, #tpu.memory_space<vmem>>, vector<1x6x128xf32>
      %88 = vector.shape_cast %87 : vector<1x6x128xf32> to vector<6x128xf32>
      %89 = vector.extract_strided_slice %88 {offsets = [4, 0], sizes = [1, 128], strides = [1, 1]} : vector<6x128xf32> to vector<1x128xf32>
      %90 = vector.extract_strided_slice %88 {offsets = [5, 0], sizes = [1, 128], strides = [1, 1]} : vector<6x128xf32> to vector<1x128xf32>
      %c0_25 = arith.constant 0 : index
      %c0_26 = arith.constant 0 : index
      %91 = vector.load %arg9[%c0_25, %c0_26] : memref<8x128xf32, #tpu.memory_space<vmem>>, vector<8x128xf32>
      %92 = vector.extract_strided_slice %91 {offsets = [6, 0], sizes = [1, 128], strides = [1, 1]} : vector<8x128xf32> to vector<1x128xf32>
      %93 = tpu.reciprocal %92 {approx = true} : vector<1x128xf32> -> vector<1x128xf32>
      %94 = vector.extract_strided_slice %91 {offsets = [0, 0], sizes = [1, 128], strides = [1, 1]} : vector<8x128xf32> to vector<1x128xf32>
      %95 = arith.mulf %94, %93 : vector<1x128xf32>
      %96 = vector.extract_strided_slice %91 {offsets = [1, 0], sizes = [1, 128], strides = [1, 1]} : vector<8x128xf32> to vector<1x128xf32>
      %97 = arith.mulf %96, %93 : vector<1x128xf32>
      %98 = vector.extract_strided_slice %91 {offsets = [2, 0], sizes = [1, 128], strides = [1, 1]} : vector<8x128xf32> to vector<1x128xf32>
      %99 = arith.mulf %98, %93 : vector<1x128xf32>
      %100 = vector.extract_strided_slice %91 {offsets = [3, 0], sizes = [1, 128], strides = [1, 1]} : vector<8x128xf32> to vector<1x128xf32>
      %101 = arith.mulf %100, %93 : vector<1x128xf32>
      %102 = vector.extract_strided_slice %91 {offsets = [4, 0], sizes = [1, 128], strides = [1, 1]} : vector<8x128xf32> to vector<1x128xf32>
      %103 = arith.mulf %102, %93 : vector<1x128xf32>
      %104 = vector.extract_strided_slice %91 {offsets = [5, 0], sizes = [1, 128], strides = [1, 1]} : vector<8x128xf32> to vector<1x128xf32>
      %105 = arith.mulf %104, %93 : vector<1x128xf32>
      %c13 = arith.constant 13 : index
      %106 = memref.load %arg3[%c13] : memref<139xf32, #tpu.memory_space<smem>>
      %107 = vector.broadcast %106 : f32 to vector<1x128xf32>
      %108 = arith.mulf %95, %107 : vector<1x128xf32>
      %c19 = arith.constant 19 : index
      %109 = memref.load %arg3[%c19] : memref<139xf32, #tpu.memory_space<smem>>
      %110 = vector.broadcast %109 : f32 to vector<1x128xf32>
      %111 = arith.mulf %97, %110 : vector<1x128xf32>
      %112 = arith.addf %108, %111 : vector<1x128xf32>
      %c25 = arith.constant 25 : index
      %113 = memref.load %arg3[%c25] : memref<139xf32, #tpu.memory_space<smem>>
      %114 = vector.broadcast %113 : f32 to vector<1x128xf32>
      %115 = arith.mulf %99, %114 : vector<1x128xf32>
      %116 = arith.addf %112, %115 : vector<1x128xf32>
      %c31 = arith.constant 31 : index
      %117 = memref.load %arg3[%c31] : memref<139xf32, #tpu.memory_space<smem>>
      %118 = vector.broadcast %117 : f32 to vector<1x128xf32>
      %119 = arith.mulf %101, %118 : vector<1x128xf32>
      %120 = arith.addf %116, %119 : vector<1x128xf32>
      %c37 = arith.constant 37 : index
      %121 = memref.load %arg3[%c37] : memref<139xf32, #tpu.memory_space<smem>>
      %122 = vector.broadcast %121 : f32 to vector<1x128xf32>
      %123 = arith.mulf %103, %122 : vector<1x128xf32>
      %124 = arith.addf %120, %123 : vector<1x128xf32>
      %c43 = arith.constant 43 : index
      %125 = memref.load %arg3[%c43] : memref<139xf32, #tpu.memory_space<smem>>
      %126 = vector.broadcast %125 : f32 to vector<1x128xf32>
      %127 = arith.mulf %105, %126 : vector<1x128xf32>
      %128 = arith.addf %124, %127 : vector<1x128xf32>
      %c49 = arith.constant 49 : index
      %129 = memref.load %arg3[%c49] : memref<139xf32, #tpu.memory_space<smem>>
      %130 = vector.broadcast %129 : f32 to vector<1x128xf32>
      %131 = arith.addf %128, %130 : vector<1x128xf32>
      %c14 = arith.constant 14 : index
      %132 = memref.load %arg3[%c14] : memref<139xf32, #tpu.memory_space<smem>>
      %133 = vector.broadcast %132 : f32 to vector<1x128xf32>
      %134 = arith.mulf %95, %133 : vector<1x128xf32>
      %c20 = arith.constant 20 : index
      %135 = memref.load %arg3[%c20] : memref<139xf32, #tpu.memory_space<smem>>
      %136 = vector.broadcast %135 : f32 to vector<1x128xf32>
      %137 = arith.mulf %97, %136 : vector<1x128xf32>
      %138 = arith.addf %134, %137 : vector<1x128xf32>
      %c26 = arith.constant 26 : index
      %139 = memref.load %arg3[%c26] : memref<139xf32, #tpu.memory_space<smem>>
      %140 = vector.broadcast %139 : f32 to vector<1x128xf32>
      %141 = arith.mulf %99, %140 : vector<1x128xf32>
      %142 = arith.addf %138, %141 : vector<1x128xf32>
      %c32 = arith.constant 32 : index
      %143 = memref.load %arg3[%c32] : memref<139xf32, #tpu.memory_space<smem>>
      %144 = vector.broadcast %143 : f32 to vector<1x128xf32>
      %145 = arith.mulf %101, %144 : vector<1x128xf32>
      %146 = arith.addf %142, %145 : vector<1x128xf32>
      %c38 = arith.constant 38 : index
      %147 = memref.load %arg3[%c38] : memref<139xf32, #tpu.memory_space<smem>>
      %148 = vector.broadcast %147 : f32 to vector<1x128xf32>
      %149 = arith.mulf %103, %148 : vector<1x128xf32>
      %150 = arith.addf %146, %149 : vector<1x128xf32>
      %c44 = arith.constant 44 : index
      %151 = memref.load %arg3[%c44] : memref<139xf32, #tpu.memory_space<smem>>
      %152 = vector.broadcast %151 : f32 to vector<1x128xf32>
      %153 = arith.mulf %105, %152 : vector<1x128xf32>
      %154 = arith.addf %150, %153 : vector<1x128xf32>
      %c50 = arith.constant 50 : index
      %155 = memref.load %arg3[%c50] : memref<139xf32, #tpu.memory_space<smem>>
      %156 = vector.broadcast %155 : f32 to vector<1x128xf32>
      %157 = arith.addf %154, %156 : vector<1x128xf32>
      %c15 = arith.constant 15 : index
      %158 = memref.load %arg3[%c15] : memref<139xf32, #tpu.memory_space<smem>>
      %159 = vector.broadcast %158 : f32 to vector<1x128xf32>
      %160 = arith.mulf %95, %159 : vector<1x128xf32>
      %c21 = arith.constant 21 : index
      %161 = memref.load %arg3[%c21] : memref<139xf32, #tpu.memory_space<smem>>
      %162 = vector.broadcast %161 : f32 to vector<1x128xf32>
      %163 = arith.mulf %97, %162 : vector<1x128xf32>
      %164 = arith.addf %160, %163 : vector<1x128xf32>
      %c27 = arith.constant 27 : index
      %165 = memref.load %arg3[%c27] : memref<139xf32, #tpu.memory_space<smem>>
      %166 = vector.broadcast %165 : f32 to vector<1x128xf32>
      %167 = arith.mulf %99, %166 : vector<1x128xf32>
      %168 = arith.addf %164, %167 : vector<1x128xf32>
      %c33 = arith.constant 33 : index
      %169 = memref.load %arg3[%c33] : memref<139xf32, #tpu.memory_space<smem>>
      %170 = vector.broadcast %169 : f32 to vector<1x128xf32>
      %171 = arith.mulf %101, %170 : vector<1x128xf32>
      %172 = arith.addf %168, %171 : vector<1x128xf32>
      %c39 = arith.constant 39 : index
      %173 = memref.load %arg3[%c39] : memref<139xf32, #tpu.memory_space<smem>>
      %174 = vector.broadcast %173 : f32 to vector<1x128xf32>
      %175 = arith.mulf %103, %174 : vector<1x128xf32>
      %176 = arith.addf %172, %175 : vector<1x128xf32>
      %c45 = arith.constant 45 : index
      %177 = memref.load %arg3[%c45] : memref<139xf32, #tpu.memory_space<smem>>
      %178 = vector.broadcast %177 : f32 to vector<1x128xf32>
      %179 = arith.mulf %105, %178 : vector<1x128xf32>
      %180 = arith.addf %176, %179 : vector<1x128xf32>
      %c51 = arith.constant 51 : index
      %181 = memref.load %arg3[%c51] : memref<139xf32, #tpu.memory_space<smem>>
      %182 = vector.broadcast %181 : f32 to vector<1x128xf32>
      %183 = arith.addf %180, %182 : vector<1x128xf32>
      %c16 = arith.constant 16 : index
      %184 = memref.load %arg3[%c16] : memref<139xf32, #tpu.memory_space<smem>>
      %185 = vector.broadcast %184 : f32 to vector<1x128xf32>
      %186 = arith.mulf %95, %185 : vector<1x128xf32>
      %c22 = arith.constant 22 : index
      %187 = memref.load %arg3[%c22] : memref<139xf32, #tpu.memory_space<smem>>
      %188 = vector.broadcast %187 : f32 to vector<1x128xf32>
      %189 = arith.mulf %97, %188 : vector<1x128xf32>
      %190 = arith.addf %186, %189 : vector<1x128xf32>
      %c28 = arith.constant 28 : index
      %191 = memref.load %arg3[%c28] : memref<139xf32, #tpu.memory_space<smem>>
      %192 = vector.broadcast %191 : f32 to vector<1x128xf32>
      %193 = arith.mulf %99, %192 : vector<1x128xf32>
      %194 = arith.addf %190, %193 : vector<1x128xf32>
      %c34 = arith.constant 34 : index
      %195 = memref.load %arg3[%c34] : memref<139xf32, #tpu.memory_space<smem>>
      %196 = vector.broadcast %195 : f32 to vector<1x128xf32>
      %197 = arith.mulf %101, %196 : vector<1x128xf32>
      %198 = arith.addf %194, %197 : vector<1x128xf32>
      %c40 = arith.constant 40 : index
      %199 = memref.load %arg3[%c40] : memref<139xf32, #tpu.memory_space<smem>>
      %200 = vector.broadcast %199 : f32 to vector<1x128xf32>
      %201 = arith.mulf %103, %200 : vector<1x128xf32>
      %202 = arith.addf %198, %201 : vector<1x128xf32>
      %c46 = arith.constant 46 : index
      %203 = memref.load %arg3[%c46] : memref<139xf32, #tpu.memory_space<smem>>
      %204 = vector.broadcast %203 : f32 to vector<1x128xf32>
      %205 = arith.mulf %105, %204 : vector<1x128xf32>
      %206 = arith.addf %202, %205 : vector<1x128xf32>
      %c52 = arith.constant 52 : index
      %207 = memref.load %arg3[%c52] : memref<139xf32, #tpu.memory_space<smem>>
      %208 = vector.broadcast %207 : f32 to vector<1x128xf32>
      %209 = arith.addf %206, %208 : vector<1x128xf32>
      %c17 = arith.constant 17 : index
      %210 = memref.load %arg3[%c17] : memref<139xf32, #tpu.memory_space<smem>>
      %211 = vector.broadcast %210 : f32 to vector<1x128xf32>
      %212 = arith.mulf %95, %211 : vector<1x128xf32>
      %c23 = arith.constant 23 : index
      %213 = memref.load %arg3[%c23] : memref<139xf32, #tpu.memory_space<smem>>
      %214 = vector.broadcast %213 : f32 to vector<1x128xf32>
      %215 = arith.mulf %97, %214 : vector<1x128xf32>
      %216 = arith.addf %212, %215 : vector<1x128xf32>
      %c29 = arith.constant 29 : index
      %217 = memref.load %arg3[%c29] : memref<139xf32, #tpu.memory_space<smem>>
      %218 = vector.broadcast %217 : f32 to vector<1x128xf32>
      %219 = arith.mulf %99, %218 : vector<1x128xf32>
      %220 = arith.addf %216, %219 : vector<1x128xf32>
      %c35 = arith.constant 35 : index
      %221 = memref.load %arg3[%c35] : memref<139xf32, #tpu.memory_space<smem>>
      %222 = vector.broadcast %221 : f32 to vector<1x128xf32>
      %223 = arith.mulf %101, %222 : vector<1x128xf32>
      %224 = arith.addf %220, %223 : vector<1x128xf32>
      %c41 = arith.constant 41 : index
      %225 = memref.load %arg3[%c41] : memref<139xf32, #tpu.memory_space<smem>>
      %226 = vector.broadcast %225 : f32 to vector<1x128xf32>
      %227 = arith.mulf %103, %226 : vector<1x128xf32>
      %228 = arith.addf %224, %227 : vector<1x128xf32>
      %c47 = arith.constant 47 : index
      %229 = memref.load %arg3[%c47] : memref<139xf32, #tpu.memory_space<smem>>
      %230 = vector.broadcast %229 : f32 to vector<1x128xf32>
      %231 = arith.mulf %105, %230 : vector<1x128xf32>
      %232 = arith.addf %228, %231 : vector<1x128xf32>
      %c53 = arith.constant 53 : index
      %233 = memref.load %arg3[%c53] : memref<139xf32, #tpu.memory_space<smem>>
      %234 = vector.broadcast %233 : f32 to vector<1x128xf32>
      %235 = arith.addf %232, %234 : vector<1x128xf32>
      %c18 = arith.constant 18 : index
      %236 = memref.load %arg3[%c18] : memref<139xf32, #tpu.memory_space<smem>>
      %237 = vector.broadcast %236 : f32 to vector<1x128xf32>
      %238 = arith.mulf %95, %237 : vector<1x128xf32>
      %c24 = arith.constant 24 : index
      %239 = memref.load %arg3[%c24] : memref<139xf32, #tpu.memory_space<smem>>
      %240 = vector.broadcast %239 : f32 to vector<1x128xf32>
      %241 = arith.mulf %97, %240 : vector<1x128xf32>
      %242 = arith.addf %238, %241 : vector<1x128xf32>
      %c30 = arith.constant 30 : index
      %243 = memref.load %arg3[%c30] : memref<139xf32, #tpu.memory_space<smem>>
      %244 = vector.broadcast %243 : f32 to vector<1x128xf32>
      %245 = arith.mulf %99, %244 : vector<1x128xf32>
      %246 = arith.addf %242, %245 : vector<1x128xf32>
      %c36 = arith.constant 36 : index
      %247 = memref.load %arg3[%c36] : memref<139xf32, #tpu.memory_space<smem>>
      %248 = vector.broadcast %247 : f32 to vector<1x128xf32>
      %249 = arith.mulf %101, %248 : vector<1x128xf32>
      %250 = arith.addf %246, %249 : vector<1x128xf32>
      %c42 = arith.constant 42 : index
      %251 = memref.load %arg3[%c42] : memref<139xf32, #tpu.memory_space<smem>>
      %252 = vector.broadcast %251 : f32 to vector<1x128xf32>
      %253 = arith.mulf %103, %252 : vector<1x128xf32>
      %254 = arith.addf %250, %253 : vector<1x128xf32>
      %c48 = arith.constant 48 : index
      %255 = memref.load %arg3[%c48] : memref<139xf32, #tpu.memory_space<smem>>
      %256 = vector.broadcast %255 : f32 to vector<1x128xf32>
      %257 = arith.mulf %105, %256 : vector<1x128xf32>
      %258 = arith.addf %254, %257 : vector<1x128xf32>
      %c54 = arith.constant 54 : index
      %259 = memref.load %arg3[%c54] : memref<139xf32, #tpu.memory_space<smem>>
      %260 = vector.broadcast %259 : f32 to vector<1x128xf32>
      %261 = arith.addf %258, %260 : vector<1x128xf32>
      %262 = arith.subf %235, %89 : vector<1x128xf32>
      %263 = arith.subf %261, %90 : vector<1x128xf32>
      %264 = arith.addf %62, %131 : vector<1x128xf32>
      %265 = arith.addf %70, %157 : vector<1x128xf32>
      %266 = arith.addf %78, %183 : vector<1x128xf32>
      %267 = arith.addf %86, %209 : vector<1x128xf32>
      %268 = arith.addf %264, %265 : vector<1x128xf32>
      %269 = arith.addf %268, %266 : vector<1x128xf32>
      %270 = arith.addf %269, %267 : vector<1x128xf32>
      %cst_27 = arith.constant 2.500000e-01 : f32
      %271 = vector.broadcast %cst_27 : f32 to vector<1x128xf32>
      %272 = arith.mulf %270, %271 : vector<1x128xf32>
      %273 = arith.subf %264, %272 : vector<1x128xf32>
      %274 = arith.subf %264, %272 : vector<1x128xf32>
      %275 = arith.mulf %273, %274 : vector<1x128xf32>
      %276 = arith.subf %265, %272 : vector<1x128xf32>
      %277 = arith.subf %265, %272 : vector<1x128xf32>
      %278 = arith.mulf %276, %277 : vector<1x128xf32>
      %279 = arith.addf %275, %278 : vector<1x128xf32>
      %280 = arith.subf %266, %272 : vector<1x128xf32>
      %281 = arith.subf %266, %272 : vector<1x128xf32>
      %282 = arith.mulf %280, %281 : vector<1x128xf32>
      %283 = arith.addf %279, %282 : vector<1x128xf32>
      %284 = arith.subf %267, %272 : vector<1x128xf32>
      %285 = arith.subf %267, %272 : vector<1x128xf32>
      %286 = arith.mulf %284, %285 : vector<1x128xf32>
      %287 = arith.addf %283, %286 : vector<1x128xf32>
      %cst_28 = arith.constant 2.500000e-01 : f32
      %288 = vector.broadcast %cst_28 : f32 to vector<1x128xf32>
      %289 = arith.mulf %287, %288 : vector<1x128xf32>
      %cst_29 = arith.constant 9.99999974E-6 : f32
      %290 = vector.broadcast %cst_29 : f32 to vector<1x128xf32>
      %291 = arith.addf %289, %290 : vector<1x128xf32>
      %292 = math.rsqrt %291 : vector<1x128xf32>
      %293 = arith.subf %264, %272 : vector<1x128xf32>
      %294 = arith.mulf %293, %292 : vector<1x128xf32>
      %c55 = arith.constant 55 : index
      %295 = memref.load %arg3[%c55] : memref<139xf32, #tpu.memory_space<smem>>
      %296 = vector.broadcast %295 : f32 to vector<1x128xf32>
      %297 = arith.mulf %294, %296 : vector<1x128xf32>
      %c59 = arith.constant 59 : index
      %298 = memref.load %arg3[%c59] : memref<139xf32, #tpu.memory_space<smem>>
      %299 = vector.broadcast %298 : f32 to vector<1x128xf32>
      %300 = arith.addf %297, %299 : vector<1x128xf32>
      %301 = arith.subf %265, %272 : vector<1x128xf32>
      %302 = arith.mulf %301, %292 : vector<1x128xf32>
      %c56 = arith.constant 56 : index
      %303 = memref.load %arg3[%c56] : memref<139xf32, #tpu.memory_space<smem>>
      %304 = vector.broadcast %303 : f32 to vector<1x128xf32>
      %305 = arith.mulf %302, %304 : vector<1x128xf32>
      %c60 = arith.constant 60 : index
      %306 = memref.load %arg3[%c60] : memref<139xf32, #tpu.memory_space<smem>>
      %307 = vector.broadcast %306 : f32 to vector<1x128xf32>
      %308 = arith.addf %305, %307 : vector<1x128xf32>
      %309 = arith.subf %266, %272 : vector<1x128xf32>
      %310 = arith.mulf %309, %292 : vector<1x128xf32>
      %c57 = arith.constant 57 : index
      %311 = memref.load %arg3[%c57] : memref<139xf32, #tpu.memory_space<smem>>
      %312 = vector.broadcast %311 : f32 to vector<1x128xf32>
      %313 = arith.mulf %310, %312 : vector<1x128xf32>
      %c61 = arith.constant 61 : index
      %314 = memref.load %arg3[%c61] : memref<139xf32, #tpu.memory_space<smem>>
      %315 = vector.broadcast %314 : f32 to vector<1x128xf32>
      %316 = arith.addf %313, %315 : vector<1x128xf32>
      %317 = arith.subf %267, %272 : vector<1x128xf32>
      %318 = arith.mulf %317, %292 : vector<1x128xf32>
      %c58 = arith.constant 58 : index
      %319 = memref.load %arg3[%c58] : memref<139xf32, #tpu.memory_space<smem>>
      %320 = vector.broadcast %319 : f32 to vector<1x128xf32>
      %321 = arith.mulf %318, %320 : vector<1x128xf32>
      %c62 = arith.constant 62 : index
      %322 = memref.load %arg3[%c62] : memref<139xf32, #tpu.memory_space<smem>>
      %323 = vector.broadcast %322 : f32 to vector<1x128xf32>
      %324 = arith.addf %321, %323 : vector<1x128xf32>
      %c63 = arith.constant 63 : index
      %325 = memref.load %arg3[%c63] : memref<139xf32, #tpu.memory_space<smem>>
      %326 = vector.broadcast %325 : f32 to vector<1x128xf32>
      %327 = arith.mulf %300, %326 : vector<1x128xf32>
      %c71 = arith.constant 71 : index
      %328 = memref.load %arg3[%c71] : memref<139xf32, #tpu.memory_space<smem>>
      %329 = vector.broadcast %328 : f32 to vector<1x128xf32>
      %330 = arith.mulf %308, %329 : vector<1x128xf32>
      %331 = arith.addf %327, %330 : vector<1x128xf32>
      %c79 = arith.constant 79 : index
      %332 = memref.load %arg3[%c79] : memref<139xf32, #tpu.memory_space<smem>>
      %333 = vector.broadcast %332 : f32 to vector<1x128xf32>
      %334 = arith.mulf %316, %333 : vector<1x128xf32>
      %335 = arith.addf %331, %334 : vector<1x128xf32>
      %c87 = arith.constant 87 : index
      %336 = memref.load %arg3[%c87] : memref<139xf32, #tpu.memory_space<smem>>
      %337 = vector.broadcast %336 : f32 to vector<1x128xf32>
      %338 = arith.mulf %324, %337 : vector<1x128xf32>
      %339 = arith.addf %335, %338 : vector<1x128xf32>
      %c95 = arith.constant 95 : index
      %340 = memref.load %arg3[%c95] : memref<139xf32, #tpu.memory_space<smem>>
      %341 = vector.broadcast %340 : f32 to vector<1x128xf32>
      %342 = arith.addf %339, %341 : vector<1x128xf32>
      %cst_30 = arith.constant 5.000000e-01 : f32
      %343 = vector.broadcast %cst_30 : f32 to vector<1x128xf32>
      %344 = arith.mulf %343, %342 : vector<1x128xf32>
      %cst_31 = arith.constant 0.707106769 : f32
      %345 = vector.broadcast %cst_31 : f32 to vector<1x128xf32>
      %346 = arith.mulf %342, %345 : vector<1x128xf32>
      %347 = math.absf %346 : vector<1x128xf32>
      %cst_32 = arith.constant 0.327591091 : f32
      %348 = vector.broadcast %cst_32 : f32 to vector<1x128xf32>
      %349 = arith.mulf %348, %347 : vector<1x128xf32>
      %cst_33 = arith.constant 1.000000e+00 : f32
      %350 = vector.broadcast %cst_33 : f32 to vector<1x128xf32>
      %351 = arith.addf %350, %349 : vector<1x128xf32>
      %cst_34 = arith.constant 1.000000e+00 : f32
      %352 = vector.broadcast %cst_34 : f32 to vector<1x128xf32>
      %353 = arith.divf %352, %351 : vector<1x128xf32>
      %cst_35 = arith.constant 1.06140542 : f32
      %354 = vector.broadcast %cst_35 : f32 to vector<1x128xf32>
      %355 = arith.mulf %353, %354 : vector<1x128xf32>
      %cst_36 = arith.constant -1.45315206 : f32
      %356 = vector.broadcast %cst_36 : f32 to vector<1x128xf32>
      %357 = arith.addf %356, %355 : vector<1x128xf32>
      %358 = arith.mulf %353, %357 : vector<1x128xf32>
      %cst_37 = arith.constant 1.42141378 : f32
      %359 = vector.broadcast %cst_37 : f32 to vector<1x128xf32>
      %360 = arith.addf %359, %358 : vector<1x128xf32>
      %361 = arith.mulf %353, %360 : vector<1x128xf32>
      %cst_38 = arith.constant -0.284496725 : f32
      %362 = vector.broadcast %cst_38 : f32 to vector<1x128xf32>
      %363 = arith.addf %362, %361 : vector<1x128xf32>
      %364 = arith.mulf %353, %363 : vector<1x128xf32>
      %cst_39 = arith.constant 0.254829586 : f32
      %365 = vector.broadcast %cst_39 : f32 to vector<1x128xf32>
      %366 = arith.addf %365, %364 : vector<1x128xf32>
      %367 = arith.mulf %353, %366 : vector<1x128xf32>
      %cst_40 = arith.constant 0.000000e+00 : f32
      %368 = vector.broadcast %cst_40 : f32 to vector<1x128xf32>
      %369 = arith.subf %368, %347 : vector<1x128xf32>
      %370 = arith.mulf %369, %347 : vector<1x128xf32>
      %371 = math.exp %370 : vector<1x128xf32>
      %372 = arith.mulf %367, %371 : vector<1x128xf32>
      %cst_41 = arith.constant 1.000000e+00 : f32
      %373 = vector.broadcast %cst_41 : f32 to vector<1x128xf32>
      %374 = arith.subf %373, %372 : vector<1x128xf32>
      %cst_42 = arith.constant 0.000000e+00 : f32
      %375 = vector.broadcast %cst_42 : f32 to vector<1x128xf32>
      %376 = arith.cmpf oge, %346, %375 : vector<1x128xf32>
      %cst_43 = arith.constant 0.000000e+00 : f32
      %377 = vector.broadcast %cst_43 : f32 to vector<1x128xf32>
      %378 = arith.subf %377, %374 : vector<1x128xf32>
      %379 = arith.select %376, %374, %378 : vector<1x128xi1>, vector<1x128xf32>
      %cst_44 = arith.constant 1.000000e+00 : f32
      %380 = vector.broadcast %cst_44 : f32 to vector<1x128xf32>
      %381 = arith.addf %380, %379 : vector<1x128xf32>
      %382 = arith.mulf %344, %381 : vector<1x128xf32>
      %c64 = arith.constant 64 : index
      %383 = memref.load %arg3[%c64] : memref<139xf32, #tpu.memory_space<smem>>
      %384 = vector.broadcast %383 : f32 to vector<1x128xf32>
      %385 = arith.mulf %300, %384 : vector<1x128xf32>
      %c72 = arith.constant 72 : index
      %386 = memref.load %arg3[%c72] : memref<139xf32, #tpu.memory_space<smem>>
      %387 = vector.broadcast %386 : f32 to vector<1x128xf32>
      %388 = arith.mulf %308, %387 : vector<1x128xf32>
      %389 = arith.addf %385, %388 : vector<1x128xf32>
      %c80 = arith.constant 80 : index
      %390 = memref.load %arg3[%c80] : memref<139xf32, #tpu.memory_space<smem>>
      %391 = vector.broadcast %390 : f32 to vector<1x128xf32>
      %392 = arith.mulf %316, %391 : vector<1x128xf32>
      %393 = arith.addf %389, %392 : vector<1x128xf32>
      %c88 = arith.constant 88 : index
      %394 = memref.load %arg3[%c88] : memref<139xf32, #tpu.memory_space<smem>>
      %395 = vector.broadcast %394 : f32 to vector<1x128xf32>
      %396 = arith.mulf %324, %395 : vector<1x128xf32>
      %397 = arith.addf %393, %396 : vector<1x128xf32>
      %c96 = arith.constant 96 : index
      %398 = memref.load %arg3[%c96] : memref<139xf32, #tpu.memory_space<smem>>
      %399 = vector.broadcast %398 : f32 to vector<1x128xf32>
      %400 = arith.addf %397, %399 : vector<1x128xf32>
      %cst_45 = arith.constant 5.000000e-01 : f32
      %401 = vector.broadcast %cst_45 : f32 to vector<1x128xf32>
      %402 = arith.mulf %401, %400 : vector<1x128xf32>
      %cst_46 = arith.constant 0.707106769 : f32
      %403 = vector.broadcast %cst_46 : f32 to vector<1x128xf32>
      %404 = arith.mulf %400, %403 : vector<1x128xf32>
      %405 = math.absf %404 : vector<1x128xf32>
      %cst_47 = arith.constant 0.327591091 : f32
      %406 = vector.broadcast %cst_47 : f32 to vector<1x128xf32>
      %407 = arith.mulf %406, %405 : vector<1x128xf32>
      %cst_48 = arith.constant 1.000000e+00 : f32
      %408 = vector.broadcast %cst_48 : f32 to vector<1x128xf32>
      %409 = arith.addf %408, %407 : vector<1x128xf32>
      %cst_49 = arith.constant 1.000000e+00 : f32
      %410 = vector.broadcast %cst_49 : f32 to vector<1x128xf32>
      %411 = arith.divf %410, %409 : vector<1x128xf32>
      %cst_50 = arith.constant 1.06140542 : f32
      %412 = vector.broadcast %cst_50 : f32 to vector<1x128xf32>
      %413 = arith.mulf %411, %412 : vector<1x128xf32>
      %cst_51 = arith.constant -1.45315206 : f32
      %414 = vector.broadcast %cst_51 : f32 to vector<1x128xf32>
      %415 = arith.addf %414, %413 : vector<1x128xf32>
      %416 = arith.mulf %411, %415 : vector<1x128xf32>
      %cst_52 = arith.constant 1.42141378 : f32
      %417 = vector.broadcast %cst_52 : f32 to vector<1x128xf32>
      %418 = arith.addf %417, %416 : vector<1x128xf32>
      %419 = arith.mulf %411, %418 : vector<1x128xf32>
      %cst_53 = arith.constant -0.284496725 : f32
      %420 = vector.broadcast %cst_53 : f32 to vector<1x128xf32>
      %421 = arith.addf %420, %419 : vector<1x128xf32>
      %422 = arith.mulf %411, %421 : vector<1x128xf32>
      %cst_54 = arith.constant 0.254829586 : f32
      %423 = vector.broadcast %cst_54 : f32 to vector<1x128xf32>
      %424 = arith.addf %423, %422 : vector<1x128xf32>
      %425 = arith.mulf %411, %424 : vector<1x128xf32>
      %cst_55 = arith.constant 0.000000e+00 : f32
      %426 = vector.broadcast %cst_55 : f32 to vector<1x128xf32>
      %427 = arith.subf %426, %405 : vector<1x128xf32>
      %428 = arith.mulf %427, %405 : vector<1x128xf32>
      %429 = math.exp %428 : vector<1x128xf32>
      %430 = arith.mulf %425, %429 : vector<1x128xf32>
      %cst_56 = arith.constant 1.000000e+00 : f32
      %431 = vector.broadcast %cst_56 : f32 to vector<1x128xf32>
      %432 = arith.subf %431, %430 : vector<1x128xf32>
      %cst_57 = arith.constant 0.000000e+00 : f32
      %433 = vector.broadcast %cst_57 : f32 to vector<1x128xf32>
      %434 = arith.cmpf oge, %404, %433 : vector<1x128xf32>
      %cst_58 = arith.constant 0.000000e+00 : f32
      %435 = vector.broadcast %cst_58 : f32 to vector<1x128xf32>
      %436 = arith.subf %435, %432 : vector<1x128xf32>
      %437 = arith.select %434, %432, %436 : vector<1x128xi1>, vector<1x128xf32>
      %cst_59 = arith.constant 1.000000e+00 : f32
      %438 = vector.broadcast %cst_59 : f32 to vector<1x128xf32>
      %439 = arith.addf %438, %437 : vector<1x128xf32>
      %440 = arith.mulf %402, %439 : vector<1x128xf32>
      %c65 = arith.constant 65 : index
      %441 = memref.load %arg3[%c65] : memref<139xf32, #tpu.memory_space<smem>>
      %442 = vector.broadcast %441 : f32 to vector<1x128xf32>
      %443 = arith.mulf %300, %442 : vector<1x128xf32>
      %c73 = arith.constant 73 : index
      %444 = memref.load %arg3[%c73] : memref<139xf32, #tpu.memory_space<smem>>
      %445 = vector.broadcast %444 : f32 to vector<1x128xf32>
      %446 = arith.mulf %308, %445 : vector<1x128xf32>
      %447 = arith.addf %443, %446 : vector<1x128xf32>
      %c81 = arith.constant 81 : index
      %448 = memref.load %arg3[%c81] : memref<139xf32, #tpu.memory_space<smem>>
      %449 = vector.broadcast %448 : f32 to vector<1x128xf32>
      %450 = arith.mulf %316, %449 : vector<1x128xf32>
      %451 = arith.addf %447, %450 : vector<1x128xf32>
      %c89 = arith.constant 89 : index
      %452 = memref.load %arg3[%c89] : memref<139xf32, #tpu.memory_space<smem>>
      %453 = vector.broadcast %452 : f32 to vector<1x128xf32>
      %454 = arith.mulf %324, %453 : vector<1x128xf32>
      %455 = arith.addf %451, %454 : vector<1x128xf32>
      %c97 = arith.constant 97 : index
      %456 = memref.load %arg3[%c97] : memref<139xf32, #tpu.memory_space<smem>>
      %457 = vector.broadcast %456 : f32 to vector<1x128xf32>
      %458 = arith.addf %455, %457 : vector<1x128xf32>
      %cst_60 = arith.constant 5.000000e-01 : f32
      %459 = vector.broadcast %cst_60 : f32 to vector<1x128xf32>
      %460 = arith.mulf %459, %458 : vector<1x128xf32>
      %cst_61 = arith.constant 0.707106769 : f32
      %461 = vector.broadcast %cst_61 : f32 to vector<1x128xf32>
      %462 = arith.mulf %458, %461 : vector<1x128xf32>
      %463 = math.absf %462 : vector<1x128xf32>
      %cst_62 = arith.constant 0.327591091 : f32
      %464 = vector.broadcast %cst_62 : f32 to vector<1x128xf32>
      %465 = arith.mulf %464, %463 : vector<1x128xf32>
      %cst_63 = arith.constant 1.000000e+00 : f32
      %466 = vector.broadcast %cst_63 : f32 to vector<1x128xf32>
      %467 = arith.addf %466, %465 : vector<1x128xf32>
      %cst_64 = arith.constant 1.000000e+00 : f32
      %468 = vector.broadcast %cst_64 : f32 to vector<1x128xf32>
      %469 = arith.divf %468, %467 : vector<1x128xf32>
      %cst_65 = arith.constant 1.06140542 : f32
      %470 = vector.broadcast %cst_65 : f32 to vector<1x128xf32>
      %471 = arith.mulf %469, %470 : vector<1x128xf32>
      %cst_66 = arith.constant -1.45315206 : f32
      %472 = vector.broadcast %cst_66 : f32 to vector<1x128xf32>
      %473 = arith.addf %472, %471 : vector<1x128xf32>
      %474 = arith.mulf %469, %473 : vector<1x128xf32>
      %cst_67 = arith.constant 1.42141378 : f32
      %475 = vector.broadcast %cst_67 : f32 to vector<1x128xf32>
      %476 = arith.addf %475, %474 : vector<1x128xf32>
      %477 = arith.mulf %469, %476 : vector<1x128xf32>
      %cst_68 = arith.constant -0.284496725 : f32
      %478 = vector.broadcast %cst_68 : f32 to vector<1x128xf32>
      %479 = arith.addf %478, %477 : vector<1x128xf32>
      %480 = arith.mulf %469, %479 : vector<1x128xf32>
      %cst_69 = arith.constant 0.254829586 : f32
      %481 = vector.broadcast %cst_69 : f32 to vector<1x128xf32>
      %482 = arith.addf %481, %480 : vector<1x128xf32>
      %483 = arith.mulf %469, %482 : vector<1x128xf32>
      %cst_70 = arith.constant 0.000000e+00 : f32
      %484 = vector.broadcast %cst_70 : f32 to vector<1x128xf32>
      %485 = arith.subf %484, %463 : vector<1x128xf32>
      %486 = arith.mulf %485, %463 : vector<1x128xf32>
      %487 = math.exp %486 : vector<1x128xf32>
      %488 = arith.mulf %483, %487 : vector<1x128xf32>
      %cst_71 = arith.constant 1.000000e+00 : f32
      %489 = vector.broadcast %cst_71 : f32 to vector<1x128xf32>
      %490 = arith.subf %489, %488 : vector<1x128xf32>
      %cst_72 = arith.constant 0.000000e+00 : f32
      %491 = vector.broadcast %cst_72 : f32 to vector<1x128xf32>
      %492 = arith.cmpf oge, %462, %491 : vector<1x128xf32>
      %cst_73 = arith.constant 0.000000e+00 : f32
      %493 = vector.broadcast %cst_73 : f32 to vector<1x128xf32>
      %494 = arith.subf %493, %490 : vector<1x128xf32>
      %495 = arith.select %492, %490, %494 : vector<1x128xi1>, vector<1x128xf32>
      %cst_74 = arith.constant 1.000000e+00 : f32
      %496 = vector.broadcast %cst_74 : f32 to vector<1x128xf32>
      %497 = arith.addf %496, %495 : vector<1x128xf32>
      %498 = arith.mulf %460, %497 : vector<1x128xf32>
      %c66 = arith.constant 66 : index
      %499 = memref.load %arg3[%c66] : memref<139xf32, #tpu.memory_space<smem>>
      %500 = vector.broadcast %499 : f32 to vector<1x128xf32>
      %501 = arith.mulf %300, %500 : vector<1x128xf32>
      %c74 = arith.constant 74 : index
      %502 = memref.load %arg3[%c74] : memref<139xf32, #tpu.memory_space<smem>>
      %503 = vector.broadcast %502 : f32 to vector<1x128xf32>
      %504 = arith.mulf %308, %503 : vector<1x128xf32>
      %505 = arith.addf %501, %504 : vector<1x128xf32>
      %c82 = arith.constant 82 : index
      %506 = memref.load %arg3[%c82] : memref<139xf32, #tpu.memory_space<smem>>
      %507 = vector.broadcast %506 : f32 to vector<1x128xf32>
      %508 = arith.mulf %316, %507 : vector<1x128xf32>
      %509 = arith.addf %505, %508 : vector<1x128xf32>
      %c90 = arith.constant 90 : index
      %510 = memref.load %arg3[%c90] : memref<139xf32, #tpu.memory_space<smem>>
      %511 = vector.broadcast %510 : f32 to vector<1x128xf32>
      %512 = arith.mulf %324, %511 : vector<1x128xf32>
      %513 = arith.addf %509, %512 : vector<1x128xf32>
      %c98 = arith.constant 98 : index
      %514 = memref.load %arg3[%c98] : memref<139xf32, #tpu.memory_space<smem>>
      %515 = vector.broadcast %514 : f32 to vector<1x128xf32>
      %516 = arith.addf %513, %515 : vector<1x128xf32>
      %cst_75 = arith.constant 5.000000e-01 : f32
      %517 = vector.broadcast %cst_75 : f32 to vector<1x128xf32>
      %518 = arith.mulf %517, %516 : vector<1x128xf32>
      %cst_76 = arith.constant 0.707106769 : f32
      %519 = vector.broadcast %cst_76 : f32 to vector<1x128xf32>
      %520 = arith.mulf %516, %519 : vector<1x128xf32>
      %521 = math.absf %520 : vector<1x128xf32>
      %cst_77 = arith.constant 0.327591091 : f32
      %522 = vector.broadcast %cst_77 : f32 to vector<1x128xf32>
      %523 = arith.mulf %522, %521 : vector<1x128xf32>
      %cst_78 = arith.constant 1.000000e+00 : f32
      %524 = vector.broadcast %cst_78 : f32 to vector<1x128xf32>
      %525 = arith.addf %524, %523 : vector<1x128xf32>
      %cst_79 = arith.constant 1.000000e+00 : f32
      %526 = vector.broadcast %cst_79 : f32 to vector<1x128xf32>
      %527 = arith.divf %526, %525 : vector<1x128xf32>
      %cst_80 = arith.constant 1.06140542 : f32
      %528 = vector.broadcast %cst_80 : f32 to vector<1x128xf32>
      %529 = arith.mulf %527, %528 : vector<1x128xf32>
      %cst_81 = arith.constant -1.45315206 : f32
      %530 = vector.broadcast %cst_81 : f32 to vector<1x128xf32>
      %531 = arith.addf %530, %529 : vector<1x128xf32>
      %532 = arith.mulf %527, %531 : vector<1x128xf32>
      %cst_82 = arith.constant 1.42141378 : f32
      %533 = vector.broadcast %cst_82 : f32 to vector<1x128xf32>
      %534 = arith.addf %533, %532 : vector<1x128xf32>
      %535 = arith.mulf %527, %534 : vector<1x128xf32>
      %cst_83 = arith.constant -0.284496725 : f32
      %536 = vector.broadcast %cst_83 : f32 to vector<1x128xf32>
      %537 = arith.addf %536, %535 : vector<1x128xf32>
      %538 = arith.mulf %527, %537 : vector<1x128xf32>
      %cst_84 = arith.constant 0.254829586 : f32
      %539 = vector.broadcast %cst_84 : f32 to vector<1x128xf32>
      %540 = arith.addf %539, %538 : vector<1x128xf32>
      %541 = arith.mulf %527, %540 : vector<1x128xf32>
      %cst_85 = arith.constant 0.000000e+00 : f32
      %542 = vector.broadcast %cst_85 : f32 to vector<1x128xf32>
      %543 = arith.subf %542, %521 : vector<1x128xf32>
      %544 = arith.mulf %543, %521 : vector<1x128xf32>
      %545 = math.exp %544 : vector<1x128xf32>
      %546 = arith.mulf %541, %545 : vector<1x128xf32>
      %cst_86 = arith.constant 1.000000e+00 : f32
      %547 = vector.broadcast %cst_86 : f32 to vector<1x128xf32>
      %548 = arith.subf %547, %546 : vector<1x128xf32>
      %cst_87 = arith.constant 0.000000e+00 : f32
      %549 = vector.broadcast %cst_87 : f32 to vector<1x128xf32>
      %550 = arith.cmpf oge, %520, %549 : vector<1x128xf32>
      %cst_88 = arith.constant 0.000000e+00 : f32
      %551 = vector.broadcast %cst_88 : f32 to vector<1x128xf32>
      %552 = arith.subf %551, %548 : vector<1x128xf32>
      %553 = arith.select %550, %548, %552 : vector<1x128xi1>, vector<1x128xf32>
      %cst_89 = arith.constant 1.000000e+00 : f32
      %554 = vector.broadcast %cst_89 : f32 to vector<1x128xf32>
      %555 = arith.addf %554, %553 : vector<1x128xf32>
      %556 = arith.mulf %518, %555 : vector<1x128xf32>
      %c67 = arith.constant 67 : index
      %557 = memref.load %arg3[%c67] : memref<139xf32, #tpu.memory_space<smem>>
      %558 = vector.broadcast %557 : f32 to vector<1x128xf32>
      %559 = arith.mulf %300, %558 : vector<1x128xf32>
      %c75 = arith.constant 75 : index
      %560 = memref.load %arg3[%c75] : memref<139xf32, #tpu.memory_space<smem>>
      %561 = vector.broadcast %560 : f32 to vector<1x128xf32>
      %562 = arith.mulf %308, %561 : vector<1x128xf32>
      %563 = arith.addf %559, %562 : vector<1x128xf32>
      %c83 = arith.constant 83 : index
      %564 = memref.load %arg3[%c83] : memref<139xf32, #tpu.memory_space<smem>>
      %565 = vector.broadcast %564 : f32 to vector<1x128xf32>
      %566 = arith.mulf %316, %565 : vector<1x128xf32>
      %567 = arith.addf %563, %566 : vector<1x128xf32>
      %c91 = arith.constant 91 : index
      %568 = memref.load %arg3[%c91] : memref<139xf32, #tpu.memory_space<smem>>
      %569 = vector.broadcast %568 : f32 to vector<1x128xf32>
      %570 = arith.mulf %324, %569 : vector<1x128xf32>
      %571 = arith.addf %567, %570 : vector<1x128xf32>
      %c99 = arith.constant 99 : index
      %572 = memref.load %arg3[%c99] : memref<139xf32, #tpu.memory_space<smem>>
      %573 = vector.broadcast %572 : f32 to vector<1x128xf32>
      %574 = arith.addf %571, %573 : vector<1x128xf32>
      %cst_90 = arith.constant 5.000000e-01 : f32
      %575 = vector.broadcast %cst_90 : f32 to vector<1x128xf32>
      %576 = arith.mulf %575, %574 : vector<1x128xf32>
      %cst_91 = arith.constant 0.707106769 : f32
      %577 = vector.broadcast %cst_91 : f32 to vector<1x128xf32>
      %578 = arith.mulf %574, %577 : vector<1x128xf32>
      %579 = math.absf %578 : vector<1x128xf32>
      %cst_92 = arith.constant 0.327591091 : f32
      %580 = vector.broadcast %cst_92 : f32 to vector<1x128xf32>
      %581 = arith.mulf %580, %579 : vector<1x128xf32>
      %cst_93 = arith.constant 1.000000e+00 : f32
      %582 = vector.broadcast %cst_93 : f32 to vector<1x128xf32>
      %583 = arith.addf %582, %581 : vector<1x128xf32>
      %cst_94 = arith.constant 1.000000e+00 : f32
      %584 = vector.broadcast %cst_94 : f32 to vector<1x128xf32>
      %585 = arith.divf %584, %583 : vector<1x128xf32>
      %cst_95 = arith.constant 1.06140542 : f32
      %586 = vector.broadcast %cst_95 : f32 to vector<1x128xf32>
      %587 = arith.mulf %585, %586 : vector<1x128xf32>
      %cst_96 = arith.constant -1.45315206 : f32
      %588 = vector.broadcast %cst_96 : f32 to vector<1x128xf32>
      %589 = arith.addf %588, %587 : vector<1x128xf32>
      %590 = arith.mulf %585, %589 : vector<1x128xf32>
      %cst_97 = arith.constant 1.42141378 : f32
      %591 = vector.broadcast %cst_97 : f32 to vector<1x128xf32>
      %592 = arith.addf %591, %590 : vector<1x128xf32>
      %593 = arith.mulf %585, %592 : vector<1x128xf32>
      %cst_98 = arith.constant -0.284496725 : f32
      %594 = vector.broadcast %cst_98 : f32 to vector<1x128xf32>
      %595 = arith.addf %594, %593 : vector<1x128xf32>
      %596 = arith.mulf %585, %595 : vector<1x128xf32>
      %cst_99 = arith.constant 0.254829586 : f32
      %597 = vector.broadcast %cst_99 : f32 to vector<1x128xf32>
      %598 = arith.addf %597, %596 : vector<1x128xf32>
      %599 = arith.mulf %585, %598 : vector<1x128xf32>
      %cst_100 = arith.constant 0.000000e+00 : f32
      %600 = vector.broadcast %cst_100 : f32 to vector<1x128xf32>
      %601 = arith.subf %600, %579 : vector<1x128xf32>
      %602 = arith.mulf %601, %579 : vector<1x128xf32>
      %603 = math.exp %602 : vector<1x128xf32>
      %604 = arith.mulf %599, %603 : vector<1x128xf32>
      %cst_101 = arith.constant 1.000000e+00 : f32
      %605 = vector.broadcast %cst_101 : f32 to vector<1x128xf32>
      %606 = arith.subf %605, %604 : vector<1x128xf32>
      %cst_102 = arith.constant 0.000000e+00 : f32
      %607 = vector.broadcast %cst_102 : f32 to vector<1x128xf32>
      %608 = arith.cmpf oge, %578, %607 : vector<1x128xf32>
      %cst_103 = arith.constant 0.000000e+00 : f32
      %609 = vector.broadcast %cst_103 : f32 to vector<1x128xf32>
      %610 = arith.subf %609, %606 : vector<1x128xf32>
      %611 = arith.select %608, %606, %610 : vector<1x128xi1>, vector<1x128xf32>
      %cst_104 = arith.constant 1.000000e+00 : f32
      %612 = vector.broadcast %cst_104 : f32 to vector<1x128xf32>
      %613 = arith.addf %612, %611 : vector<1x128xf32>
      %614 = arith.mulf %576, %613 : vector<1x128xf32>
      %c68 = arith.constant 68 : index
      %615 = memref.load %arg3[%c68] : memref<139xf32, #tpu.memory_space<smem>>
      %616 = vector.broadcast %615 : f32 to vector<1x128xf32>
      %617 = arith.mulf %300, %616 : vector<1x128xf32>
      %c76 = arith.constant 76 : index
      %618 = memref.load %arg3[%c76] : memref<139xf32, #tpu.memory_space<smem>>
      %619 = vector.broadcast %618 : f32 to vector<1x128xf32>
      %620 = arith.mulf %308, %619 : vector<1x128xf32>
      %621 = arith.addf %617, %620 : vector<1x128xf32>
      %c84 = arith.constant 84 : index
      %622 = memref.load %arg3[%c84] : memref<139xf32, #tpu.memory_space<smem>>
      %623 = vector.broadcast %622 : f32 to vector<1x128xf32>
      %624 = arith.mulf %316, %623 : vector<1x128xf32>
      %625 = arith.addf %621, %624 : vector<1x128xf32>
      %c92 = arith.constant 92 : index
      %626 = memref.load %arg3[%c92] : memref<139xf32, #tpu.memory_space<smem>>
      %627 = vector.broadcast %626 : f32 to vector<1x128xf32>
      %628 = arith.mulf %324, %627 : vector<1x128xf32>
      %629 = arith.addf %625, %628 : vector<1x128xf32>
      %c100 = arith.constant 100 : index
      %630 = memref.load %arg3[%c100] : memref<139xf32, #tpu.memory_space<smem>>
      %631 = vector.broadcast %630 : f32 to vector<1x128xf32>
      %632 = arith.addf %629, %631 : vector<1x128xf32>
      %cst_105 = arith.constant 5.000000e-01 : f32
      %633 = vector.broadcast %cst_105 : f32 to vector<1x128xf32>
      %634 = arith.mulf %633, %632 : vector<1x128xf32>
      %cst_106 = arith.constant 0.707106769 : f32
      %635 = vector.broadcast %cst_106 : f32 to vector<1x128xf32>
      %636 = arith.mulf %632, %635 : vector<1x128xf32>
      %637 = math.absf %636 : vector<1x128xf32>
      %cst_107 = arith.constant 0.327591091 : f32
      %638 = vector.broadcast %cst_107 : f32 to vector<1x128xf32>
      %639 = arith.mulf %638, %637 : vector<1x128xf32>
      %cst_108 = arith.constant 1.000000e+00 : f32
      %640 = vector.broadcast %cst_108 : f32 to vector<1x128xf32>
      %641 = arith.addf %640, %639 : vector<1x128xf32>
      %cst_109 = arith.constant 1.000000e+00 : f32
      %642 = vector.broadcast %cst_109 : f32 to vector<1x128xf32>
      %643 = arith.divf %642, %641 : vector<1x128xf32>
      %cst_110 = arith.constant 1.06140542 : f32
      %644 = vector.broadcast %cst_110 : f32 to vector<1x128xf32>
      %645 = arith.mulf %643, %644 : vector<1x128xf32>
      %cst_111 = arith.constant -1.45315206 : f32
      %646 = vector.broadcast %cst_111 : f32 to vector<1x128xf32>
      %647 = arith.addf %646, %645 : vector<1x128xf32>
      %648 = arith.mulf %643, %647 : vector<1x128xf32>
      %cst_112 = arith.constant 1.42141378 : f32
      %649 = vector.broadcast %cst_112 : f32 to vector<1x128xf32>
      %650 = arith.addf %649, %648 : vector<1x128xf32>
      %651 = arith.mulf %643, %650 : vector<1x128xf32>
      %cst_113 = arith.constant -0.284496725 : f32
      %652 = vector.broadcast %cst_113 : f32 to vector<1x128xf32>
      %653 = arith.addf %652, %651 : vector<1x128xf32>
      %654 = arith.mulf %643, %653 : vector<1x128xf32>
      %cst_114 = arith.constant 0.254829586 : f32
      %655 = vector.broadcast %cst_114 : f32 to vector<1x128xf32>
      %656 = arith.addf %655, %654 : vector<1x128xf32>
      %657 = arith.mulf %643, %656 : vector<1x128xf32>
      %cst_115 = arith.constant 0.000000e+00 : f32
      %658 = vector.broadcast %cst_115 : f32 to vector<1x128xf32>
      %659 = arith.subf %658, %637 : vector<1x128xf32>
      %660 = arith.mulf %659, %637 : vector<1x128xf32>
      %661 = math.exp %660 : vector<1x128xf32>
      %662 = arith.mulf %657, %661 : vector<1x128xf32>
      %cst_116 = arith.constant 1.000000e+00 : f32
      %663 = vector.broadcast %cst_116 : f32 to vector<1x128xf32>
      %664 = arith.subf %663, %662 : vector<1x128xf32>
      %cst_117 = arith.constant 0.000000e+00 : f32
      %665 = vector.broadcast %cst_117 : f32 to vector<1x128xf32>
      %666 = arith.cmpf oge, %636, %665 : vector<1x128xf32>
      %cst_118 = arith.constant 0.000000e+00 : f32
      %667 = vector.broadcast %cst_118 : f32 to vector<1x128xf32>
      %668 = arith.subf %667, %664 : vector<1x128xf32>
      %669 = arith.select %666, %664, %668 : vector<1x128xi1>, vector<1x128xf32>
      %cst_119 = arith.constant 1.000000e+00 : f32
      %670 = vector.broadcast %cst_119 : f32 to vector<1x128xf32>
      %671 = arith.addf %670, %669 : vector<1x128xf32>
      %672 = arith.mulf %634, %671 : vector<1x128xf32>
      %c69 = arith.constant 69 : index
      %673 = memref.load %arg3[%c69] : memref<139xf32, #tpu.memory_space<smem>>
      %674 = vector.broadcast %673 : f32 to vector<1x128xf32>
      %675 = arith.mulf %300, %674 : vector<1x128xf32>
      %c77 = arith.constant 77 : index
      %676 = memref.load %arg3[%c77] : memref<139xf32, #tpu.memory_space<smem>>
      %677 = vector.broadcast %676 : f32 to vector<1x128xf32>
      %678 = arith.mulf %308, %677 : vector<1x128xf32>
      %679 = arith.addf %675, %678 : vector<1x128xf32>
      %c85 = arith.constant 85 : index
      %680 = memref.load %arg3[%c85] : memref<139xf32, #tpu.memory_space<smem>>
      %681 = vector.broadcast %680 : f32 to vector<1x128xf32>
      %682 = arith.mulf %316, %681 : vector<1x128xf32>
      %683 = arith.addf %679, %682 : vector<1x128xf32>
      %c93 = arith.constant 93 : index
      %684 = memref.load %arg3[%c93] : memref<139xf32, #tpu.memory_space<smem>>
      %685 = vector.broadcast %684 : f32 to vector<1x128xf32>
      %686 = arith.mulf %324, %685 : vector<1x128xf32>
      %687 = arith.addf %683, %686 : vector<1x128xf32>
      %c101 = arith.constant 101 : index
      %688 = memref.load %arg3[%c101] : memref<139xf32, #tpu.memory_space<smem>>
      %689 = vector.broadcast %688 : f32 to vector<1x128xf32>
      %690 = arith.addf %687, %689 : vector<1x128xf32>
      %cst_120 = arith.constant 5.000000e-01 : f32
      %691 = vector.broadcast %cst_120 : f32 to vector<1x128xf32>
      %692 = arith.mulf %691, %690 : vector<1x128xf32>
      %cst_121 = arith.constant 0.707106769 : f32
      %693 = vector.broadcast %cst_121 : f32 to vector<1x128xf32>
      %694 = arith.mulf %690, %693 : vector<1x128xf32>
      %695 = math.absf %694 : vector<1x128xf32>
      %cst_122 = arith.constant 0.327591091 : f32
      %696 = vector.broadcast %cst_122 : f32 to vector<1x128xf32>
      %697 = arith.mulf %696, %695 : vector<1x128xf32>
      %cst_123 = arith.constant 1.000000e+00 : f32
      %698 = vector.broadcast %cst_123 : f32 to vector<1x128xf32>
      %699 = arith.addf %698, %697 : vector<1x128xf32>
      %cst_124 = arith.constant 1.000000e+00 : f32
      %700 = vector.broadcast %cst_124 : f32 to vector<1x128xf32>
      %701 = arith.divf %700, %699 : vector<1x128xf32>
      %cst_125 = arith.constant 1.06140542 : f32
      %702 = vector.broadcast %cst_125 : f32 to vector<1x128xf32>
      %703 = arith.mulf %701, %702 : vector<1x128xf32>
      %cst_126 = arith.constant -1.45315206 : f32
      %704 = vector.broadcast %cst_126 : f32 to vector<1x128xf32>
      %705 = arith.addf %704, %703 : vector<1x128xf32>
      %706 = arith.mulf %701, %705 : vector<1x128xf32>
      %cst_127 = arith.constant 1.42141378 : f32
      %707 = vector.broadcast %cst_127 : f32 to vector<1x128xf32>
      %708 = arith.addf %707, %706 : vector<1x128xf32>
      %709 = arith.mulf %701, %708 : vector<1x128xf32>
      %cst_128 = arith.constant -0.284496725 : f32
      %710 = vector.broadcast %cst_128 : f32 to vector<1x128xf32>
      %711 = arith.addf %710, %709 : vector<1x128xf32>
      %712 = arith.mulf %701, %711 : vector<1x128xf32>
      %cst_129 = arith.constant 0.254829586 : f32
      %713 = vector.broadcast %cst_129 : f32 to vector<1x128xf32>
      %714 = arith.addf %713, %712 : vector<1x128xf32>
      %715 = arith.mulf %701, %714 : vector<1x128xf32>
      %cst_130 = arith.constant 0.000000e+00 : f32
      %716 = vector.broadcast %cst_130 : f32 to vector<1x128xf32>
      %717 = arith.subf %716, %695 : vector<1x128xf32>
      %718 = arith.mulf %717, %695 : vector<1x128xf32>
      %719 = math.exp %718 : vector<1x128xf32>
      %720 = arith.mulf %715, %719 : vector<1x128xf32>
      %cst_131 = arith.constant 1.000000e+00 : f32
      %721 = vector.broadcast %cst_131 : f32 to vector<1x128xf32>
      %722 = arith.subf %721, %720 : vector<1x128xf32>
      %cst_132 = arith.constant 0.000000e+00 : f32
      %723 = vector.broadcast %cst_132 : f32 to vector<1x128xf32>
      %724 = arith.cmpf oge, %694, %723 : vector<1x128xf32>
      %cst_133 = arith.constant 0.000000e+00 : f32
      %725 = vector.broadcast %cst_133 : f32 to vector<1x128xf32>
      %726 = arith.subf %725, %722 : vector<1x128xf32>
      %727 = arith.select %724, %722, %726 : vector<1x128xi1>, vector<1x128xf32>
      %cst_134 = arith.constant 1.000000e+00 : f32
      %728 = vector.broadcast %cst_134 : f32 to vector<1x128xf32>
      %729 = arith.addf %728, %727 : vector<1x128xf32>
      %730 = arith.mulf %692, %729 : vector<1x128xf32>
      %c70 = arith.constant 70 : index
      %731 = memref.load %arg3[%c70] : memref<139xf32, #tpu.memory_space<smem>>
      %732 = vector.broadcast %731 : f32 to vector<1x128xf32>
      %733 = arith.mulf %300, %732 : vector<1x128xf32>
      %c78 = arith.constant 78 : index
      %734 = memref.load %arg3[%c78] : memref<139xf32, #tpu.memory_space<smem>>
      %735 = vector.broadcast %734 : f32 to vector<1x128xf32>
      %736 = arith.mulf %308, %735 : vector<1x128xf32>
      %737 = arith.addf %733, %736 : vector<1x128xf32>
      %c86 = arith.constant 86 : index
      %738 = memref.load %arg3[%c86] : memref<139xf32, #tpu.memory_space<smem>>
      %739 = vector.broadcast %738 : f32 to vector<1x128xf32>
      %740 = arith.mulf %316, %739 : vector<1x128xf32>
      %741 = arith.addf %737, %740 : vector<1x128xf32>
      %c94 = arith.constant 94 : index
      %742 = memref.load %arg3[%c94] : memref<139xf32, #tpu.memory_space<smem>>
      %743 = vector.broadcast %742 : f32 to vector<1x128xf32>
      %744 = arith.mulf %324, %743 : vector<1x128xf32>
      %745 = arith.addf %741, %744 : vector<1x128xf32>
      %c102 = arith.constant 102 : index
      %746 = memref.load %arg3[%c102] : memref<139xf32, #tpu.memory_space<smem>>
      %747 = vector.broadcast %746 : f32 to vector<1x128xf32>
      %748 = arith.addf %745, %747 : vector<1x128xf32>
      %cst_135 = arith.constant 5.000000e-01 : f32
      %749 = vector.broadcast %cst_135 : f32 to vector<1x128xf32>
      %750 = arith.mulf %749, %748 : vector<1x128xf32>
      %cst_136 = arith.constant 0.707106769 : f32
      %751 = vector.broadcast %cst_136 : f32 to vector<1x128xf32>
      %752 = arith.mulf %748, %751 : vector<1x128xf32>
      %753 = math.absf %752 : vector<1x128xf32>
      %cst_137 = arith.constant 0.327591091 : f32
      %754 = vector.broadcast %cst_137 : f32 to vector<1x128xf32>
      %755 = arith.mulf %754, %753 : vector<1x128xf32>
      %cst_138 = arith.constant 1.000000e+00 : f32
      %756 = vector.broadcast %cst_138 : f32 to vector<1x128xf32>
      %757 = arith.addf %756, %755 : vector<1x128xf32>
      %cst_139 = arith.constant 1.000000e+00 : f32
      %758 = vector.broadcast %cst_139 : f32 to vector<1x128xf32>
      %759 = arith.divf %758, %757 : vector<1x128xf32>
      %cst_140 = arith.constant 1.06140542 : f32
      %760 = vector.broadcast %cst_140 : f32 to vector<1x128xf32>
      %761 = arith.mulf %759, %760 : vector<1x128xf32>
      %cst_141 = arith.constant -1.45315206 : f32
      %762 = vector.broadcast %cst_141 : f32 to vector<1x128xf32>
      %763 = arith.addf %762, %761 : vector<1x128xf32>
      %764 = arith.mulf %759, %763 : vector<1x128xf32>
      %cst_142 = arith.constant 1.42141378 : f32
      %765 = vector.broadcast %cst_142 : f32 to vector<1x128xf32>
      %766 = arith.addf %765, %764 : vector<1x128xf32>
      %767 = arith.mulf %759, %766 : vector<1x128xf32>
      %cst_143 = arith.constant -0.284496725 : f32
      %768 = vector.broadcast %cst_143 : f32 to vector<1x128xf32>
      %769 = arith.addf %768, %767 : vector<1x128xf32>
      %770 = arith.mulf %759, %769 : vector<1x128xf32>
      %cst_144 = arith.constant 0.254829586 : f32
      %771 = vector.broadcast %cst_144 : f32 to vector<1x128xf32>
      %772 = arith.addf %771, %770 : vector<1x128xf32>
      %773 = arith.mulf %759, %772 : vector<1x128xf32>
      %cst_145 = arith.constant 0.000000e+00 : f32
      %774 = vector.broadcast %cst_145 : f32 to vector<1x128xf32>
      %775 = arith.subf %774, %753 : vector<1x128xf32>
      %776 = arith.mulf %775, %753 : vector<1x128xf32>
      %777 = math.exp %776 : vector<1x128xf32>
      %778 = arith.mulf %773, %777 : vector<1x128xf32>
      %cst_146 = arith.constant 1.000000e+00 : f32
      %779 = vector.broadcast %cst_146 : f32 to vector<1x128xf32>
      %780 = arith.subf %779, %778 : vector<1x128xf32>
      %cst_147 = arith.constant 0.000000e+00 : f32
      %781 = vector.broadcast %cst_147 : f32 to vector<1x128xf32>
      %782 = arith.cmpf oge, %752, %781 : vector<1x128xf32>
      %cst_148 = arith.constant 0.000000e+00 : f32
      %783 = vector.broadcast %cst_148 : f32 to vector<1x128xf32>
      %784 = arith.subf %783, %780 : vector<1x128xf32>
      %785 = arith.select %782, %780, %784 : vector<1x128xi1>, vector<1x128xf32>
      %cst_149 = arith.constant 1.000000e+00 : f32
      %786 = vector.broadcast %cst_149 : f32 to vector<1x128xf32>
      %787 = arith.addf %786, %785 : vector<1x128xf32>
      %788 = arith.mulf %750, %787 : vector<1x128xf32>
      %c103 = arith.constant 103 : index
      %789 = memref.load %arg3[%c103] : memref<139xf32, #tpu.memory_space<smem>>
      %790 = vector.broadcast %789 : f32 to vector<1x128xf32>
      %791 = arith.mulf %382, %790 : vector<1x128xf32>
      %c107 = arith.constant 107 : index
      %792 = memref.load %arg3[%c107] : memref<139xf32, #tpu.memory_space<smem>>
      %793 = vector.broadcast %792 : f32 to vector<1x128xf32>
      %794 = arith.mulf %440, %793 : vector<1x128xf32>
      %795 = arith.addf %791, %794 : vector<1x128xf32>
      %c111 = arith.constant 111 : index
      %796 = memref.load %arg3[%c111] : memref<139xf32, #tpu.memory_space<smem>>
      %797 = vector.broadcast %796 : f32 to vector<1x128xf32>
      %798 = arith.mulf %498, %797 : vector<1x128xf32>
      %799 = arith.addf %795, %798 : vector<1x128xf32>
      %c115 = arith.constant 115 : index
      %800 = memref.load %arg3[%c115] : memref<139xf32, #tpu.memory_space<smem>>
      %801 = vector.broadcast %800 : f32 to vector<1x128xf32>
      %802 = arith.mulf %556, %801 : vector<1x128xf32>
      %803 = arith.addf %799, %802 : vector<1x128xf32>
      %c119 = arith.constant 119 : index
      %804 = memref.load %arg3[%c119] : memref<139xf32, #tpu.memory_space<smem>>
      %805 = vector.broadcast %804 : f32 to vector<1x128xf32>
      %806 = arith.mulf %614, %805 : vector<1x128xf32>
      %807 = arith.addf %803, %806 : vector<1x128xf32>
      %c123 = arith.constant 123 : index
      %808 = memref.load %arg3[%c123] : memref<139xf32, #tpu.memory_space<smem>>
      %809 = vector.broadcast %808 : f32 to vector<1x128xf32>
      %810 = arith.mulf %672, %809 : vector<1x128xf32>
      %811 = arith.addf %807, %810 : vector<1x128xf32>
      %c127 = arith.constant 127 : index
      %812 = memref.load %arg3[%c127] : memref<139xf32, #tpu.memory_space<smem>>
      %813 = vector.broadcast %812 : f32 to vector<1x128xf32>
      %814 = arith.mulf %730, %813 : vector<1x128xf32>
      %815 = arith.addf %811, %814 : vector<1x128xf32>
      %c131 = arith.constant 131 : index
      %816 = memref.load %arg3[%c131] : memref<139xf32, #tpu.memory_space<smem>>
      %817 = vector.broadcast %816 : f32 to vector<1x128xf32>
      %818 = arith.mulf %788, %817 : vector<1x128xf32>
      %819 = arith.addf %815, %818 : vector<1x128xf32>
      %820 = arith.addf %264, %819 : vector<1x128xf32>
      %c135 = arith.constant 135 : index
      %821 = memref.load %arg3[%c135] : memref<139xf32, #tpu.memory_space<smem>>
      %822 = vector.broadcast %821 : f32 to vector<1x128xf32>
      %823 = arith.addf %820, %822 : vector<1x128xf32>
      %c104 = arith.constant 104 : index
      %824 = memref.load %arg3[%c104] : memref<139xf32, #tpu.memory_space<smem>>
      %825 = vector.broadcast %824 : f32 to vector<1x128xf32>
      %826 = arith.mulf %382, %825 : vector<1x128xf32>
      %c108 = arith.constant 108 : index
      %827 = memref.load %arg3[%c108] : memref<139xf32, #tpu.memory_space<smem>>
      %828 = vector.broadcast %827 : f32 to vector<1x128xf32>
      %829 = arith.mulf %440, %828 : vector<1x128xf32>
      %830 = arith.addf %826, %829 : vector<1x128xf32>
      %c112 = arith.constant 112 : index
      %831 = memref.load %arg3[%c112] : memref<139xf32, #tpu.memory_space<smem>>
      %832 = vector.broadcast %831 : f32 to vector<1x128xf32>
      %833 = arith.mulf %498, %832 : vector<1x128xf32>
      %834 = arith.addf %830, %833 : vector<1x128xf32>
      %c116 = arith.constant 116 : index
      %835 = memref.load %arg3[%c116] : memref<139xf32, #tpu.memory_space<smem>>
      %836 = vector.broadcast %835 : f32 to vector<1x128xf32>
      %837 = arith.mulf %556, %836 : vector<1x128xf32>
      %838 = arith.addf %834, %837 : vector<1x128xf32>
      %c120 = arith.constant 120 : index
      %839 = memref.load %arg3[%c120] : memref<139xf32, #tpu.memory_space<smem>>
      %840 = vector.broadcast %839 : f32 to vector<1x128xf32>
      %841 = arith.mulf %614, %840 : vector<1x128xf32>
      %842 = arith.addf %838, %841 : vector<1x128xf32>
      %c124 = arith.constant 124 : index
      %843 = memref.load %arg3[%c124] : memref<139xf32, #tpu.memory_space<smem>>
      %844 = vector.broadcast %843 : f32 to vector<1x128xf32>
      %845 = arith.mulf %672, %844 : vector<1x128xf32>
      %846 = arith.addf %842, %845 : vector<1x128xf32>
      %c128 = arith.constant 128 : index
      %847 = memref.load %arg3[%c128] : memref<139xf32, #tpu.memory_space<smem>>
      %848 = vector.broadcast %847 : f32 to vector<1x128xf32>
      %849 = arith.mulf %730, %848 : vector<1x128xf32>
      %850 = arith.addf %846, %849 : vector<1x128xf32>
      %c132 = arith.constant 132 : index
      %851 = memref.load %arg3[%c132] : memref<139xf32, #tpu.memory_space<smem>>
      %852 = vector.broadcast %851 : f32 to vector<1x128xf32>
      %853 = arith.mulf %788, %852 : vector<1x128xf32>
      %854 = arith.addf %850, %853 : vector<1x128xf32>
      %855 = arith.addf %265, %854 : vector<1x128xf32>
      %c136 = arith.constant 136 : index
      %856 = memref.load %arg3[%c136] : memref<139xf32, #tpu.memory_space<smem>>
      %857 = vector.broadcast %856 : f32 to vector<1x128xf32>
      %858 = arith.addf %855, %857 : vector<1x128xf32>
      %c105 = arith.constant 105 : index
      %859 = memref.load %arg3[%c105] : memref<139xf32, #tpu.memory_space<smem>>
      %860 = vector.broadcast %859 : f32 to vector<1x128xf32>
      %861 = arith.mulf %382, %860 : vector<1x128xf32>
      %c109 = arith.constant 109 : index
      %862 = memref.load %arg3[%c109] : memref<139xf32, #tpu.memory_space<smem>>
      %863 = vector.broadcast %862 : f32 to vector<1x128xf32>
      %864 = arith.mulf %440, %863 : vector<1x128xf32>
      %865 = arith.addf %861, %864 : vector<1x128xf32>
      %c113 = arith.constant 113 : index
      %866 = memref.load %arg3[%c113] : memref<139xf32, #tpu.memory_space<smem>>
      %867 = vector.broadcast %866 : f32 to vector<1x128xf32>
      %868 = arith.mulf %498, %867 : vector<1x128xf32>
      %869 = arith.addf %865, %868 : vector<1x128xf32>
      %c117 = arith.constant 117 : index
      %870 = memref.load %arg3[%c117] : memref<139xf32, #tpu.memory_space<smem>>
      %871 = vector.broadcast %870 : f32 to vector<1x128xf32>
      %872 = arith.mulf %556, %871 : vector<1x128xf32>
      %873 = arith.addf %869, %872 : vector<1x128xf32>
      %c121 = arith.constant 121 : index
      %874 = memref.load %arg3[%c121] : memref<139xf32, #tpu.memory_space<smem>>
      %875 = vector.broadcast %874 : f32 to vector<1x128xf32>
      %876 = arith.mulf %614, %875 : vector<1x128xf32>
      %877 = arith.addf %873, %876 : vector<1x128xf32>
      %c125 = arith.constant 125 : index
      %878 = memref.load %arg3[%c125] : memref<139xf32, #tpu.memory_space<smem>>
      %879 = vector.broadcast %878 : f32 to vector<1x128xf32>
      %880 = arith.mulf %672, %879 : vector<1x128xf32>
      %881 = arith.addf %877, %880 : vector<1x128xf32>
      %c129 = arith.constant 129 : index
      %882 = memref.load %arg3[%c129] : memref<139xf32, #tpu.memory_space<smem>>
      %883 = vector.broadcast %882 : f32 to vector<1x128xf32>
      %884 = arith.mulf %730, %883 : vector<1x128xf32>
      %885 = arith.addf %881, %884 : vector<1x128xf32>
      %c133 = arith.constant 133 : index
      %886 = memref.load %arg3[%c133] : memref<139xf32, #tpu.memory_space<smem>>
      %887 = vector.broadcast %886 : f32 to vector<1x128xf32>
      %888 = arith.mulf %788, %887 : vector<1x128xf32>
      %889 = arith.addf %885, %888 : vector<1x128xf32>
      %890 = arith.addf %266, %889 : vector<1x128xf32>
      %c137 = arith.constant 137 : index
      %891 = memref.load %arg3[%c137] : memref<139xf32, #tpu.memory_space<smem>>
      %892 = vector.broadcast %891 : f32 to vector<1x128xf32>
      %893 = arith.addf %890, %892 : vector<1x128xf32>
      %c106 = arith.constant 106 : index
      %894 = memref.load %arg3[%c106] : memref<139xf32, #tpu.memory_space<smem>>
      %895 = vector.broadcast %894 : f32 to vector<1x128xf32>
      %896 = arith.mulf %382, %895 : vector<1x128xf32>
      %c110 = arith.constant 110 : index
      %897 = memref.load %arg3[%c110] : memref<139xf32, #tpu.memory_space<smem>>
      %898 = vector.broadcast %897 : f32 to vector<1x128xf32>
      %899 = arith.mulf %440, %898 : vector<1x128xf32>
      %900 = arith.addf %896, %899 : vector<1x128xf32>
      %c114 = arith.constant 114 : index
      %901 = memref.load %arg3[%c114] : memref<139xf32, #tpu.memory_space<smem>>
      %902 = vector.broadcast %901 : f32 to vector<1x128xf32>
      %903 = arith.mulf %498, %902 : vector<1x128xf32>
      %904 = arith.addf %900, %903 : vector<1x128xf32>
      %c118 = arith.constant 118 : index
      %905 = memref.load %arg3[%c118] : memref<139xf32, #tpu.memory_space<smem>>
      %906 = vector.broadcast %905 : f32 to vector<1x128xf32>
      %907 = arith.mulf %556, %906 : vector<1x128xf32>
      %908 = arith.addf %904, %907 : vector<1x128xf32>
      %c122 = arith.constant 122 : index
      %909 = memref.load %arg3[%c122] : memref<139xf32, #tpu.memory_space<smem>>
      %910 = vector.broadcast %909 : f32 to vector<1x128xf32>
      %911 = arith.mulf %614, %910 : vector<1x128xf32>
      %912 = arith.addf %908, %911 : vector<1x128xf32>
      %c126 = arith.constant 126 : index
      %913 = memref.load %arg3[%c126] : memref<139xf32, #tpu.memory_space<smem>>
      %914 = vector.broadcast %913 : f32 to vector<1x128xf32>
      %915 = arith.mulf %672, %914 : vector<1x128xf32>
      %916 = arith.addf %912, %915 : vector<1x128xf32>
      %c130 = arith.constant 130 : index
      %917 = memref.load %arg3[%c130] : memref<139xf32, #tpu.memory_space<smem>>
      %918 = vector.broadcast %917 : f32 to vector<1x128xf32>
      %919 = arith.mulf %730, %918 : vector<1x128xf32>
      %920 = arith.addf %916, %919 : vector<1x128xf32>
      %c134 = arith.constant 134 : index
      %921 = memref.load %arg3[%c134] : memref<139xf32, #tpu.memory_space<smem>>
      %922 = vector.broadcast %921 : f32 to vector<1x128xf32>
      %923 = arith.mulf %788, %922 : vector<1x128xf32>
      %924 = arith.addf %920, %923 : vector<1x128xf32>
      %925 = arith.addf %267, %924 : vector<1x128xf32>
      %c138 = arith.constant 138 : index
      %926 = memref.load %arg3[%c138] : memref<139xf32, #tpu.memory_space<smem>>
      %927 = vector.broadcast %926 : f32 to vector<1x128xf32>
      %928 = arith.addf %925, %927 : vector<1x128xf32>
      %c0_150 = arith.constant 0 : index
      %c0_151 = arith.constant 0 : index
      %c0_152 = arith.constant 0 : index
      %929 = vector.load %arg8[%c0_150, %c0_151, %c0_152] : memref<1x6x128xf32, #tpu.memory_space<vmem>>, vector<1x1x128xf32>
      %930 = vector.shape_cast %929 : vector<1x1x128xf32> to vector<1x128xf32>
      %931 = vector.shape_cast %823 : vector<1x128xf32> to vector<1x1x128xf32>
      tpu.vector_store %arg8[%c0_150, %c0_151, %c0_152], %931 {strides = array<i32>} : memref<1x6x128xf32, #tpu.memory_space<vmem>>, vector<1x1x128xf32>,
      %c0_153 = arith.constant 0 : index
      %c1_154 = arith.constant 1 : index
      %c0_155 = arith.constant 0 : index
      %932 = vector.load %arg8[%c0_153, %c1_154, %c0_155] : memref<1x6x128xf32, #tpu.memory_space<vmem>>, vector<1x1x128xf32>
      %933 = vector.shape_cast %932 : vector<1x1x128xf32> to vector<1x128xf32>
      %934 = vector.shape_cast %858 : vector<1x128xf32> to vector<1x1x128xf32>
      tpu.vector_store %arg8[%c0_153, %c1_154, %c0_155], %934 {strides = array<i32>} : memref<1x6x128xf32, #tpu.memory_space<vmem>>, vector<1x1x128xf32>,
      %c0_156 = arith.constant 0 : index
      %c2_157 = arith.constant 2 : index
      %c0_158 = arith.constant 0 : index
      %935 = vector.load %arg8[%c0_156, %c2_157, %c0_158] : memref<1x6x128xf32, #tpu.memory_space<vmem>>, vector<1x1x128xf32>
      %936 = vector.shape_cast %935 : vector<1x1x128xf32> to vector<1x128xf32>
      %937 = vector.shape_cast %893 : vector<1x128xf32> to vector<1x1x128xf32>
      tpu.vector_store %arg8[%c0_156, %c2_157, %c0_158], %937 {strides = array<i32>} : memref<1x6x128xf32, #tpu.memory_space<vmem>>, vector<1x1x128xf32>,
      %c0_159 = arith.constant 0 : index
      %c3_160 = arith.constant 3 : index
      %c0_161 = arith.constant 0 : index
      %938 = vector.load %arg8[%c0_159, %c3_160, %c0_161] : memref<1x6x128xf32, #tpu.memory_space<vmem>>, vector<1x1x128xf32>
      %939 = vector.shape_cast %938 : vector<1x1x128xf32> to vector<1x128xf32>
      %940 = vector.shape_cast %928 : vector<1x128xf32> to vector<1x1x128xf32>
      tpu.vector_store %arg8[%c0_159, %c3_160, %c0_161], %940 {strides = array<i32>} : memref<1x6x128xf32, #tpu.memory_space<vmem>>, vector<1x1x128xf32>,
      %c0_162 = arith.constant 0 : index
      %c4_163 = arith.constant 4 : index
      %c0_164 = arith.constant 0 : index
      %941 = vector.load %arg8[%c0_162, %c4_163, %c0_164] : memref<1x6x128xf32, #tpu.memory_space<vmem>>, vector<1x1x128xf32>
      %942 = vector.shape_cast %941 : vector<1x1x128xf32> to vector<1x128xf32>
      %943 = vector.shape_cast %262 : vector<1x128xf32> to vector<1x1x128xf32>
      tpu.vector_store %arg8[%c0_162, %c4_163, %c0_164], %943 {strides = array<i32>} : memref<1x6x128xf32, #tpu.memory_space<vmem>>, vector<1x1x128xf32>,
      %c0_165 = arith.constant 0 : index
      %c5_166 = arith.constant 5 : index
      %c0_167 = arith.constant 0 : index
      %944 = vector.load %arg8[%c0_165, %c5_166, %c0_167] : memref<1x6x128xf32, #tpu.memory_space<vmem>>, vector<1x1x128xf32>
      %945 = vector.shape_cast %944 : vector<1x1x128xf32> to vector<1x128xf32>
      %946 = vector.shape_cast %263 : vector<1x128xf32> to vector<1x1x128xf32>
      tpu.vector_store %arg8[%c0_165, %c5_166, %c0_167], %946 {strides = array<i32>} : memref<1x6x128xf32, #tpu.memory_space<vmem>>, vector<1x1x128xf32>,
    } else {
    }
    return
  }
  func.func @transform_0(%arg0: i32, %arg1: i32, %arg2: i32) -> i32 {
    %c0_i32 = arith.constant 0 : i32
    %c0_i32_0 = arith.constant 0 : i32
    return %c0_i32 : i32
  }
  func.func @transform_1(%arg0: i32, %arg1: i32, %arg2: i32) -> (i32, i32) {
    %c0_i32 = arith.constant 0 : i32
    %c0_i32_0 = arith.constant 0 : i32
    %c0_i32_1 = arith.constant 0 : i32
    return %c0_i32, %c0_i32_0 : i32, i32
  }
  func.func @transform_2(%arg0: i32, %arg1: i32, %arg2: i32) -> (i32, i32, i32) {
    %c0_i32 = arith.constant 0 : i32
    %c0_i32_0 = arith.constant 0 : i32
    return %arg0, %c0_i32, %arg1 : i32, i32, i32
  }
  func.func @transform_3(%arg0: i32, %arg1: i32, %arg2: i32) -> (i32, i32, i32) {
    %c0_i32 = arith.constant 0 : i32
    %c0_i32_0 = arith.constant 0 : i32
    return %arg0, %c0_i32, %arg2 : i32, i32, i32
  }
  func.func @transform_4(%arg0: i32, %arg1: i32, %arg2: i32) -> (i32, i32, i32) {
    %c0_i32 = arith.constant 0 : i32
    %c0_i32_0 = arith.constant 0 : i32
    return %arg0, %arg2, %c0_i32 : i32, i32, i32
  }
  func.func @transform_5(%arg0: i32, %arg1: i32, %arg2: i32) -> (i32, i32, i32) {
    %c0_i32 = arith.constant 0 : i32
    %c0_i32_0 = arith.constant 0 : i32
    return %arg0, %c0_i32, %arg1 : i32, i32, i32
  }
}

</mosaic_0001>

<bundles_post_ra>
// kernel: flow_attention.1
= control target key start
LH: loop header
LB: loop body
LE: loop exit
PB: predicated region body
PF: predicated region fallthrough
CT: control target
= control target key end

     0   :  { %s3579_s0 = inlined_call_operand.vmem [shape: f32[139], index: 0, kind: input, shape index: {}]   ;;  %s3580_s1 = inlined_call_operand.vmem [shape: f32[2,2], index: 1, kind: input, shape index: {}]   ;;  %s3581_s2 = inlined_call_operand.vmem [shape: f32[2,6,256], index: 2, kind: input, shape index: {}]   ;;  %s3582_s3 = inlined_call_operand.vmem [shape: bf16[2,8,256], index: 3, kind: input, shape index: {}]   ;;  %s3583_s4 = inlined_call_operand.vmem [shape: f32[2,256,8], index: 4, kind: input, shape index: {}]   ;;  %s3584_s5 = inlined_call_operand.vmem [shape: f32[2,6,256], index: 5, kind: output, shape index: {}]  }
   0x1   :  { %3588 = sst [smem:[#allocation16_spill]] %s3579_s0 }
   0x2   :  { %3589 = sst [smem:[#allocation17_spill]] %s3580_s1 }
   0x3   :  { %3590 = sst [smem:[#allocation18_spill]] %s3581_s2 }
   0x4   :  { %3591 = sst [smem:[#allocation19_spill]] %s3582_s3 }
   0x5   :  { %3592 = sst [smem:[#allocation20_spill]] %s3583_s4 }
   0x6   :  { %3593 = sst [smem:[#allocation21_spill]] %s3584_s5 }
   0x7   :  { %10 = vsyncpa [#allocation5], 0 }
   0x8   :  { %11 = vsyncpa [#allocation7], 0  ;;  %s2432_s18 = smov 0   ;;  %s2434_s19 = smov 0  }
   0x9   :  { %s2436_s20 = smov 0   ;;  %s2438_s21 = smov 0  }
   0xa   :  { %s2440_s22 = smov 0   ;;  %s2442_s23 = smov 0  }
   0xb   :  { %s2444_s24 = smov 0  }
   0xc LB: > { %3594 = sst [smem:[#allocation10_spill]] %s2384_s21  ;;  %s1980_s25 = sadd.s32 4294967295, %s2396_s24   ;;  %s2396_s24 = sphi %s2444_s24, %s17_s24   ;;  %s2392_s23 = sphi %s2442_s23, %s3641_s23   ;;  %s2388_s22 = sphi %s2440_s22, %s3640_s22   ;;  %s2384_s21 = sphi %s2438_s21, %s3639_s21   ;;  %s2380_s20 = sphi %s2436_s20, %s3638_s20   ;;  %s2376_s19 = sphi %s2434_s19, %s3637_s19   ;;  %s2372_s18 = sphi %s2432_s18, %s3636_s18  }
   0xd   : > { %3595 = sst [smem:[#allocation11_spill]] %s2388_s22  ;;  %s29_s26 = sadd.s32 1, %s2384_s21 }
   0xe   : > { %3596 = sst [smem:[#allocation12_spill]] %s2392_s23  ;;  %p30_p0 = scmp.ge.s32.totalorder %s29_s26, 2 }
   0xf   : > { %s32_s27 = sadd.s32 1, %s2388_s22  ;;  %s36_s28 = sadd.s32 1, %s2392_s23 }
  0x10   : > { %p1982_p1 = scmp.ge.s32.totalorder %s2396_s24, 1  ;;  %s3643_s26 = smov (%p30_p0, %s29_s26), 0 }
  0x11   : > { %3597 = sst [smem:[#allocation13_spill]] %s3643_s26  ;;  %s3645_s27 = smov (!%p30_p0, %s32_s27), %s2388_s22 }
  0x12   : > { %p195_p2 = scmp.lt.s32.totalorder %s2396_s24, 9  ;;  %p34_p3 = scmp.ge.s32.totalorder %s3645_s27, 2 }
  0x13   : > { %p2476_p4 = scmp.eq.s32.totalorder %s1980_s25, 0  ;;  %s3600_s0 = sld [smem:[#allocation16_spill]] }
  0x14   : > { %p2480_p5 = pnand %p1982_p1, %p195_p2  ;;  %s3647_s27 = smov (%p34_p3, %s3645_s27), 0 }
  0x15   : > { %3601 = sst [smem:[#allocation14_spill]] %s3647_s27  ;;  %s3649_s28 = smov (!%p34_p3, %s36_s28), %s2392_s23 }
  0x16   : > { %p2156_p6 = pneg %p2480_p5  ;;  %p38_p7 = scmp.ge.s32.totalorder %s3649_s28, 2 }
  0x17   : > { %s3602_s1 = sld [smem:[#allocation17_spill]]  ;;  %s2398_s12 = smov [#allocation4]  }
  0x18   : > { %p2157_p8 = pnand %p2476_p4, %p2156_p6  ;;  %s3651_s28 = smov (%p38_p7, %s3649_s28), 0 }
  0x19   : > { %s207_s8 = sshll.u32 %s3600_s0, 4  ;;  %3603 = sst [smem:[#allocation15_spill]] %s3651_s28  ;;  %s208_s8 = int_to_ptr.vmem [resolvable:$true] %s207_s8 }
  0x1a   : > { %2159 = dma.vmem_to_smem (!%p2157_p8), %s208_s8, 32, %s2398_s12, [#allocation5]  }
  0x1b   : > { %s2399_s13 = smov [#allocation6]   ;;  %265 = sbr.rel (%p2480_p5) target bundleno = 693 (0x2b5), region = 40 }
  0x1d   : > { %s217_s11 = sshll.u32 %s3602_s1, 4  ;;  %s218_s11 = int_to_ptr.vmem [resolvable:$true] %s217_s11 }
  0x1e   : > { %2162 = dma.vmem_to_smem (!%p2157_p8), %s218_s11, 32, %s2399_s13, [#allocation7]  }
  0x20   : > { %2363 = dma.done.wait (%p2476_p4), [#allocation5], 32  }
  0x21   : > { %2365 = vsyncadd (%p2476_p4), [#allocation5], 4294967264 }
  0x22   : > { %2367 = dma.done.wait (%p2476_p4), [#allocation7], 32  }
  0x23   : > { %2369 = vsyncadd (%p2476_p4), [#allocation7], 4294967264 }
  0x24   : > { %277 = sfence }
  0x25   : > { %p323_p9 = scmp.lt.s32.totalorder %s2380_s20, 1  ;;  %p325_p10 = scmp.lt.s32.totalorder %s2376_s19, 1 }
  0x26   : > { %s1993_s14 = sshll.u32 %s2372_s18, 4  ;;  %p333_p11 = scmp.lt.s32.totalorder %s2372_s18, 1 }
  0x27   : > { %s324_s15 = scalar_select %p323_p9, %s2380_s20, 1 }
  0x28   : > { %s3653_s19 = smov (!%p325_p10, %s2376_s19), 1  ;;  %p342_p12 = scmp.lt.s32.totalorder %s1993_s14, 31 }
  0x29   : > { %s1989_s16 = sshll.u32 %s324_s15, 1  ;;  %s1994_s29 = sshll.u32 %s324_s15, 5 }
  0x2a   : > { %s328_s17 = sadd.s32 %s1989_s16, %s3653_s19  ;;  %s3604_s2 = sld [smem:[#allocation18_spill]] }
  0x2b   : > { %s1990_s25 = sshll.u32 %s328_s17, 3  ;;  %s3605_s5 = sld [smem:[#allocation21_spill]] }
  0x2c   : > { %s334_s11 = scalar_select %p333_p11, %s2372_s18, 1 }
  0x2d   : > { %s3655_s14 = smov (!%p342_p12, %s1993_s14), 31  ;;  %s3606_s3 = sld [smem:[#allocation19_spill]] }
  0x2e   : > { %s336_s12 = sadd.s32 %s1989_s16, %s334_s11  ;;  %s345_s0 = sadd.s32 %s1994_s29, %s3655_s14 }
  0x2f   : > { %s1992_s13 = sshll.u32 %s336_s12, 2  ;;  %s1995_s15 = sshll.u32 %s345_s0, 3 }
  0x30   : > { %s2518_s7 = scalar_lea.vmem %s3604_s2, %s1990_s25  ;;  %s3607_s4 = sld [smem:[#allocation20_spill]] }
  0x31   : > { %s2523_s10 = scalar_lea.vmem %s3605_s5, %s1990_s25  ;;  %p1998_p13 = scmp.ne.s32.totalorder %s2372_s18, 0 }
  0x32   : > { %s2538_s0 = sld [smem:[#allocation4]] (!%p1998_p13)  ;;  %s2011_s19 = sshll.u32 (!%p1998_p13), %s2380_s20, 7 }
  0x33   : > { %s2529_s17 = scalar_lea.vmem %s3606_s3, %s1992_s13  ;;  %360 = sbr.rel (%p1998_p13) target bundleno = 128 (0x80), region = 52 }
  0x34   : > { %s2540_s1 = sld [smem:[#allocation4 + $0x4]] (!%p1998_p13) }
  0x35   : > { %s2542_s28 = sld [smem:[#allocation4 + $0x1]] (!%p1998_p13) }
  0x36   : > { %s2534_s6 = scalar_lea.vmem %s3607_s4, %s1995_s15  ;;  %s2544_s14 = sld [smem:[#allocation4 + $0x5]] (!%p1998_p13) }
  0x37   : > { %s2546_s16 = sld [smem:[#allocation4 + $0x2]] (!%p1998_p13)  ;;  %s477_s15 = sadd.s32 (!%p1998_p13), 1, %s2011_s19 }
  0x38   : > { %v362_v0 = vld [vmem:[%s2518_s7] sm:$0x3f]  ;;  %v2400_v1 = vmov 0.0   ;;  %s2548_s25 = sld [smem:[#allocation4 + $0x6]]  ;;  %v415_v35 = vstv %s2538_s0 }
  0x39   : > { %361 = vst [vmem:[#allocation2] sm:$0xff] %v2400_v1  ;;  %v364_v2 = vrot.slane %v362_v0, 1  ;;  %v367_v3 = vrot.slane %v362_v0, 2  ;;  %v370_v5 = vrot.slane %v362_v0, 3  ;;  %s2550_s29 = sld [smem:[#allocation4 + $0x3]] }
  0x3a   : > { %s2552_s8 = sld [smem:[#allocation4 + $0x7]]  ;;  %v418_v40 = vstv %s2540_s1 }
  0x3b   : > { %v366_v4 = vadd.f32 %v364_v2, %v362_v0  ;;  %s2554_s9 = sld [smem:[#allocation4 + $0x8]]  ;;  %v425_v41 = vstv %s2542_s28 }
  0x3c   : > { %s2556_s11 = sld [smem:[#allocation4 + $0x9]]  ;;  %v428_v48 = vstv %s2544_s14 }
  0x3d   : > { %v369_v6 = vadd.f32 %v367_v3, %v366_v4  ;;  %s2558_s12 = sld [smem:[#allocation4 + $0xa]]  ;;  %v434_v42 = vstv %s2546_s16 }
  0x3e   : > { %s2560_s13 = sld [smem:[#allocation4 + $0xb]]  ;;  %v437_v49 = vstv %s2548_s25 }
  0x3f   : > { %v372_v7 = vadd.f32 %v370_v5, %v369_v6  ;;  %v443_v43 = vstv %s2550_s29  ;;  %s2010_s30 = sld [smem:[#allocation4 + $0xc]] }
  0x40   : > { %v446_v50 = vstv %s2552_s8  ;;  %s476_s0 = sld [smem:[#allocation6 + %s2011_s19]] }
  0x41   : > { %v373_v8 = vmul.f32 0.25, %v372_v7  ;;  %v449_v55 = vstv %s2554_s9  ;;  %s478_s1 = sld [smem:[#allocation6 + %s477_s15]] }
  0x42   : > { %v452_v56 = vstv %s2556_s11 }
  0x43   : > { %v374_v9 = vsub.f32 %v362_v0, %v373_v8  ;;  %v377_v10 = vrot.slane %v373_v8, 7  ;;  %v385_v11 = vrot.slane %v373_v8, 6  ;;  %v393_v12 = vrot.slane %v373_v8, 5 }
  0x44   : > { %v459_v57 = vstv %s2558_s12  ;;  %v466_v58 = vstv %s2560_s13 }
  0x45   : > { %v379_v13 = vsub.f32 %v362_v0, %v377_v10  ;;  %v387_v14 = vsub.f32 %v362_v0, %v385_v11  ;;  %v395_v15 = vsub.f32 %v362_v0, %v393_v12  ;;  %v375_v16 = vmul.f32 %v374_v9, %v374_v9 }
  0x46   : > { %v473_v7 = vstv %s2010_s30 }
  0x47   : > { %v380_v17 = vmul.f32 %v379_v13, %v379_v13  ;;  %v388_v18 = vmul.f32 %v387_v14, %v387_v14  ;;  %v396_v19 = vmul.f32 %v395_v15, %v395_v15  ;;  %v482_v10 = vstv %s478_s1 }
  0x49   : > { %v382_v20 = vrot.slane %v380_v17, 1  ;;  %v390_v21 = vrot.slane %v388_v18, 2  ;;  %v398_v23 = vrot.slane %v396_v19, 3 }
  0x4b   : > { %v384_v22 = vadd.f32 %v382_v20, %v375_v16 }
  0x4d   : > { %v392_v24 = vadd.f32 %v390_v21, %v384_v22 }
  0x4f   : > { %v400_v25 = vadd.f32 %v398_v23, %v392_v24 }
  0x51   : > { %v401_v26 = vmul.f32 0.25, %v400_v25 }
  0x53   : > { %v402_v27 = vadd.f32 1e-05, %v401_v26 }
  0x55   : > { %2227 = vrsqrt.f32 %v402_v27  ;;  %vm409_vm0 = vweird.f32 %v402_v27 }
  0x5b   : > { %v2228_v28 = vpop.eup %2227 }
  0x5c   : > { %v404_v29 = vmul.f32 %v2228_v28, %v402_v27  ;;  %vm410_vm1 = vweird.f32 %v2228_v28 }
  0x5d   : > { %vm411_vm2 = vmor %vm409_vm0, %vm410_vm1 }
  0x5e   : > { %v405_v30 = vmul.f32 %v2228_v28, %v404_v29 }
  0x60   : > { %v406_v31 = vmul.f32 0.5, %v405_v30 }
  0x62   : > { %v407_v32 = vsub.f32 1.5, %v406_v31 }
  0x64   : > { %v408_v33 = vmul.f32 %v2228_v28, %v407_v32 }
  0x66   : > { %v412_v34 = vsel %vm411_vm2, %v2228_v28, %v408_v33 }
  0x67   : > { %v413_v36 = vmul.f32 %v412_v34, %v374_v9  ;;  %v421_v37 = vrot.slane %v412_v34, 7  ;;  %v430_v38 = vrot.slane %v412_v34, 6  ;;  %v439_v39 = vrot.slane %v412_v34, 5 }
  0x68   : > { %v480_v9 = vstv %s476_s0 }
  0x69   : > { %v416_v44 = vmul.f32 %v415_v35, %v413_v36  ;;  %v423_v45 = vmul.f32 %v421_v37, %v379_v13  ;;  %v432_v46 = vmul.f32 %v430_v38, %v387_v14  ;;  %v441_v47 = vmul.f32 %v439_v39, %v395_v15 }
  0x6b   : > { %v419_v51 = vadd.f32 %v418_v40, %v416_v44  ;;  %v426_v52 = vmul.f32 %v425_v41, %v423_v45  ;;  %v435_v53 = vmul.f32 %v434_v42, %v432_v46  ;;  %v444_v54 = vmul.f32 %v443_v43, %v441_v47 }
  0x6d   : > { %v429_v59 = vadd.f32 %v428_v48, %v426_v52  ;;  %v438_v60 = vadd.f32 %v437_v49, %v435_v53  ;;  %v447_v61 = vadd.f32 %v446_v50, %v444_v54  ;;  %v450_v62 = vmul.f32 %v449_v55, %v419_v51 }
  0x6f   : > { %v453_v63 = vmul.f32 %v452_v56, %v429_v59  ;;  %v460_v0 = vmul.f32 %v459_v57, %v438_v60  ;;  %v467_v1 = vmul.f32 %v466_v58, %v447_v61 }
  0x71   : > { %v455_v2 = vrot.slane %v453_v63, 1  ;;  %v462_v3 = vrot.slane %v460_v0, 2  ;;  %v469_v5 = vrot.slane %v467_v1, 3 }
  0x73   : > { %v457_v4 = vadd.f32 %v455_v2, %v450_v62 }
  0x75   : > { %v464_v6 = vadd.f32 %v462_v3, %v457_v4 }
  0x77   : > { %v471_v8 = vadd.f32 %v469_v5, %v464_v6 }
  0x79   : > { %v474_v11 = vadd.f32 %v473_v7, %v471_v8 }
  0x7b   : > { %479 = vst [vmem:[#allocation3] sm:$0x1] %v474_v11  ;;  %v481_v12 = vmul.f32 %v480_v9, %v474_v11  ;;  %v483_v13 = vmul.f32 %v482_v10, %v474_v11 }
  0x7d   : > { %v484_v14 = vmax.f32 %v481_v12, %v483_v13 }
  0x7f   : > { %485 = vst [vmem:[#allocation3 + $0x1] sm:$0x1] %v484_v14 }
  0x80 PF: > { %v503_v15 = vld [vmem:[%s2534_s6 + $0x70] sm:$0xff]  ;;  %v501_v16 = vld [vmem:[%s2534_s6 + $0x60] sm:$0xff]  ;;  %v2401_v18 = vmov 0   ;;  %v502_v19 = vld [vmem:[%s2534_s6 + $0x68] sm:$0xff]  ;;  %p2012_p0 = scmp.ne.s32.totalorder %s2372_s18, 1 }
  0x81   : > { %v499_v17 = vld [vmem:[%s2534_s6 + $0x50] sm:$0xff]  ;;  %2231 = vset.pattern.permute.xlu2 %v2401_v18  ;;  %2230 = vset.pattern.permute.xlu1 %v2401_v18  ;;  %v504_v20 = vld [vmem:[%s2534_s6 + $0x78] sm:$0xff]  ;;  %v498_v22 = vld [vmem:[%s2534_s6 + $0x48] sm:$0xff]  ;;  %s2632_s20 = sld [smem:[#allocation4]] (!%p2012_p0) }
  0x82   : > { %2229 = vset.pattern.permute.xlu0 %v2401_v18  ;;  %567 = vperm.xlu1 %2230, %v501_v16   ;;  %v500_v21 = vld [vmem:[%s2534_s6 + $0x58] sm:$0xff]  ;;  %v497_v23 = vld [vmem:[%s2534_s6 + $0x40] sm:$0xff]  ;;  %v495_v24 = vld [vmem:[%s2534_s6 + $0x30] sm:$0xff]  ;;  %s2642_s18 = sld [smem:[#allocation4 + $0x5]] (!%p2012_p0) }
  0x83   : > { %577 = vperm.xlu0 %2229, %v503_v15   ;;  %557 = vperm.xlu2 %2231, %v499_v17   ;;  %v493_v25 = vld [vmem:[%s2534_s6 + $0x20] sm:$0xff]  ;;  %v496_v26 = vld [vmem:[%s2534_s6 + $0x38] sm:$0xff]  ;;  %v494_v27 = vld [vmem:[%s2534_s6 + $0x28] sm:$0xff]  ;;  %s2646_s28 = sld [smem:[#allocation4 + $0x6]] (!%p2012_p0) }
  0x84   : > { %v492_v28 = vld [vmem:[%s2534_s6 + $0x18] sm:$0xff]  ;;  %v491_v29 = vld [vmem:[%s2534_s6 + $0x10] sm:$0xff]  ;;  %v489_v30 = vld [vmem:[%s2534_s6] sm:$0xff]  ;;  %s2648_s14 = sld [smem:[#allocation4 + $0x3]] (!%p2012_p0) }
  0x85   : > { %v490_v31 = vld [vmem:[%s2534_s6 + $0x8] sm:$0xff]  ;;  %s2638_s6 = sld [smem:[#allocation4 + $0x1]] (!%p2012_p0) }
  0x86   : > { %v2591_v33 = vld [vmem:[#allocation3] ss:$0 sm:$0xff]  ;;  %v2593_v37 = vld [vmem:[#allocation3 + $0x1] ss:$0 sm:$0xff]  ;;  %s2650_s16 = sld [smem:[#allocation4 + $0x7]] (!%p2012_p0) }
  0x87   : > { %s2652_s25 = sld [smem:[#allocation4 + $0xd]] (!%p2012_p0) }
  0x88   : > { %s2654_s29 = sld [smem:[#allocation4 + $0x13]] (!%p2012_p0) }
  0x89   : > { %s2656_s8 = sld [smem:[#allocation4 + $0x19]] (!%p2012_p0) }
  0x8a   : > { %572 = vperm.xlu1 %2230, %v502_v19   ;;  %s2661_s9 = sld [smem:[#allocation4 + $0x1f]] (!%p2012_p0) }
  0x8b   : > { %582 = vperm.xlu0 %2229, %v504_v20   ;;  %562 = vperm.xlu2 %2231, %v500_v21   ;;  %s2663_s11 = sld [smem:[#allocation4 + $0x25]] (!%p2012_p0) }
  0x8c   : > { %s2674_s12 = sld [smem:[#allocation4 + $0x2b]] (!%p2012_p0) }
  0x8d   : > { %s2682_s13 = sld [smem:[#allocation4 + $0x31]] (!%p2012_p0) }
  0x8e   : > { %s2691_s19 = sld [smem:[#allocation4 + $0xe]] (!%p2012_p0) }
  0x8f   : > { %s2699_s15 = sld [smem:[#allocation4 + $0x14]] (!%p2012_p0) }
  0x90   : > { %s2705_s30 = sld [smem:[#allocation4 + $0x1a]] (!%p2012_p0) }
  0x91   : > { %s2711_s0 = sld [smem:[#allocation4 + $0x20]] (!%p2012_p0) }
  0x92   : > { %552 = vperm.xlu1 %2230, %v498_v22   ;;  %s2715_s1 = sld [smem:[#allocation4 + $0x26]] (!%p2012_p0) }
  0x93   : > { %547 = vperm.xlu0 %2229, %v497_v23   ;;  %537 = vperm.xlu2 %2231, %v495_v24   ;;  %s2778_s2 = sld [smem:[#allocation4 + $0x22]] (!%p2012_p0) }
  0x94   : > { %s2973_s3 = sld [smem:[#allocation4 + $0x59]] (!%p2012_p0) }
  0x95   : > { %s2975_s4 = sld [smem:[#allocation4 + $0x61]] (!%p2012_p0) }
  0x96   : > { %s2977_s5 = sld [smem:[#allocation4 + $0x42]] (!%p2012_p0) }
  0x97   : > { %s2979_s27 = sld [smem:[#allocation4 + $0x4a]] (!%p2012_p0) }
  0x98   : > { %s2981_s26 = sld [smem:[#allocation4 + $0x52]] (!%p2012_p0) }
  0x99   : > { %s2983_s23 = sld [smem:[#allocation4 + $0x5a]] (!%p2012_p0) }
  0x9a   : > { %527 = vperm.xlu1 %2230, %v493_v25   ;;  %s2987_s22 = sld [smem:[#allocation4 + $0x43]] (!%p2012_p0) }
  0x9b   : > { %542 = vperm.xlu0 %2229, %v496_v26   ;;  %532 = vperm.xlu2 %2231, %v494_v27   ;;  %s2992_s21 = sld [smem:[#allocation4 + $0x4b]] (!%p2012_p0) }
  0xa2   : > { %522 = vperm.xlu1 %2230, %v492_v28  }
  0xa3   : > { %517 = vperm.xlu0 %2229, %v491_v29   ;;  %507 = vperm.xlu2 %2231, %v489_v30  }
  0xab   : > { %512 = vperm.xlu0 %2229, %v490_v31  }
  0xdd   : > { %v558_v32 = vpop.permute.xlu2 %557 }
  0xde   : > { %v596_v42 = vmul.f32 %v2591_v33, %v558_v32 }
  0xe0   : > { %v613_v52 = vsub.f32 %v596_v42, %v2593_v37 }
  0xe2   : > { %v639_v58 = vmul.f32 1.442695, %v613_v52 }
  0xe5   : > { %v563_v36 = vpop.permute.xlu2 %562 }
  0xe6   : > { %v597_v45 = vmul.f32 %v2591_v33, %v563_v36 }
  0xe8   : > { %v614_v53 = vsub.f32 %v597_v45, %v2593_v37 }
  0xea   : > { %v641_v61 = vmul.f32 1.442695, %v614_v53 }
  0xed   : > { %v538_v49 = vpop.permute.xlu2 %537 }
  0xee   : > { %v592_v63 = vmul.f32 %v2591_v33, %v538_v49 }
  0xf0   : > { %v609_v7 = vsub.f32 %v592_v63, %v2593_v37 }
  0xf2   : > { %v631_v17 = vmul.f32 1.442695, %v609_v7 }
  0xf4   : > { %v568_v34 = vpop.permute.xlu1 %567 }
  0xf5   : > { %v578_v35 = vpop.permute.xlu0 %577  ;;  %v598_v40 = vmul.f32 %v2591_v33, %v568_v34  ;;  %v533_v5 = vpop.permute.xlu2 %532 }
  0xf6   : > { %v600_v38 = vmul.f32 %v2591_v33, %v578_v35  ;;  %v591_v10 = vmul.f32 %v2591_v33, %v533_v5 }
  0xf7   : > { %v615_v50 = vsub.f32 %v598_v40, %v2593_v37 }
  0xf8   : > { %v617_v39 = vsub.f32 %v600_v38, %v2593_v37  ;;  %v608_v21 = vsub.f32 %v591_v10, %v2593_v37 }
  0xf9   : > { %v643_v56 = vmul.f32 1.442695, %v615_v50 }
  0xfa   : > { %v647_v47 = vmul.f32 1.442695, %v617_v39  ;;  %v629_v28 = vmul.f32 1.442695, %v608_v21 }
  0xfc   : > { %v573_v41 = vpop.permute.xlu1 %572  ;;  %2234 = vpow2.f32 %v647_v47 }
  0xfd   : > { %v583_v43 = vpop.permute.xlu0 %582  ;;  %v599_v44 = vmul.f32 %v2591_v33, %v573_v41  ;;  %v508_v29 = vpop.permute.xlu2 %507 }
  0xfe   : > { %v601_v46 = vmul.f32 %v2591_v33, %v583_v43  ;;  %v586_v35 = vmul.f32 %v2591_v33, %v508_v29 }
  0xff   : > { %v616_v48 = vsub.f32 %v599_v44, %v2593_v37 }
 0x100   : > { %v618_v51 = vsub.f32 %v601_v46, %v2593_v37  ;;  %v603_v44 = vsub.f32 %v586_v35, %v2593_v37 }
 0x101   : > { %v645_v55 = vmul.f32 1.442695, %v616_v48 }
 0x102   : > { %v649_v54 = vmul.f32 1.442695, %v618_v51  ;;  %v2235_v2 = vpop.eup %2234  ;;  %v619_v50 = vmul.f32 1.442695, %v603_v44 }
 0x104   : > { %2236 = vpow2.f32 %v649_v54  ;;  %v553_v57 = vpop.permute.xlu1 %552 }
 0x105   : > { %v595_v59 = vmul.f32 %v2591_v33, %v553_v57  ;;  %v548_v60 = vpop.permute.xlu0 %547  ;;  %2238 = vpow2.f32 %v645_v55 }
 0x106   : > { %v594_v62 = vmul.f32 %v2591_v33, %v548_v60  ;;  %2240 = vpow2.f32 %v643_v56  ;;  %v488_v60 = vld [vmem:[%s2529_s17] sm:$0xf]  ;;  %s2636_s17 = sld [smem:[#allocation4 + $0x4]] (!%p2012_p0) }
 0x107   : > { %v612_v0 = vsub.f32 %v595_v59, %v2593_v37  ;;  %2242 = vpow2.f32 %v639_v58 }
 0x108   : > { %v611_v1 = vsub.f32 %v594_v62, %v2593_v37  ;;  %2244 = vpow2.f32 %v641_v61 }
 0x109   : > { %v637_v3 = vmul.f32 1.442695, %v612_v0 }
 0x10a   : > { %v2237_v4 = vpop.eup %2236  ;;  %v635_v6 = vmul.f32 1.442695, %v611_v1 }
 0x10b   : > { %v658_v8 = vpack.c.bf16 %v2237_v4, %v2235_v2  ;;  %v2239_v9 = vpop.eup %2238  ;;  %2246 = vpow2.f32 %v637_v3 }
 0x10c   : > { %v528_v11 = vpop.permute.xlu1 %527  ;;  %v2241_v14 = vpop.eup %2240  ;;  %2248 = vpow2.f32 %v635_v6 }
 0x10d   : > { %v543_v12 = vpop.permute.xlu0 %542  ;;  %v590_v13 = vmul.f32 %v2591_v33, %v528_v11  ;;  %660 = vmatpush.bf16.msra.mxu0 %v658_v8  ;;  %v2243_v16 = vpop.eup %2242  ;;  %v657_v19 = vpack.c.bf16 %v2239_v9, %v2241_v14  ;;  %2250 = vpow2.f32 %v631_v17 }
 0x10e   : > { %v593_v15 = vmul.f32 %v2591_v33, %v543_v12  ;;  %v2245_v20 = vpop.eup %2244 }
 0x10f   : > { %v607_v18 = vsub.f32 %v590_v13, %v2593_v37  ;;  %v656_v26 = vpack.c.bf16 %v2245_v20, %v2243_v16 }
 0x110   : > { %v610_v22 = vsub.f32 %v593_v15, %v2593_v37 }
 0x111   : > { %661 = vmatpush.bf16.msra.mxu0 %v657_v19  ;;  %v627_v24 = vmul.f32 1.442695, %v607_v18  ;;  %v2247_v25 = vpop.eup %2246 }
 0x112   : > { %v633_v23 = vmul.f32 1.442695, %v610_v22  ;;  %v2249_v27 = vpop.eup %2248 }
 0x113   : > { %v655_v38 = vpack.c.bf16 %v2247_v25, %v2249_v27  ;;  %v2251_v40 = vpop.eup %2250 }
 0x114   : > { %2252 = vpow2.f32 %v633_v23  ;;  %v523_v30 = vpop.permute.xlu1 %522 }
 0x115   : > { %v589_v31 = vmul.f32 %v2591_v33, %v523_v30  ;;  %v518_v32 = vpop.permute.xlu0 %517  ;;  %662 = vmatpush.bf16.msra.mxu0 %v656_v26  ;;  %2254 = vpow2.f32 %v627_v24 }
 0x116   : > { %v588_v34 = vmul.f32 %v2591_v33, %v518_v32  ;;  %2256 = vpow2.f32 %v629_v28 }
 0x117   : > { %v606_v36 = vsub.f32 %v589_v31, %v2593_v37 }
 0x118   : > { %v605_v39 = vsub.f32 %v588_v34, %v2593_v37 }
 0x119   : > { %v625_v41 = vmul.f32 1.442695, %v606_v36  ;;  %663 = vmatpush.bf16.msra.mxu0 %v655_v38 }
 0x11a   : > { %v2253_v42 = vpop.eup %2252  ;;  %v623_v43 = vmul.f32 1.442695, %v605_v39 }
 0x11b   : > { %2258 = vpow2.f32 %v625_v41  ;;  %v654_v45 = vpack.c.bf16 %v2253_v42, %v2251_v40  ;;  %v2255_v46 = vpop.eup %2254 }
 0x11c   : > { %2260 = vpow2.f32 %v623_v43  ;;  %v2257_v48 = vpop.eup %2256 }
 0x11d   : > { %v513_v47 = vpop.permute.xlu0 %512  ;;  %664 = vmatpush.bf16.msra.mxu0 %v654_v45  ;;  %v653_v51 = vpack.c.bf16 %v2257_v48, %v2255_v46  ;;  %2262 = vpow2.f32 %v619_v50 }
 0x11e   : > { %v587_v49 = vmul.f32 %v2591_v33, %v513_v47  ;;  %v659_v33 = vld [vmem:[#allocation2] sm:$0xff] }
 0x120   : > { %v604_v52 = vsub.f32 %v587_v49, %v2593_v37 }
 0x121   : > { %v2259_v53 = vpop.eup %2258  ;;  %665 = vmatpush.bf16.msra.mxu0 %v653_v51 }
 0x122   : > { %v2261_v54 = vpop.eup %2260  ;;  %v621_v55 = vmul.f32 1.442695, %v604_v52 }
 0x123   : > { %v652_v56 = vpack.c.bf16 %v2259_v53, %v2261_v54  ;;  %v2263_v57 = vpop.eup %2262 }
 0x124   : > { %2264 = vpow2.f32 %v621_v55 }
 0x125   : > { %666 = vmatpush.bf16.msra.mxu0 %v652_v56 }
 0x12a   : > { %v2265_v58 = vpop.eup %2264 }
 0x12b   : > { %v651_v59 = vpack.c.bf16 %v2265_v58, %v2263_v57 }
 0x12d   : > { %667 = vmatpush.bf16.msra.mxu0 %v651_v59 }
 0x130   : > { %668 = vmatmul.bf16.vlgmr.msra.gmra.mxu0 %v488_v60 }
 0x1ad   : > { %v669_v61 = vpop.f32.mrf.mxu0 }
 0x1ae   : > { %v673_v62 = vadd.f32 %v669_v61, %v659_v33 }
 0x1b0   : > { %674 = vst [vmem:[#allocation2] sm:$0xff] %v673_v62 }
 0x1b1   : > { %678 = sbr.rel (%p2012_p0) target bundleno = 693 (0x2b5), region = 56 }
 0x1b5   : > { %v671_v63 = vpop.f32.mrf.mxu0 }
 0x1b6   : > { %v2630_v37 = vld [vmem:[%s2518_s7] sm:$0x3f]  ;;  %s2644_s7 = sld [smem:[#allocation4 + $0x2]]  ;;  %v787_v28 = vstv %s2652_s25  ;;  %v790_v31 = vstv %s2654_s29  ;;  %v797_v32 = vstv %s2656_s8 }
 0x1b7   : > { %v765_v0 = vld [vmem:[#allocation2] sm:$0xff]  ;;  %v681_v1 = vrot.slane %v2630_v37, 1  ;;  %v684_v2 = vrot.slane %v2630_v37, 2  ;;  %v687_v4 = vrot.slane %v2630_v37, 3  ;;  %v804_v42 = vstv %s2661_s9  ;;  %s2719_s25 = sld [smem:[#allocation4 + $0x2c]] }
 0x1b8   : > { %2266 = vrcp.f32 %v765_v0  ;;  %v811_v46 = vstv %s2663_s11  ;;  %v732_v47 = vstv %s2632_s20  ;;  %v735_v52 = vstv %s2636_s17  ;;  %s2724_s29 = sld [smem:[#allocation4 + $0x32]] }
 0x1b9   : > { %v683_v3 = vadd.f32 %v681_v1, %v2630_v37  ;;  %v742_v53 = vstv %s2638_s6  ;;  %v745_v54 = vstv %s2642_s18  ;;  %v818_v58 = vstv %s2674_s12  ;;  %s2728_s8 = sld [smem:[#allocation4 + $0xf]] }
 0x1ba   : > { %v754_v60 = vstv %s2646_s28  ;;  %v828_v61 = vstv %s2691_s19  ;;  %s2732_s9 = sld [smem:[#allocation4 + $0x15]]  ;;  %v838_v1 = vstv %s2705_s30 }
 0x1bb   : > { %v686_v5 = vadd.f32 %v684_v2, %v683_v3  ;;  %s2737_s11 = sld [smem:[#allocation4 + $0x1b]] }
 0x1bc   : > { %v751_v55 = vstv %s2644_s7  ;;  %s2742_s12 = sld [smem:[#allocation4 + $0x21]] }
 0x1bd   : > { %v689_v7 = vadd.f32 %v687_v4, %v686_v5  ;;  %s2747_s19 = sld [smem:[#allocation4 + $0x27]] }
 0x1be   : > { %v2267_v6 = vpop.eup %2266  ;;  %s2758_s30 = sld [smem:[#allocation4 + $0x33]] }
 0x1bf   : > { %v690_v8 = vmul.f32 0.25, %v689_v7  ;;  %v768_v9 = vrot.slane %v2267_v6, 6  ;;  %v771_v10 = vrot.slane %v2267_v6, 5  ;;  %v774_v15 = vrot.slane %v2267_v6, 4  ;;  %s2061_s20 = sld [smem:[#allocation4 + $0x36]] }
 0x1c0   : > { %v777_v16 = vrot.slane %v2267_v6, 3  ;;  %v780_v17 = vrot.slane %v2267_v6, 2  ;;  %v783_v21 = vrot.slane %v2267_v6, 1  ;;  %v845_v7 = vstv %s2711_s0  ;;  %s2761_s0 = sld [smem:[#allocation4 + $0x10]] }
 0x1c1   : > { %v2659_v11 = vsub.f32 %v2630_v37, %v690_v8  ;;  %v694_v12 = vrot.slane %v690_v8, 7  ;;  %v702_v13 = vrot.slane %v690_v8, 6  ;;  %v710_v14 = vrot.slane %v690_v8, 5  ;;  %s2923_s17 = sld [smem:[#allocation4 + $0x37]] }
 0x1c2   : > { %v2678_v23 = vmul.f32 %v768_v9, %v765_v0  ;;  %v2680_v24 = vmul.f32 %v771_v10, %v765_v0  ;;  %v2693_v29 = vmul.f32 %v774_v15, %v765_v0  ;;  %v2695_v30 = vmul.f32 %v777_v16, %v765_v0  ;;  %s2933_s6 = sld [smem:[#allocation4 + $0x3b]] }
 0x1c3   : > { %v2666_v18 = vsub.f32 %v2630_v37, %v694_v12  ;;  %v2669_v19 = vsub.f32 %v2630_v37, %v702_v13  ;;  %v2672_v20 = vsub.f32 %v2630_v37, %v710_v14  ;;  %v692_v22 = vmul.f32 %v2659_v11, %v2659_v11  ;;  %s2935_s18 = sld [smem:[#allocation4 + $0x38]] }
 0x1c4   : > { %v2701_v36 = vmul.f32 %v780_v17, %v765_v0  ;;  %v2703_v38 = vmul.f32 %v783_v21, %v765_v0  ;;  %v788_v39 = vmul.f32 %v787_v28, %v2678_v23  ;;  %v791_v40 = vmul.f32 %v790_v31, %v2680_v24  ;;  %s2937_s7 = sld [smem:[#allocation4 + $0x3c]] }
 0x1c5   : > { %v697_v25 = vmul.f32 %v2666_v18, %v2666_v18  ;;  %v705_v26 = vmul.f32 %v2669_v19, %v2669_v19  ;;  %v713_v27 = vmul.f32 %v2672_v20, %v2672_v20  ;;  %v798_v41 = vmul.f32 %v797_v32, %v2693_v29  ;;  %s2939_s28 = sld [smem:[#allocation4 + $0x39]] }
 0x1c6   : > { %v805_v45 = vmul.f32 %v804_v42, %v2695_v30  ;;  %v793_v48 = vrot.slane %v791_v40, 1  ;;  %v812_v50 = vmul.f32 %v811_v46, %v2701_v36  ;;  %v819_v63 = vmul.f32 %v818_v58, %v2703_v38 }
 0x1c7   : > { %v699_v34 = vrot.slane %v697_v25, 1  ;;  %v707_v35 = vrot.slane %v705_v26, 2  ;;  %v715_v44 = vrot.slane %v713_v27, 3  ;;  %v800_v49 = vrot.slane %v798_v41, 2 }
 0x1c8   : > { %v795_v56 = vadd.f32 %v793_v48, %v788_v39  ;;  %v807_v57 = vrot.slane %v805_v45, 3  ;;  %v814_v33 = vrot.slane %v812_v50, 4  ;;  %v831_v0 = vstv %s2699_s15  ;;  %s2752_s15 = sld [smem:[#allocation4 + $0x2d]] }
 0x1c9   : > { %v701_v43 = vadd.f32 %v699_v34, %v692_v22  ;;  %v829_v3 = vmul.f32 %v828_v61, %v2678_v23  ;;  %v832_v4 = vmul.f32 %v831_v0, %v2680_v24  ;;  %v839_v5 = vmul.f32 %v838_v1, %v2693_v29 }
 0x1ca   : > { %v802_v62 = vadd.f32 %v800_v49, %v795_v56  ;;  %v852_v8 = vstv %s2715_s1  ;;  %v859_v9 = vstv %s2719_s25  ;;  %v846_v14 = vmul.f32 %v845_v7, %v2695_v30  ;;  %s2768_s1 = sld [smem:[#allocation4 + $0x16]] }
 0x1cb   : > { %v709_v51 = vadd.f32 %v707_v35, %v701_v43  ;;  %v834_v12 = vrot.slane %v832_v4, 1  ;;  %v841_v13 = vrot.slane %v839_v5, 2  ;;  %v760_v15 = vstv %s2648_s14  ;;  %s2772_s25 = sld [smem:[#allocation4 + $0x1c]] }
 0x1cc   : > { %v809_v6 = vadd.f32 %v807_v57, %v802_v62  ;;  %v763_v16 = vstv %s2650_s16  ;;  %v825_v17 = vstv %s2682_s13  ;;  %v853_v21 = vmul.f32 %v852_v8, %v2701_v36  ;;  %s2941_s14 = sld [smem:[#allocation4 + $0x3d]] }
 0x1cd   : > { %v717_v59 = vadd.f32 %v715_v44, %v709_v51  ;;  %v821_v22 = vrot.slane %v819_v63, 5  ;;  %v836_v25 = vadd.f32 %v834_v12, %v829_v3  ;;  %v848_v26 = vrot.slane %v846_v14, 3  ;;  %s2943_s16 = sld [smem:[#allocation4 + $0x3a]] }
 0x1ce   : > { %v816_v27 = vadd.f32 %v814_v33, %v809_v6  ;;  %v2764_v28 = vmul.f32 %v859_v9, %v2703_v38  ;;  %v866_v31 = vstv %s2724_s29  ;;  %v869_v32 = vstv %s2728_s8  ;;  %s2783_s8 = sld [smem:[#allocation4 + $0x28]] }
 0x1cf   : > { %v718_v2 = vmul.f32 0.25, %v717_v59  ;;  %v843_v34 = vadd.f32 %v841_v13, %v836_v25  ;;  %v855_v35 = vrot.slane %v853_v21, 4  ;;  %v872_v39 = vstv %s2732_s9  ;;  %s2787_s9 = sld [smem:[#allocation4 + $0x2e]] }
 0x1d0   : > { %v879_v40 = vstv %s2737_s11  ;;  %v870_v41 = vmul.f32 %v869_v32, %v2678_v23  ;;  %v873_v42 = vmul.f32 %v872_v39, %v2680_v24  ;;  %v886_v44 = vstv %s2742_s12  ;;  %s2795_s11 = sld [smem:[#allocation4 + $0x11]] }
 0x1d1   : > { %v2749_v10 = vadd.f32 1e-05, %v718_v2  ;;  %v880_v43 = vmul.f32 %v879_v40, %v2693_v29  ;;  %v850_v45 = vadd.f32 %v848_v26, %v843_v34  ;;  %v887_v46 = vmul.f32 %v886_v44, %v2695_v30  ;;  %s2799_s12 = sld [smem:[#allocation4 + $0x17]] }
 0x1d2   : > { %v893_v48 = vstv %s2747_s19  ;;  %v900_v49 = vstv %s2752_s15  ;;  %v875_v50 = vrot.slane %v873_v42, 1  ;;  %v2789_v58 = vadd.f32 %v821_v22, %v816_v27  ;;  %s2803_s19 = sld [smem:[#allocation4 + $0x1d]] }
 0x1d3   : > { %2268 = vrsqrt.f32 %v2749_v10  ;;  %vm726_vm3 = vweird.f32 %v2749_v10  ;;  %v882_v51 = vrot.slane %v880_v43, 2  ;;  %v894_v56 = vmul.f32 %v893_v48, %v2701_v36  ;;  %s2808_s15 = sld [smem:[#allocation4 + $0x23]] }
 0x1d4   : > { %v862_v59 = vrot.slane %v2764_v28, 5  ;;  %v901_v33 = vmul.f32 %v900_v49, %v2703_v38  ;;  %v910_v61 = vstv %s2761_s0  ;;  %v857_v63 = vadd.f32 %v855_v35, %v850_v45  ;;  %s2811_s0 = sld [smem:[#allocation4 + $0x34]] }
 0x1d5   : > { %v877_v0 = vadd.f32 %v875_v50, %v870_v41  ;;  %v889_v1 = vrot.slane %v887_v46, 3  ;;  %v896_v2 = vrot.slane %v894_v56, 4  ;;  %v911_v3 = vmul.f32 %v910_v61, %v2678_v23  ;;  %s2945_s13 = sld [smem:[#allocation4 + $0x3e]] }
 0x1d6   : > { %v913_v4 = vstv %s2768_s1  ;;  %v920_v8 = vstv %s2772_s25  ;;  %v903_v9 = vrot.slane %v901_v33, 5  ;;  %v927_v13 = vstv %s2778_s2  ;;  %s2816_s1 = sld [smem:[#allocation4 + $0x29]] }
 0x1d7   : > { %v884_v6 = vadd.f32 %v882_v51, %v877_v0  ;;  %v914_v7 = vmul.f32 %v913_v4, %v2680_v24  ;;  %v921_v12 = vmul.f32 %v920_v8, %v2693_v29  ;;  %v934_v14 = vstv %s2783_s8  ;;  %s2818_s2 = sld [smem:[#allocation4 + $0x2f]] }
 0x1d8   : > { %v928_v26 = vmul.f32 %v927_v13, %v2695_v30  ;;  %v907_v27 = vstv %s2758_s30  ;;  %v935_v32 = vmul.f32 %v934_v14, %v2701_v36  ;;  %v941_v34 = vstv %s2787_s9  ;;  %s2830_s30 = sld [smem:[#allocation4 + $0x35]] }
 0x1d9   : > { %v2269_v57 = vpop.eup %2268  ;;  %v891_v22 = vadd.f32 %v889_v1, %v884_v6  ;;  %v916_v25 = vrot.slane %v914_v7, 1  ;;  %v923_v28 = vrot.slane %v921_v12, 2  ;;  %v864_v43 = vadd.f32 %v862_v59, %v857_v63  ;;  %s2832_s25 = sld [smem:[#allocation4 + $0x12]] }
 0x1da   : > { %v721_v62 = vmul.f32 %v2269_v57, %v2749_v10  ;;  %vm727_vm4 = vweird.f32 %v2269_v57  ;;  %v930_v41 = vrot.slane %v928_v26, 3  ;;  %v942_v44 = vmul.f32 %v941_v34, %v2703_v38  ;;  %s2838_s8 = sld [smem:[#allocation4 + $0x18]] }
 0x1db   : > { %v898_v39 = vadd.f32 %v896_v2, %v891_v22  ;;  %v918_v40 = vadd.f32 %v916_v25, %v911_v3  ;;  %vm2823_vm5 = vmor %vm726_vm3, %vm727_vm4  ;;  %v951_v45 = vstv %s2795_s11  ;;  %v954_v46 = vstv %s2799_s12  ;;  %s2843_s9 = sld [smem:[#allocation4 + $0x1e]] }
 0x1dc   : > { %v722_v5 = vmul.f32 %v2269_v57, %v721_v62  ;;  %v937_v51 = vrot.slane %v935_v32, 4  ;;  %v952_v56 = vmul.f32 %v951_v45, %v2678_v23  ;;  %v955_v10 = vmul.f32 %v954_v46, %v2680_v24  ;;  %s2846_s11 = sld [smem:[#allocation4 + $0x24]] }
 0x1dd   : > { %v905_v49 = vadd.f32 %v903_v9, %v898_v39  ;;  %v925_v50 = vadd.f32 %v923_v28, %v918_v40  ;;  %v961_v33 = vstv %s2803_s19  ;;  %v968_v61 = vstv %s2808_s15  ;;  %s2849_s12 = sld [smem:[#allocation4 + $0x2a]] }
 0x1de   : > { %v723_v21 = vmul.f32 0.5, %v722_v5  ;;  %v944_v63 = vrot.slane %v942_v44, 5  ;;  %v962_v0 = vmul.f32 %v961_v33, %v2693_v29  ;;  %v957_v6 = vrot.slane %v955_v10, 1  ;;  %s2856_s19 = sld [smem:[#allocation4 + $0x30]] }
 0x1df   : > { %v932_v62 = vadd.f32 %v930_v41, %v925_v50  ;;  %v969_v7 = vmul.f32 %v968_v61, %v2695_v30  ;;  %v975_v22 = vstv %s2816_s1  ;;  %v867_v25 = vadd.f32 %v866_v31, %v864_v43  ;;  %s2947_s29 = sld [smem:[#allocation4 + $0x3f]] }
 0x1e0   : > { %v724_v35 = vsub.f32 1.5, %v723_v21  ;;  %v959_v14 = vadd.f32 %v957_v6, %v952_v56  ;;  %v948_v26 = vstv %s2811_s0  ;;  %v976_v28 = vmul.f32 %v975_v22, %v2701_v36  ;;  %s2949_s15 = sld [smem:[#allocation4 + $0x47]] }
 0x1e1   : > { %v939_v5 = vadd.f32 %v937_v51, %v932_v62  ;;  %v971_v21 = vrot.slane %v969_v7, 3  ;;  %v982_v32 = vstv %s2818_s2  ;;  %v995_v42 = vstv %s2838_s8  ;;  %s2951_s0 = sld [smem:[#allocation4 + $0x4f]] }
 0x1e2   : > { %v725_v48 = vmul.f32 %v2269_v57, %v724_v35  ;;  %v983_v31 = vmul.f32 %v982_v32, %v2703_v38  ;;  %v978_v39 = vrot.slane %v976_v28, 4  ;;  %v1009_v44 = vstv %s2846_s11  ;;  %s2953_s1 = sld [smem:[#allocation4 + $0x57]] }
 0x1e3   : > { %v946_v13 = vadd.f32 %v944_v63, %v939_v5  ;;  %v989_v45 = vstv %s2830_s30  ;;  %v1010_v46 = vmul.f32 %v1009_v44, %v2695_v30  ;;  %v1040_v63 = vrot.slane %v867_v25, 7  ;;  %s2955_s2 = sld [smem:[#allocation4 + $0x5f]] }
 0x1e4   : > { %v729_v59 = vsel %vm2823_vm5, %v2269_v57, %v725_v48  ;;  %v964_v57 = vrot.slane %v962_v0, 2  ;;  %v985_v40 = vrot.slane %v983_v31, 5  ;;  %v1016_v48 = vstv %s2849_s12  ;;  %s2957_s30 = sld [smem:[#allocation4 + $0x40]] }
 0x1e5   : > { %v730_v1 = vmul.f32 %v729_v59, %v2659_v11  ;;  %v738_v2 = vrot.slane %v729_v59, 7  ;;  %v747_v3 = vrot.slane %v729_v59, 6  ;;  %v756_v4 = vrot.slane %v729_v59, 5  ;;  %s2961_s8 = sld [smem:[#allocation4 + $0x50]] }
 0x1e6   : > { %v1012_v30 = vrot.slane %v1010_v46, 3  ;;  %s2965_s11 = sld [smem:[#allocation4 + $0x60]]  ;;  %v1108_v46 = vstv %s2933_s6 }
 0x1e7   : > { %v733_v8 = vmul.f32 %v732_v47, %v730_v1  ;;  %v740_v11 = vmul.f32 %v738_v2, %v2666_v18  ;;  %v749_v9 = vmul.f32 %v747_v3, %v2669_v19  ;;  %v758_v12 = vmul.f32 %v756_v4, %v2672_v20  ;;  %s2967_s12 = sld [smem:[#allocation4 + $0x41]] }
 0x1e8   : > { %v826_v47 = vadd.f32 %v825_v17, %v2789_v58  ;;  %v908_v18 = vadd.f32 %v907_v27, %v905_v49  ;;  %v966_v20 = vadd.f32 %v964_v57, %v959_v14  ;;  %v949_v58 = vadd.f32 %v948_v26, %v946_v13  ;;  %s3003_s6 = sld [smem:[#allocation4 + $0x5b]] }
 0x1e9   : > { %v736_v19 = vadd.f32 %v735_v52, %v733_v8  ;;  %v743_v34 = vmul.f32 %v742_v53, %v740_v11  ;;  %v752_v35 = vmul.f32 %v751_v55, %v749_v9  ;;  %v761_v17 = vmul.f32 %v760_v15, %v758_v12 }
 0x1ea   : > { %v973_v27 = vadd.f32 %v971_v21, %v966_v20  ;;  %v992_v52 = vstv %s2832_s25  ;;  %v1002_v53 = vstv %s2843_s9  ;;  %v996_v55 = vmul.f32 %v995_v42, %v2680_v24  ;;  %s2959_s25 = sld [smem:[#allocation4 + $0x48]] }
 0x1eb   : > { %v993_v41 = vmul.f32 %v992_v52, %v2678_v23  ;;  %v1003_v15 = vmul.f32 %v1002_v53, %v2693_v29  ;;  %v1023_v49 = vstv %s2856_s19  ;;  %v1017_v23 = vmul.f32 %v1016_v48, %v2701_v36  ;;  %s2963_s9 = sld [smem:[#allocation4 + $0x58]] }
 0x1ec   : > { %v980_v43 = vadd.f32 %v978_v39, %v973_v27  ;;  %v998_v51 = vrot.slane %v996_v55, 1  ;;  %v746_v10 = vadd.f32 %v745_v54, %v743_v34  ;;  %v755_v33 = vadd.f32 %v754_v60, %v752_v35  ;;  %s2969_s19 = sld [smem:[#allocation4 + $0x49]] }
 0x1ed   : > { %v1005_v56 = vrot.slane %v1003_v15, 2  ;;  %v764_v61 = vadd.f32 %v763_v16, %v761_v17  ;;  %v1032_v24 = vrot.slane %v2630_v37, 4  ;;  %v1024_v62 = vmul.f32 %v1023_v49, %v2703_v38 }
 0x1ee   : > { %v987_v50 = vadd.f32 %v985_v40, %v980_v43  ;;  %v1000_v59 = vadd.f32 %v998_v51, %v993_v41  ;;  %v1044_v0 = vrot.slane %v908_v18, 6  ;;  %v1048_v1 = vrot.slane %v949_v58, 5 }
 0x1ef   : > { %v1019_v36 = vrot.slane %v1017_v23, 4  ;;  %v2896_v54 = vadd.f32 %v826_v47, %v736_v19  ;;  %v2898_v60 = vadd.f32 %v1040_v63, %v746_v10  ;;  %v1026_v6 = vrot.slane %v1024_v62, 5 }
 0x1f0   : > { %v990_v29 = vadd.f32 %v989_v45, %v987_v50  ;;  %v1007_v2 = vadd.f32 %v1005_v56, %v1000_v59  ;;  %v2900_v16 = vadd.f32 %v1044_v0, %v755_v33  ;;  %v2902_v4 = vadd.f32 %v1048_v1, %v764_v61 }
 0x1f1   : > { %v1052_v38 = vrot.slane %v2898_v60, 1  ;;  %v1030_v8 = vstv %s2061_s20  ;;  %v1035_v13 = vrot.slane %v2630_v37, 5  ;;  %s2971_s20 = sld [smem:[#allocation4 + $0x51]]  ;;  %v1105_v45 = vstv %s2923_s17 }
 0x1f2   : > { %v1034_v3 = vsub.f32 %v990_v29, %v1032_v24  ;;  %v1014_v5 = vadd.f32 %v1012_v30, %v1007_v2  ;;  %v1056_v57 = vrot.slane %v2900_v16, 2  ;;  %v1060_v9 = vrot.slane %v2902_v4, 3  ;;  %s2998_s17 = sld [smem:[#allocation4 + $0x53]] }
 0x1f3   : > { %v1054_v11 = vadd.f32 %v1052_v38, %v2896_v54  ;;  %v1115_v49 = vstv %s2935_s18  ;;  %v1118_v50 = vstv %s2937_s7  ;;  %v1124_v51 = vstv %s2939_s28  ;;  %s3210_s18 = sld [smem:[#allocation4 + $0x45]] }
 0x1f4   : > { %1827 = vst [vmem:[%s2523_s10 + $0x4] sm:$0x1] %v1034_v3  ;;  %v1021_v7 = vadd.f32 %v1019_v36, %v1014_v5  ;;  %v1127_v56 = vstv %s2941_s14  ;;  %v1133_v23 = vstv %s2943_s16  ;;  %v1136_v10 = vstv %s2945_s13  ;;  %s3221_s7 = sld [smem:[#allocation4 + $0x55]] }
 0x1f5   : > { %v1058_v14 = vadd.f32 %v1056_v57, %v1054_v11  ;;  %v1139_v33 = vstv %s2947_s29  ;;  %v1142_v24 = vstv %s2949_s15  ;;  %v1149_v29 = vstv %s2951_s0  ;;  %s3253_s28 = sld [smem:[#allocation4 + $0x5d]] }
 0x1f6   : > { %v1028_v12 = vadd.f32 %v1026_v6, %v1021_v7  ;;  %v1209_v59 = vstv %s2959_s25  ;;  %v1156_v30 = vstv %s2953_s1  ;;  %v1206_v62 = vstv %s2957_s30  ;;  %s3258_s14 = sld [smem:[#allocation4 + $0x46]] }
 0x1f7   : > { %v1062_v22 = vadd.f32 %v1060_v9, %v1058_v14  ;;  %v1216_v63 = vstv %s2961_s8  ;;  %v1276_v0 = vstv %s2969_s19  ;;  %v1223_v2 = vstv %s2963_s9  ;;  %s3262_s16 = sld [smem:[#allocation4 + $0x4e]] }
 0x1f8   : > { %v1031_v21 = vadd.f32 %v1030_v8, %v1028_v12  ;;  %v1273_v36 = vstv %s2967_s12  ;;  %v1283_v3 = vstv %s2971_s20  ;;  %v1163_v7 = vstv %s2955_s2  ;;  %s3264_s13 = sld [smem:[#allocation4 + $0x65]] }
 0x1f9   : > { %v1063_v25 = vmul.f32 0.25, %v1062_v22  ;;  %v1290_v8 = vstv %s2973_s3  ;;  %v1340_v11 = vstv %s2977_s5  ;;  %v1343_v9 = vstv %s2979_s27  ;;  %s3049_s3 = sld [smem:[#allocation4 + $0x62]] }
 0x1fa   : > { %v1037_v47 = vsub.f32 %v1031_v21, %v1035_v13  ;;  %v1230_v22 = vstv %s2965_s11  ;;  %s3066_s5 = sld [smem:[#allocation4 + $0x4c]] }
 0x1fb   : > { %v2912_v18 = vsub.f32 %v2896_v54, %v1063_v25  ;;  %v1067_v26 = vrot.slane %v1063_v25, 7  ;;  %v1075_v19 = vrot.slane %v1063_v25, 6  ;;  %v1083_v20 = vrot.slane %v1063_v25, 5  ;;  %s3201_s27 = sld [smem:[#allocation4 + $0x4d]] }
 0x1fc   : > { %1828 = vst [vmem:[%s2523_s10 + $0x5] sm:$0x1] %v1037_v47  ;;  %v1350_v47 = vstv %s2981_s26  ;;  %v1357_v25 = vstv %s2983_s23  ;;  %s2098_s23 = sld [smem:[#allocation4 + $0x5c]] }
 0x1fd   : > { %v2915_v28 = vsub.f32 %v2898_v60, %v1067_v26  ;;  %v2918_v32 = vsub.f32 %v2900_v16, %v1075_v19  ;;  %v2921_v37 = vsub.f32 %v2902_v4, %v1083_v20  ;;  %v1065_v34 = vmul.f32 %v2912_v18, %v2912_v18  ;;  %s3128_s26 = sld [smem:[#allocation4 + $0x64]] }
 0x1fe   : > { %s3266_s29 = sld [smem:[#allocation4 + $0x56]] }
 0x1ff   : > { %v1070_v35 = vmul.f32 %v2915_v28, %v2915_v28  ;;  %v1078_v17 = vmul.f32 %v2918_v32, %v2918_v32  ;;  %v1086_v31 = vmul.f32 %v2921_v37, %v2921_v37  ;;  %s3268_s15 = sld [smem:[#allocation4 + $0x5e]] }
 0x200   : > { %s3288_s0 = sld [smem:[#allocation4 + $0x66]] }
 0x201   : > { %v1072_v58 = vrot.slane %v1070_v35, 1  ;;  %v1080_v27 = vrot.slane %v1078_v17, 2  ;;  %v1088_v52 = vrot.slane %v1086_v31, 3  ;;  %v1297_v35 = vstv %s2975_s4  ;;  %s3056_s4 = sld [smem:[#allocation4 + $0x63]] }
 0x202   : > { %v1410_v17 = vstv %s2992_s21  ;;  %v1417_v31 = vstv %s2998_s17  ;;  %s2097_s21 = sld [smem:[#allocation4 + $0x54]] }
 0x203   : > { %v1074_v39 = vadd.f32 %v1072_v58, %v1065_v34  ;;  %v1424_v58 = vstv %s3003_s6  ;;  %s3348_s1 = sld [smem:[#allocation4 + $0x67]] }
 0x204   : > { %s3353_s2 = sld [smem:[#allocation4 + $0x6b]] }
 0x205   : > { %v1082_v40 = vadd.f32 %v1080_v27, %v1074_v39  ;;  %s3365_s30 = sld [smem:[#allocation4 + $0x68]] }
 0x206   : > { %s3373_s25 = sld [smem:[#allocation4 + $0x6f]] }
 0x207   : > { %v1090_v41 = vadd.f32 %v1088_v52, %v1082_v40  ;;  %s3386_s8 = sld [smem:[#allocation4 + $0x6c]] }
 0x208   : > { %s3389_s9 = sld [smem:[#allocation4 + $0x73]] }
 0x209   : > { %v1091_v42 = vmul.f32 0.25, %v1090_v41  ;;  %s3394_s11 = sld [smem:[#allocation4 + $0x70]] }
 0x20a   : > { %s3401_s12 = sld [smem:[#allocation4 + $0x74]] }
 0x20b   : > { %v1092_v53 = vadd.f32 1e-05, %v1091_v42  ;;  %s3406_s19 = sld [smem:[#allocation4 + $0x69]] }
 0x20c   : > { %s3413_s20 = sld [smem:[#allocation4 + $0x6d]] }
 0x20d   : > { %2270 = vrsqrt.f32 %v1092_v53  ;;  %vm1099_vm6 = vweird.f32 %v1092_v53  ;;  %s3417_s17 = sld [smem:[#allocation4 + $0x77]] }
 0x20e   : > { %s3427_s6 = sld [smem:[#allocation4 + $0x71]] }
 0x213   : > { %v2271_v43 = vpop.eup %2270 }
 0x214   : > { %v1094_v55 = vmul.f32 %v2271_v43, %v1092_v53  ;;  %vm1100_vm7 = vweird.f32 %v2271_v43 }
 0x215   : > { %vm1101_vm8 = vmor %vm1099_vm6, %vm1100_vm7 }
 0x216   : > { %v1095_v15 = vmul.f32 %v2271_v43, %v1094_v55 }
 0x218   : > { %v1096_v44 = vmul.f32 0.5, %v1095_v15 }
 0x21a   : > { %v1097_v48 = vsub.f32 1.5, %v1096_v44 }
 0x21c   : > { %v1098_v61 = vmul.f32 %v2271_v43, %v1097_v48 }
 0x21e   : > { %v1102_v1 = vsel %vm1101_vm8, %v2271_v43, %v1098_v61 }
 0x21f   : > { %v1103_v5 = vmul.f32 %v1102_v1, %v2912_v18  ;;  %v1111_v6 = vrot.slane %v1102_v1, 7  ;;  %v1120_v38 = vrot.slane %v1102_v1, 6  ;;  %v1129_v57 = vrot.slane %v1102_v1, 5 }
 0x220   : > { %v1407_v18 = vstv %s2987_s22  ;;  %s2095_s22 = sld [smem:[#allocation4 + $0x44]] }
 0x221   : > { %v1106_v12 = vmul.f32 %v1105_v45, %v1103_v5  ;;  %v1113_v13 = vmul.f32 %v1111_v6, %v2915_v28  ;;  %v1122_v14 = vmul.f32 %v1120_v38, %v2918_v32  ;;  %v1131_v21 = vmul.f32 %v1129_v57, %v2921_v37 }
 0x223   : > { %v3024_v26 = vadd.f32 %v1108_v46, %v1106_v12  ;;  %v1116_v19 = vmul.f32 %v1115_v49, %v1113_v13  ;;  %v1125_v20 = vmul.f32 %v1124_v51, %v1122_v14  ;;  %v1134_v34 = vmul.f32 %v1133_v23, %v1131_v21 }
 0x225   : > { %v3030_v27 = vadd.f32 %v1118_v50, %v1116_v19  ;;  %v3032_v28 = vadd.f32 %v1127_v56, %v1125_v20  ;;  %v3034_v32 = vadd.f32 %v1136_v10, %v1134_v34  ;;  %v1140_v37 = vmul.f32 %v1139_v33, %v3024_v26 }
 0x226   : > { %v1207_v39 = vmul.f32 %v1206_v62, %v3024_v26  ;;  %v1274_v52 = vmul.f32 %v1273_v36, %v3024_v26  ;;  %v1341_v40 = vmul.f32 %v1340_v11, %v3024_v26  ;;  %v1408_v41 = vmul.f32 %v1407_v18, %v3024_v26 }
 0x227   : > { %v1143_v42 = vmul.f32 %v1142_v24, %v3030_v27  ;;  %v1150_v53 = vmul.f32 %v1149_v29, %v3032_v28  ;;  %v1157_v43 = vmul.f32 %v1156_v30, %v3034_v32  ;;  %v1210_v55 = vmul.f32 %v1209_v59, %v3030_v27 }
 0x228   : > { %v1217_v15 = vmul.f32 %v1216_v63, %v3032_v28  ;;  %v1224_v44 = vmul.f32 %v1223_v2, %v3034_v32  ;;  %v1277_v45 = vmul.f32 %v1276_v0, %v3030_v27  ;;  %v1284_v46 = vmul.f32 %v1283_v3, %v3032_v28 }
 0x229   : > { %v1145_v48 = vrot.slane %v1143_v42, 1  ;;  %v1152_v49 = vrot.slane %v1150_v53, 2  ;;  %v1159_v50 = vrot.slane %v1157_v43, 3  ;;  %v1212_v51 = vrot.slane %v1210_v55, 1 }
 0x22a   : > { %v1219_v56 = vrot.slane %v1217_v15, 2  ;;  %v1226_v23 = vrot.slane %v1224_v44, 3  ;;  %v1279_v10 = vrot.slane %v1277_v45, 1  ;;  %v1286_v33 = vrot.slane %v1284_v46, 2 }
 0x22b   : > { %v1147_v61 = vadd.f32 %v1145_v48, %v1140_v37  ;;  %v1214_v24 = vadd.f32 %v1212_v51, %v1207_v39  ;;  %v1291_v29 = vmul.f32 %v1290_v8, %v3034_v32  ;;  %v1344_v59 = vmul.f32 %v1343_v9, %v3030_v27 }
 0x22c   : > { %v1281_v30 = vadd.f32 %v1279_v10, %v1274_v52  ;;  %v1351_v62 = vmul.f32 %v1350_v47, %v3032_v28  ;;  %v1358_v63 = vmul.f32 %v1357_v25, %v3034_v32  ;;  %v1411_v0 = vmul.f32 %v1410_v17, %v3030_v27 }
 0x22d   : > { %v1154_v1 = vadd.f32 %v1152_v49, %v1147_v61  ;;  %v1221_v2 = vadd.f32 %v1219_v56, %v1214_v24  ;;  %v1293_v36 = vrot.slane %v1291_v29, 3  ;;  %v1346_v3 = vrot.slane %v1344_v59, 1 }
 0x22e   : > { %v1288_v5 = vadd.f32 %v1286_v33, %v1281_v30  ;;  %v1353_v6 = vrot.slane %v1351_v62, 2  ;;  %v1360_v38 = vrot.slane %v1358_v63, 3  ;;  %v1413_v57 = vrot.slane %v1411_v0, 1 }
 0x22f   : > { %v1161_v8 = vadd.f32 %v1159_v50, %v1154_v1  ;;  %v1228_v11 = vadd.f32 %v1226_v23, %v1221_v2  ;;  %v1348_v9 = vadd.f32 %v1346_v3, %v1341_v40  ;;  %v1418_v12 = vmul.f32 %v1417_v31, %v3032_v28 }
 0x230   : > { %v1295_v13 = vadd.f32 %v1293_v36, %v1288_v5  ;;  %v1415_v14 = vadd.f32 %v1413_v57, %v1408_v41  ;;  %v1425_v21 = vmul.f32 %v1424_v58, %v3034_v32  ;;  %v1364_v34 = vstv %s3049_s3  ;;  %s3431_s3 = sld [smem:[#allocation4 + $0x78]] }
 0x231   : > { %v3062_v47 = vadd.f32 %v1163_v7, %v1161_v8  ;;  %v3064_v25 = vadd.f32 %v1230_v22, %v1228_v11  ;;  %v1355_v18 = vadd.f32 %v1353_v6, %v1348_v9  ;;  %v1420_v19 = vrot.slane %v1418_v12, 2 }
 0x232   : > { %v3068_v20 = vadd.f32 %v1297_v35, %v1295_v13  ;;  %v1427_v17 = vrot.slane %v1425_v21, 3  ;;  %v1431_v42 = vstv %s3056_s4  ;;  %v1477_v48 = vstv %s3066_s5  ;;  %s3435_s4 = sld [smem:[#allocation4 + $0x75]] }
 0x233   : > { %v3072_v31 = vmul.f32 0.70710677, %v3062_v47  ;;  %v3075_v58 = vmul.f32 0.70710677, %v3064_v25  ;;  %v1362_v7 = vadd.f32 %v1360_v38, %v1355_v18  ;;  %v1422_v37 = vadd.f32 %v1420_v19, %v1415_v14  ;;  %s3442_s5 = sld [smem:[#allocation4 + $0x7b]] }
 0x234   : > { %v3078_v22 = vmul.f32 0.70710677, %v3068_v20  ;;  %v1484_v49 = vstv %s2097_s21  ;;  %v1474_v23 = vstv %s2095_s22  ;;  %v1478_v10 = vmul.f32 %v1477_v48, %v3030_v27  ;;  %s3448_s21 = sld [smem:[#allocation4 + $0x6a]] }
 0x235   : > { %v3081_v39 = vand.u32 2147483647, %v3072_v31  ;;  %v3084_v35 = vand.u32 2147483647, %v3075_v58  ;;  %v3086_v52 = vadd.f32 %v1364_v34, %v1362_v7  ;;  %v1429_v41 = vadd.f32 %v1427_v17, %v1422_v37  ;;  %s3453_s22 = sld [smem:[#allocation4 + $0x6e]] }
 0x236   : > { %v3089_v40 = vand.u32 2147483647, %v3078_v22  ;;  %v3111_v33 = vmul.f32 %v1484_v49, %v3032_v28  ;;  %v1491_v61 = vstv %s2098_s23  ;;  %v1475_v29 = vmul.f32 %v1474_v23, %v3024_v26  ;;  %s3458_s23 = sld [smem:[#allocation4 + $0x72]] }
 0x237   : > { %v1168_v53 = vmul.f32 0.3275911, %v3081_v39  ;;  %v1235_v43 = vmul.f32 0.3275911, %v3084_v35  ;;  %v3096_v15 = vmul.f32 0.70710677, %v3086_v52  ;;  %v3098_v46 = vadd.f32 %v1431_v42, %v1429_v41 }
 0x238   : > { %v1302_v55 = vmul.f32 0.3275911, %v3089_v40  ;;  %v1480_v62 = vrot.slane %v1478_v10, 1  ;;  %v1487_v63 = vrot.slane %v3111_v33, 2  ;;  %v3121_v0 = vmul.f32 %v1491_v61, %v3034_v32 }
 0x239   : > { %v1169_v44 = vadd.f32 1.0, %v1168_v53  ;;  %v1236_v45 = vadd.f32 1.0, %v1235_v43  ;;  %v3104_v51 = vand.u32 2147483647, %v3096_v15  ;;  %v3107_v56 = vmul.f32 0.70710677, %v3098_v46 }
 0x23a   : > { %v3101_v50 = vadd.f32 1.0, %v1302_v55  ;;  %v1482_v19 = vadd.f32 %v1480_v62, %v1475_v29 }
 0x23b   : > { %2272 = vrcp.f32 %v1169_v44  ;;  %v1369_v24 = vmul.f32 0.3275911, %v3104_v51  ;;  %v3117_v30 = vand.u32 2147483647, %v3107_v56  ;;  %vm1175_vm9 = vweird.f32 %v1169_v44 }
 0x23c   : > { %2274 = vrcp.f32 %v1236_v45  ;;  %v1179_v36 = vand.u32 2147483647, %v1169_v44  ;;  %v1181_v5 = vand.u32 2147483648, %v1169_v44  ;;  %v1246_v38 = vand.u32 2147483647, %v1236_v45 }
 0x23d   : > { %2276 = vrcp.f32 %v3101_v50  ;;  %v1370_v3 = vadd.f32 1.0, %v1369_v24  ;;  %v1436_v57 = vmul.f32 0.3275911, %v3117_v30  ;;  %v1248_v11 = vand.u32 2147483648, %v1236_v45 }
 0x23e   : > { %vm1242_vm11 = vweird.f32 %v1236_v45  ;;  %v1313_v12 = vand.u32 2147483647, %v3101_v50  ;;  %v1315_v21 = vand.u32 2147483648, %v3101_v50  ;;  %vm3135_vm14 = vcmp.eq.f32.partialorder %v1179_v36, 8.507059e+37 }
 0x23f   : > { %2278 = vrcp.f32 %v1370_v3  ;;  %v3126_v18 = vadd.f32 1.0, %v1436_v57  ;;  %v1182_v7 = vor.u32 1.1754944e-38, %v1181_v5  ;;  %vm3145_vm0 = vcmp.eq.f32.partialorder %v1246_v38, 8.507059e+37 }
 0x240   : > { %v1249_v55 = vor.u32 1.1754944e-38, %v1248_v11  ;;  %vm1309_vm1 = vweird.f32 %v3101_v50  ;;  %vm3150_vm3 = vcmp.eq.f32.partialorder %v1313_v12, 8.507059e+37  ;;  %v1316_v10 = vor.u32 1.1754944e-38, %v1315_v21 }
 0x241   : > { %v2273_v59 = vpop.eup %2272  ;;  %v1380_v33 = vand.u32 2147483647, %v1370_v3  ;;  %2280 = vrcp.f32 %v3126_v18  ;;  %vm1376_vm5 = vweird.f32 %v1370_v3  ;;  %v1382_v5 = vand.u32 2147483648, %v1370_v3 }
 0x242   : > { %v2275_v1 = vpop.eup %2274  ;;  %v1171_v2 = vmul.f32 %v2273_v59, %v1169_v44  ;;  %vm1176_vm10 = vweird.f32 %v2273_v59  ;;  %v1498_v11 = vstv %s3128_s26  ;;  %v1447_v43 = vand.u32 2147483647, %v3126_v18  ;;  %s3462_s26 = sld [smem:[#allocation4 + $0x76]] }
 0x243   : > { %v1238_v6 = vmul.f32 %v2275_v1, %v1236_v45  ;;  %vm1243_vm12 = vweird.f32 %v2275_v1  ;;  %v2277_v13 = vpop.eup %2276  ;;  %vm3131_vm13 = vmor %vm1175_vm9, %vm1176_vm10  ;;  %vm3178_vm7 = vcmp.eq.f32.partialorder %v1380_v33, 8.507059e+37  ;;  %vm1443_vm9 = vweird.f32 %v3126_v18 }
 0x244   : > { %v1172_v8 = vsub.f32 1.0, %v1171_v2  ;;  %v1305_v41 = vmul.f32 %v2277_v13, %v3101_v50  ;;  %vm3141_vm15 = vmor %vm1242_vm11, %vm1243_vm12  ;;  %vm1310_vm2 = vweird.f32 %v2277_v13  ;;  %vm1448_vm12 = vcmp.eq.f32.partialorder %v1447_v43, 8.507059e+37 }
 0x245   : > { %v1239_v9 = vsub.f32 1.0, %v1238_v6  ;;  %v2279_v23 = vpop.eup %2278  ;;  %vm3170_vm4 = vmor %vm1309_vm1, %vm1310_vm2  ;;  %vm1200_vm1 = vcmp.ge.f32.partialorder %v3072_v31, 0.0  ;;  %vm1267_vm2 = vcmp.ge.f32.partialorder %v3075_v58, 0.0  ;;  %v1232_v58 = vmul.f32 0.5, %v3064_v25 }
 0x246   : > { %v1173_v14 = vmul.f32 %v2273_v59, %v1172_v8  ;;  %v1306_v48 = vsub.f32 1.0, %v1305_v41  ;;  %v1372_v62 = vmul.f32 %v2279_v23, %v1370_v3  ;;  %vm1377_vm6 = vweird.f32 %v2279_v23 }
 0x247   : > { %v1240_v37 = vmul.f32 %v2275_v1, %v1239_v9  ;;  %v1489_v8 = vadd.f32 %v1487_v63, %v1482_v19  ;;  %v2281_v21 = vpop.eup %2280  ;;  %vm3188_vm8 = vmor %vm1376_vm5, %vm1377_vm6  ;;  %v1383_v19 = vor.u32 1.1754944e-38, %v1382_v5  ;;  %v1449_v3 = vand.u32 2147483648, %v3126_v18 }
 0x248   : > { %v1174_v42 = vadd.f32 %v2273_v59, %v1173_v14  ;;  %v1307_v29 = vmul.f32 %v2277_v13, %v1306_v48  ;;  %vm1444_vm10 = vweird.f32 %v2281_v21 }
 0x249   : > { %v1241_v44 = vadd.f32 %v2275_v1, %v1240_v37  ;;  %vm3214_vm11 = vmor %vm1443_vm9, %vm1444_vm10 }
 0x24a   : > { %v1178_v45 = vsel %vm3131_vm13, %v2273_v59, %v1174_v42  ;;  %v1308_v38 = vadd.f32 %v2277_v13, %v1307_v29  ;;  %v1439_v42 = vmul.f32 %v2281_v21, %v3126_v18  ;;  %v1261_v18 = vsub.f32 0.0, %v3084_v35 }
 0x24b   : > { %v3159_v61 = vsel %vm3135_vm14, %v1182_v7, %v1178_v45  ;;  %v1245_v24 = vsel %vm3141_vm15, %v2275_v1, %v1241_v44  ;;  %v1373_v1 = vsub.f32 1.0, %v1372_v62  ;;  %v1450_v62 = vor.u32 1.1754944e-38, %v1449_v3 }
 0x24c   : > { %v1185_v2 = vmul.f32 1.0614054, %v3159_v61  ;;  %v3166_v36 = vsel %vm3145_vm0, %v1249_v55, %v1245_v24  ;;  %v1312_v12 = vsel %vm3170_vm4, %v2277_v13, %v1308_v38  ;;  %v1494_v13 = vrot.slane %v3121_v0, 3 }
 0x24d   : > { %v1252_v6 = vmul.f32 1.0614054, %v3166_v36  ;;  %v1374_v14 = vmul.f32 %v2279_v23, %v1373_v1  ;;  %v3185_v17 = vsel %vm3150_vm3, %v1316_v10, %v1312_v12  ;;  %v1440_v48 = vsub.f32 1.0, %v1439_v42 }
 0x24e   : > { %v1186_v57 = vadd.f32 -1.4531521, %v1185_v2  ;;  %v1319_v37 = vmul.f32 1.0614054, %v3185_v17  ;;  %v1496_v45 = vadd.f32 %v1494_v13, %v1489_v8  ;;  %v1194_v10 = vsub.f32 0.0, %v3081_v39 }
 0x24f   : > { %v1253_v9 = vadd.f32 -1.4531521, %v1252_v6  ;;  %v1375_v41 = vadd.f32 %v2279_v23, %v1374_v14  ;;  %v1441_v29 = vmul.f32 %v2281_v21, %v1440_v48  ;;  %vm1334_vm3 = vcmp.ge.f32.partialorder %v3078_v22, 0.0 }
 0x250   : > { %v1187_v34 = vmul.f32 %v1186_v57, %v3159_v61  ;;  %v1320_v55 = vadd.f32 -1.4531521, %v1319_v37  ;;  %v3218_v2 = vadd.f32 %v1498_v11, %v1496_v45  ;;  %v1195_v8 = vmul.f32 %v1194_v10, %v3081_v39 }
 0x251   : > { %v1254_v7 = vmul.f32 %v1253_v9, %v3166_v36  ;;  %v1379_v44 = vsel %vm3188_vm8, %v2279_v23, %v1375_v41  ;;  %v1442_v38 = vadd.f32 %v2281_v21, %v1441_v29  ;;  %v1328_v11 = vsub.f32 0.0, %v3089_v40 }
 0x252   : > { %v1188_v53 = vadd.f32 1.4214138, %v1187_v34  ;;  %v3205_v49 = vsel %vm3178_vm7, %v1383_v19, %v1379_v44  ;;  %v1321_v33 = vmul.f32 %v1320_v55, %v3185_v17  ;;  %v3226_v57 = vmul.f32 0.70710677, %v3218_v2 }
 0x253   : > { %v1255_v0 = vadd.f32 1.4214138, %v1254_v7  ;;  %v1386_v24 = vmul.f32 1.0614054, %v3205_v49  ;;  %v1446_v9 = vsel %vm3214_vm11, %v2281_v21, %v1442_v38  ;;  %v1395_v19 = vsub.f32 0.0, %v3104_v51 }
 0x254   : > { %v1189_v59 = vmul.f32 %v1188_v53, %v3159_v61  ;;  %v1322_v5 = vadd.f32 1.4214138, %v1321_v33  ;;  %v3233_v14 = vsel %vm1448_vm12, %v1450_v62, %v1446_v9  ;;  %v3236_v50 = vand.u32 2147483647, %v3226_v57 }
 0x255   : > { %v1387_v6 = vadd.f32 -1.4531521, %v1386_v24  ;;  %v1256_v1 = vmul.f32 %v1255_v0, %v3166_v36  ;;  %v1544_v39 = vstv %s3201_s27  ;;  %v1262_v7 = vmul.f32 %v1261_v18, %v3084_v35  ;;  %s3466_s27 = sld [smem:[#allocation4 + $0x79]] }
 0x256   : > { %v1190_v34 = vadd.f32 -0.28449672, %v1189_v59  ;;  %v1323_v63 = vmul.f32 %v1322_v5, %v3185_v17  ;;  %v1453_v37 = vmul.f32 1.0614054, %v3233_v14  ;;  %v1503_v21 = vmul.f32 0.3275911, %v3236_v50 }
 0x257   : > { %v1388_v12 = vmul.f32 %v1387_v6, %v3205_v49  ;;  %v1257_v13 = vadd.f32 -0.28449672, %v1256_v1  ;;  %v1196_v41 = vmul.f32 1.442695, %v1195_v8  ;;  %v1329_v42 = vmul.f32 %v1328_v11, %v3089_v40 }
 0x258   : > { %v1541_v53 = vstv %s3210_s18  ;;  %v1454_v3 = vadd.f32 -1.4531521, %v1453_v37  ;;  %v1504_v55 = vadd.f32 1.0, %v1503_v21  ;;  %v1545_v44 = vmul.f32 %v1544_v39, %v3030_v27  ;;  %s3471_s18 = sld [smem:[#allocation4 + $0x7a]] }
 0x259   : > { %v1389_v43 = vadd.f32 1.4214138, %v1388_v12  ;;  %v1324_v48 = vadd.f32 -0.28449672, %v1323_v63  ;;  %v1396_v0 = vmul.f32 %v1395_v19, %v3104_v51  ;;  %v1462_v45 = vsub.f32 0.0, %v3117_v30 }
 0x25a   : > { %v1551_v10 = vstv %s3221_s7  ;;  %v1191_v35 = vmul.f32 %v1190_v34, %v3159_v61  ;;  %v1258_v33 = vmul.f32 %v1257_v13, %v3166_v36  ;;  %v1263_v24 = vmul.f32 1.442695, %v1262_v7  ;;  %s3480_s7 = sld [smem:[#allocation4 + $0x7c]] }
 0x25b   : > { %2282 = vrcp.f32 %v1504_v55  ;;  %v1330_v29 = vmul.f32 1.442695, %v1329_v42  ;;  %v1542_v40 = vmul.f32 %v1541_v53, %v3024_v26  ;;  %v1390_v23 = vmul.f32 %v1389_v43, %v3205_v49 }
 0x25c   : > { %v1455_v62 = vmul.f32 %v1454_v3, %v3233_v14  ;;  %v1547_v59 = vrot.slane %v1545_v44, 1  ;;  %v1552_v51 = vmul.f32 %v1551_v10, %v3032_v28  ;;  %2284 = vpow2.f32 %v1196_v41 }
 0x25d   : > { %v1325_v5 = vmul.f32 %v1324_v48, %v3185_v17  ;;  %v1397_v6 = vmul.f32 1.442695, %v1396_v0  ;;  %v1463_v38 = vmul.f32 %v1462_v45, %v3117_v30  ;;  %v1192_v1 = vadd.f32 0.2548296, %v1191_v35 }
 0x25e   : > { %v1259_v18 = vadd.f32 0.2548296, %v1258_v33  ;;  %2286 = vpow2.f32 %v1263_v24  ;;  %v1391_v11 = vadd.f32 -0.28449672, %v1390_v23  ;;  %v1456_v9 = vadd.f32 1.4214138, %v1455_v62 }
 0x25f   : > { %2288 = vpow2.f32 %v1330_v29  ;;  %v1549_v12 = vadd.f32 %v1547_v59, %v1542_v40  ;;  %v1554_v34 = vrot.slane %v1552_v51, 2  ;;  %v1326_v63 = vadd.f32 0.2548296, %v1325_v5 }
 0x260   : > { %2290 = vpow2.f32 %v1397_v6  ;;  %v1464_v19 = vmul.f32 1.442695, %v1463_v38  ;;  %v1193_v39 = vmul.f32 %v1192_v1, %v3159_v61  ;;  %v1260_v13 = vmul.f32 %v1259_v18, %v3166_v36 }
 0x261   : > { %v2283_v8 = vpop.eup %2282  ;;  %v1514_v7 = vand.u32 2147483647, %v1504_v55  ;;  %v1516_v37 = vand.u32 2147483648, %v1504_v55  ;;  %vm1510_vm13 = vweird.f32 %v1504_v55  ;;  %v1558_v42 = vstv %s3253_s28  ;;  %s3485_s28 = sld [smem:[#allocation4 + $0x7d]] }
 0x262   : > { %v1506_v30 = vmul.f32 %v2283_v8, %v1504_v55  ;;  %v2285_v21 = vpop.eup %2284  ;;  %vm1511_vm14 = vweird.f32 %v2283_v8  ;;  %v1392_v43 = vmul.f32 %v1391_v11, %v3205_v49  ;;  %v1457_v3 = vmul.f32 %v1456_v9, %v3233_v14 }
 0x263   : > { %v1556_v44 = vadd.f32 %v1554_v34, %v1549_v12  ;;  %v1559_v61 = vmul.f32 %v1558_v42, %v3034_v32  ;;  %v1327_v48 = vmul.f32 %v1326_v63, %v3185_v17  ;;  %v1608_v45 = vstv %s3258_s14  ;;  %vm3279_vm15 = vmor %vm1510_vm13, %vm1511_vm14  ;;  %s3491_s14 = sld [smem:[#allocation4 + $0x7e]] }
 0x264   : > { %v1507_v41 = vsub.f32 1.0, %v1506_v30  ;;  %v2287_v53 = vpop.eup %2286  ;;  %v1611_v10 = vstv %s3262_s16  ;;  %vm3283_vm0 = vcmp.eq.f32.partialorder %v1514_v7, 8.507059e+37  ;;  %v1517_v33 = vor.u32 1.1754944e-38, %v1516_v37  ;;  %s3494_s16 = sld [smem:[#allocation4 + $0x7f]] }
 0x265   : > { %v2289_v36 = vpop.eup %2288  ;;  %v1561_v24 = vrot.slane %v1559_v61, 3  ;;  %v1565_v29 = vstv %s3264_s13  ;;  %v1609_v17 = vmul.f32 %v1608_v45, %v3024_v26  ;;  %v1612_v62 = vmul.f32 %v1611_v10, %v3030_v27  ;;  %s3499_s13 = sld [smem:[#allocation4 + $0x80]] }
 0x266   : > { %v1508_v0 = vmul.f32 %v2283_v8, %v1507_v41  ;;  %v2291_v40 = vpop.eup %2290  ;;  %v1618_v59 = vstv %s3266_s29  ;;  %v1393_v51 = vadd.f32 0.2548296, %v1392_v43  ;;  %v1458_v5 = vadd.f32 -0.28449672, %v1457_v3  ;;  %s3504_s29 = sld [smem:[#allocation4 + $0x81]] }
 0x267   : > { %v1563_v6 = vadd.f32 %v1561_v24, %v1556_v44  ;;  %v1619_v38 = vmul.f32 %v1618_v59, %v3032_v28  ;;  %v1529_v18 = vsub.f32 0.0, %v3236_v50  ;;  %v1614_v11 = vrot.slane %v1612_v62, 1 }
 0x268   : > { %v1509_v23 = vadd.f32 %v2283_v8, %v1508_v0  ;;  %v1625_v9 = vstv %s3268_s15  ;;  %v1198_v12 = vmul.f32 %v2285_v21, %v1193_v39  ;;  %v1265_v34 = vmul.f32 %v2287_v53, %v1260_v13  ;;  %s3510_s15 = sld [smem:[#allocation4 + $0x82]] }
 0x269   : > { %v3302_v27 = vadd.f32 %v1565_v29, %v1563_v6  ;;  %v1616_v30 = vadd.f32 %v1614_v11, %v1609_v17  ;;  %v1621_v28 = vrot.slane %v1619_v38, 2  ;;  %v1626_v7 = vmul.f32 %v1625_v9, %v3034_v32 }
 0x26a   : > { %v1513_v1 = vsel %vm3279_vm15, %v2283_v8, %v1509_v23  ;;  %v1332_v8 = vmul.f32 %v2289_v36, %v1327_v48  ;;  %v1394_v37 = vmul.f32 %v1393_v51, %v3205_v49  ;;  %v1459_v41 = vmul.f32 %v1458_v5, %v3233_v14 }
 0x26b   : > { %v3300_v26 = vsel %vm3283_vm0, %v1517_v33, %v1513_v1  ;;  %v3309_v39 = vmul.f32 0.70710677, %v3302_v27  ;;  %v1530_v21 = vmul.f32 %v1529_v18, %v3236_v50  ;;  %v1623_v42 = vadd.f32 %v1621_v28, %v1616_v30 }
 0x26c   : > { %v1520_v63 = vmul.f32 1.0614054, %v3300_v26  ;;  %v1628_v53 = vrot.slane %v1626_v7, 3  ;;  %2292 = vpow2.f32 %v1464_v19  ;;  %v1632_v3 = vstv %s3288_s0  ;;  %s3513_s0 = sld [smem:[#allocation4 + $0x83]] }
 0x26d   : > { %v3313_v43 = vand.u32 2147483647, %v3309_v39  ;;  %v1199_v44 = vsub.f32 1.0, %v1198_v12  ;;  %v1266_v32 = vsub.f32 1.0, %v1265_v34  ;;  %v1333_v36 = vsub.f32 1.0, %v1332_v8 }
 0x26e   : > { %v1521_v13 = vadd.f32 -1.4531521, %v1520_v63  ;;  %v1630_v49 = vadd.f32 %v1628_v53, %v1623_v42  ;;  %v1399_v48 = vmul.f32 %v2291_v40, %v1394_v37  ;;  %v1460_v0 = vadd.f32 0.2548296, %v1459_v41 }
 0x26f   : > { %v1570_v45 = vmul.f32 0.3275911, %v3313_v43  ;;  %v1531_v55 = vmul.f32 1.442695, %v1530_v21  ;;  %v1201_v35 = vsub.f32 0.0, %v1199_v44  ;;  %v1268_v33 = vsub.f32 0.0, %v1266_v32 }
 0x270   : > { %v1522_v61 = vmul.f32 %v1521_v13, %v3300_v26  ;;  %v3318_v50 = vadd.f32 %v1632_v3, %v1630_v49  ;;  %v1335_v23 = vsub.f32 0.0, %v1333_v36  ;;  %v1400_v17 = vsub.f32 1.0, %v1399_v48 }
 0x271   : > { %v3322_v19 = vadd.f32 1.0, %v1570_v45  ;;  %v1461_v62 = vmul.f32 %v1460_v0, %v3233_v14  ;;  %v1202_v5 = vsel %vm1200_vm1, %v1199_v44, %v1201_v35  ;;  %v1269_v6 = vsel %vm1267_vm2, %v1266_v32, %v1268_v33 }
 0x272   : > { %v1523_v10 = vadd.f32 1.4214138, %v1522_v61  ;;  %v3326_v29 = vmul.f32 0.70710677, %v3318_v50  ;;  %v2293_v40 = vpop.eup %2292  ;;  %v1336_v14 = vsel %vm1334_vm3, %v1333_v36, %v1335_v23  ;;  %v1402_v18 = vsub.f32 0.0, %v1400_v17 }
 0x273   : > { %2294 = vrcp.f32 %v3322_v19  ;;  %v3340_v11 = vmul.f32 %v2293_v40, %v1461_v62  ;;  %v1165_v22 = vmul.f32 0.5, %v3062_v47  ;;  %vm1401_vm4 = vcmp.ge.f32.partialorder %v3096_v15, 0.0 }
 0x274   : > { %v1524_v24 = vmul.f32 %v1523_v10, %v3300_v26  ;;  %2296 = vpow2.f32 %v1531_v55  ;;  %v3332_v51 = vand.u32 2147483647, %v3326_v29  ;;  %v1203_v34 = vadd.f32 1.0, %v1202_v5 }
 0x275   : > { %v1270_v63 = vadd.f32 1.0, %v1269_v6  ;;  %v1299_v30 = vmul.f32 0.5, %v3068_v20  ;;  %v1337_v7 = vadd.f32 1.0, %v1336_v14  ;;  %v1403_v15 = vsel %vm1401_vm4, %v1400_v17, %v1402_v18 }
 0x276   : > { %v1525_v59 = vadd.f32 -0.28449672, %v1524_v24  ;;  %v1637_v1 = vmul.f32 0.3275911, %v3332_v51  ;;  %v1467_v37 = vsub.f32 1.0, %v3340_v11  ;;  %v1583_v25 = vand.u32 2147483648, %v3322_v19 }
 0x277   : > { %v1596_v41 = vsub.f32 0.0, %v3313_v43  ;;  %vm1577_vm5 = vweird.f32 %v3322_v19  ;;  %v1581_v13 = vand.u32 2147483647, %v3322_v19  ;;  %v3362_v21 = vmul.f32 0.5, %v3098_v46 }
 0x278   : > { %v1526_v38 = vmul.f32 %v1525_v59, %v3300_v26  ;;  %v3344_v12 = vadd.f32 1.0, %v1637_v1  ;;  %vm1468_vm7 = vcmp.ge.f32.partialorder %v3107_v56, 0.0  ;;  %v3367_v53 = vmul.f32 %v1203_v34, %v1165_v22 }
 0x279   : > { %v2295_v31 = vpop.eup %2294  ;;  %v3370_v3 = vmul.f32 0.5, %v3218_v2  ;;  %vm1535_vm8 = vcmp.ge.f32.partialorder %v3226_v57, 0.0  ;;  %v3375_v32 = vmul.f32 %v1270_v63, %v1232_v58  ;;  %v1404_v46 = vadd.f32 1.0, %v1403_v15 }
 0x27a   : > { %v1527_v9 = vadd.f32 0.2548296, %v1526_v38  ;;  %v2297_v28 = vpop.eup %2296  ;;  %v1573_v47 = vmul.f32 %v2295_v31, %v3322_v19  ;;  %2298 = vrcp.f32 %v3344_v12  ;;  %vm1578_vm6 = vweird.f32 %v2295_v31 }
 0x27b   : > { %vm3382_vm9 = vmor %vm1577_vm5, %vm1578_vm6  ;;  %v1584_v2 = vor.u32 1.1754944e-38, %v1583_v25  ;;  %v1469_v36 = vsub.f32 0.0, %v1467_v37  ;;  %vm1582_vm10 = vcmp.eq.f32.partialorder %v1581_v13, 8.507059e+37  ;;  %v1597_v0 = vmul.f32 %v1596_v41, %v3313_v43 }
 0x27c   : > { %v1528_v8 = vmul.f32 %v1527_v9, %v3300_v26  ;;  %v1574_v20 = vsub.f32 1.0, %v1573_v47  ;;  %v1366_v26 = vmul.f32 0.5, %v3086_v52  ;;  %v3377_v52 = vmul.f32 %v1337_v7, %v1299_v30 }
 0x27d   : > { %vm1644_vm11 = vweird.f32 %v3344_v12  ;;  %v1663_v55 = vsub.f32 0.0, %v3332_v51  ;;  %v1650_v35 = vand.u32 2147483648, %v3344_v12  ;;  %v1675_v33 = vstv %s3348_s1  ;;  %s3518_s1 = sld [smem:[#allocation4 + $0x84]] }
 0x27e   : > { %v1533_v42 = vmul.f32 %v2297_v28, %v1528_v8  ;;  %v1575_v44 = vmul.f32 %v2295_v31, %v1574_v20  ;;  %v1678_v24 = vstv %s3353_s2  ;;  %v1648_v23 = vand.u32 2147483647, %v3344_v12  ;;  %s3525_s2 = sld [smem:[#allocation4 + $0x85]] }
 0x27f   : > { %v3408_v17 = vmul.f32 %v1404_v46, %v1366_v26  ;;  %v1470_v62 = vsel %vm1468_vm7, %v1467_v37, %v1469_v36  ;;  %v1598_v5 = vmul.f32 1.442695, %v1597_v0  ;;  %v1676_v1 = vmul.f32 %v1675_v33, %v3367_v53 }
 0x280   : > { %v2299_v49 = vpop.eup %2298  ;;  %v1576_v48 = vadd.f32 %v2295_v31, %v1575_v44  ;;  %v1534_v45 = vsub.f32 1.0, %v1533_v42  ;;  %v1679_v14 = vmul.f32 %v1678_v24, %v3375_v32  ;;  %v1651_v11 = vor.u32 1.1754944e-38, %v1650_v35 }
 0x281   : > { %v1640_v10 = vmul.f32 %v2299_v49, %v3344_v12  ;;  %vm1645_vm12 = vweird.f32 %v2299_v49  ;;  %v1664_v22 = vmul.f32 %v1663_v55, %v3332_v51  ;;  %v1682_v9 = vstv %s3373_s25  ;;  %s3537_s25 = sld [smem:[#allocation4 + $0x87]] }
 0x282   : > { %v1580_v19 = vsel %vm3382_vm9, %v2295_v31, %v1576_v48  ;;  %v1536_v6 = vsub.f32 0.0, %v1534_v45  ;;  %vm3421_vm13 = vmor %vm1644_vm11, %vm1645_vm12  ;;  %vm1649_vm14 = vcmp.eq.f32.partialorder %v1648_v23, 8.507059e+37  ;;  %v1710_v34 = vstv %s3365_s30  ;;  %s3528_s30 = sld [smem:[#allocation4 + $0x86]] }
 0x283   : > { %v3403_v43 = vsel %vm1582_vm10, %v1584_v2, %v1580_v19  ;;  %v1641_v40 = vsub.f32 1.0, %v1640_v10  ;;  %v1713_v58 = vstv %s3386_s8  ;;  %v1471_v63 = vadd.f32 1.0, %v1470_v62  ;;  %s3539_s8 = sld [smem:[#allocation4 + $0x88]] }
 0x284   : > { %v1587_v59 = vmul.f32 1.0614054, %v3403_v43  ;;  %2300 = vpow2.f32 %v1598_v5  ;;  %v1686_v12 = vstv %s3389_s9  ;;  %v1537_v51 = vsel %vm1535_vm8, %v1534_v45, %v1536_v6  ;;  %s3542_s9 = sld [smem:[#allocation4 + $0x89]] }
 0x285   : > { %v1642_v38 = vmul.f32 %v2299_v49, %v1641_v40  ;;  %v1680_v7 = vadd.f32 %v1679_v14, %v1676_v1  ;;  %v1683_v8 = vmul.f32 %v1682_v9, %v3377_v52  ;;  %v1711_v37 = vmul.f32 %v1710_v34, %v3367_v53 }
 0x286   : > { %v1588_v18 = vadd.f32 -1.4531521, %v1587_v59  ;;  %v1714_v25 = vmul.f32 %v1713_v58, %v3375_v32  ;;  %v1665_v41 = vmul.f32 1.442695, %v1664_v22  ;;  %v1687_v20 = vmul.f32 %v1686_v12, %v3408_v17 }
 0x287   : > { %v1643_v31 = vadd.f32 %v2299_v49, %v1642_v38  ;;  %v1717_v13 = vstv %s3394_s11  ;;  %v1538_v26 = vadd.f32 1.0, %v1537_v51  ;;  %v1748_v44 = vstv %s3406_s19  ;;  %s2145_s11 = sld [smem:[#allocation4 + $0x8a]] }
 0x288   : > { %v1589_v30 = vmul.f32 %v1588_v18, %v3403_v43  ;;  %v1751_v46 = vstv %s3413_s20  ;;  %v1684_v2 = vadd.f32 %v1683_v8, %v1680_v7  ;;  %v1715_v45 = vadd.f32 %v1714_v25, %v1711_v37 }
 0x289   : > { %v1647_v28 = vsel %vm3421_vm13, %v2299_v49, %v1643_v31  ;;  %v1749_v49 = vmul.f32 %v1748_v44, %v3367_v53  ;;  %v1752_v36 = vmul.f32 %v1751_v46, %v3375_v32  ;;  %v1718_v10 = vmul.f32 %v1717_v13, %v3377_v52 }
 0x28a   : > { %v1590_v47 = vadd.f32 1.4214138, %v1589_v30  ;;  %v3444_v15 = vsel %vm1649_vm14, %v1651_v11, %v1647_v28  ;;  %v2301_v48 = vpop.eup %2300  ;;  %v1755_v55 = vstv %s3427_s6  ;;  %v1472_v19 = vmul.f32 %v1471_v63, %v3362_v21 }
 0x28b   : > { %v1654_v57 = vmul.f32 1.0614054, %v3444_v15  ;;  %2302 = vpow2.f32 %v1665_v41  ;;  %v1721_v33 = vstv %s3401_s12  ;;  %v3474_v24 = vmul.f32 %v1538_v26, %v3370_v3 }
 0x28c   : > { %v1591_v42 = vmul.f32 %v1590_v47, %v3403_v43  ;;  %v1690_v23 = vstv %s3417_s17  ;;  %v1759_v62 = vstv %s3435_s4  ;;  %vm1602_vm15 = vcmp.ge.f32.partialorder %v3309_v39, 0.0 }
 0x28d   : > { %v1655_v61 = vadd.f32 -1.4531521, %v1654_v57  ;;  %v1688_v21 = vadd.f32 %v1687_v20, %v1684_v2  ;;  %v1753_v5 = vadd.f32 %v1752_v36, %v1749_v49  ;;  %v1756_v6 = vmul.f32 %v1755_v55, %v3377_v52 }
 0x28e   : > { %v1592_v0 = vadd.f32 -0.28449672, %v1591_v42  ;;  %v1719_v1 = vadd.f32 %v1718_v10, %v1715_v45  ;;  %v1722_v3 = vmul.f32 %v1721_v33, %v3408_v17  ;;  %v1725_v14 = vstv %s3431_s3 }
 0x28f   : > { %v1656_v35 = vmul.f32 %v1655_v61, %v3444_v15  ;;  %v1760_v56 = vmul.f32 %v1759_v62, %v3408_v17  ;;  %v1786_v11 = vstv %s3448_s21  ;;  %v1789_v22 = vstv %s3453_s22 }
 0x290   : > { %v1593_v40 = vmul.f32 %v1592_v0, %v3403_v43  ;;  %v1787_v31 = vmul.f32 %v1786_v11, %v3367_v53  ;;  %v1790_v34 = vmul.f32 %v1789_v22, %v3375_v32  ;;  %v1793_v58 = vstv %s3458_s23 }
 0x291   : > { %v1657_v59 = vadd.f32 1.4214138, %v1656_v35  ;;  %v2303_v63 = vpop.eup %2302  ;;  %v1757_v12 = vadd.f32 %v1756_v6, %v1753_v5  ;;  %v1794_v51 = vmul.f32 %v1793_v58, %v3377_v52  ;;  %v1797_v28 = vstv %s3462_s26 }
 0x292   : > { %v1594_v38 = vadd.f32 0.2548296, %v1593_v40  ;;  %v1791_v8 = vadd.f32 %v1790_v34, %v1787_v31  ;;  %v1798_v53 = vmul.f32 %v1797_v28, %v3408_v17  ;;  %v1691_v47 = vmul.f32 %v1690_v23, %v1472_v19 }
 0x293   : > { %v1658_v18 = vmul.f32 %v1657_v59, %v3444_v15  ;;  %v1694_v37 = vstv %s3442_s5  ;;  %v1801_v25 = vstv %s3471_s18  ;;  %v1723_v41 = vadd.f32 %v1722_v3, %v1719_v1 }
 0x294   : > { %v1595_v9 = vmul.f32 %v1594_v38, %v3403_v43  ;;  %v1763_v43 = vstv %s3466_s27  ;;  %v1726_v52 = vmul.f32 %v1725_v14, %v1472_v19  ;;  %v1795_v20 = vadd.f32 %v1794_v51, %v1791_v8 }
 0x295   : > { %v1659_v30 = vadd.f32 -0.28449672, %v1658_v18  ;;  %v1729_v26 = vstv %s3480_s7  ;;  %v1761_v42 = vadd.f32 %v1760_v56, %v1757_v12  ;;  %v1764_v44 = vmul.f32 %v1763_v43, %v1472_v19 }
 0x296   : > { %v1600_v7 = vmul.f32 %v2301_v48, %v1595_v9  ;;  %v1767_v17 = vstv %s3485_s28  ;;  %v1799_v61 = vadd.f32 %v1798_v53, %v1795_v20  ;;  %v1802_v2 = vmul.f32 %v1801_v25, %v1472_v19 }
 0x297   : > { %v1660_v32 = vmul.f32 %v1659_v30, %v3444_v15  ;;  %v1567_v49 = vmul.f32 0.5, %v3302_v27  ;;  %v1692_v48 = vadd.f32 %v1691_v47, %v1688_v21  ;;  %v1805_v0 = vstv %s3491_s14 }
 0x298   : > { %v1601_v57 = vsub.f32 1.0, %v1600_v7  ;;  %v1695_v10 = vmul.f32 %v1694_v37, %v3474_v24  ;;  %v1727_v55 = vadd.f32 %v1726_v52, %v1723_v41  ;;  %v1730_v19 = vmul.f32 %v1729_v26, %v3474_v24 }
 0x299   : > { %v1661_v13 = vadd.f32 0.2548296, %v1660_v32  ;;  %v1765_v33 = vadd.f32 %v1764_v44, %v1761_v42  ;;  %v1698_v40 = vstv %s3494_s16  ;;  %v1733_v23 = vstv %s3499_s13 }
 0x29a   : > { %v1603_v46 = vsub.f32 0.0, %v1601_v57  ;;  %v1803_v39 = vadd.f32 %v1802_v2, %v1799_v61  ;;  %v1806_v62 = vmul.f32 %v1805_v0, %v3474_v24  ;;  %v1771_v5 = vstv %s3504_s29 }
 0x29b   : > { %v1662_v36 = vmul.f32 %v1661_v13, %v3444_v15  ;;  %v1768_v15 = vmul.f32 %v1767_v17, %v3474_v24  ;;  %v1809_v6 = vstv %s3510_s15  ;;  %v1634_v38 = vmul.f32 0.5, %v3318_v50 }
 0x29c   : > { %v1604_v45 = vsel %vm1602_vm15, %v1601_v57, %v1603_v46  ;;  %vm1669_vm0 = vcmp.ge.f32.partialorder %v3326_v29, 0.0  ;;  %v1696_v1 = vadd.f32 %v1695_v10, %v1692_v48  ;;  %v1731_v18 = vadd.f32 %v1730_v19, %v1727_v55 }
 0x29d   : > { %v1605_v27 = vadd.f32 1.0, %v1604_v45  ;;  %v1667_v35 = vmul.f32 %v2303_v63, %v1662_v36  ;;  %v1769_v56 = vadd.f32 %v1768_v15, %v1765_v33  ;;  %v1807_v22 = vadd.f32 %v1806_v62, %v1803_v39 }
 0x29e   : > { %v1702_v34 = vstv %s3513_s0  ;;  %v1737_v58 = vstv %s3518_s1  ;;  %v1775_v63 = vstv %s3525_s2  ;;  %v1813_v30 = vstv %s3528_s30 }
 0x29f   : > { %v1606_v59 = vmul.f32 %v1605_v27, %v1567_v49  ;;  %v1668_v21 = vsub.f32 1.0, %v1667_v35  ;;  %v1707_v41 = vstv %s3537_s25  ;;  %v1745_v42 = vstv %s3539_s8 }
 0x2a0   : > { %v1783_v44 = vstv %s3542_s9  ;;  %v1821_v46 = vstv %s2145_s11 }
 0x2a1   : > { %v1670_v3 = vsub.f32 0.0, %v1668_v21  ;;  %v1699_v14 = vmul.f32 %v1698_v40, %v1606_v59  ;;  %v1734_v24 = vmul.f32 %v1733_v23, %v1606_v59  ;;  %v1772_v11 = vmul.f32 %v1771_v5, %v1606_v59 }
 0x2a2   : > { %v1810_v9 = vmul.f32 %v1809_v6, %v1606_v59 }
 0x2a3   : > { %v1671_v31 = vsel %vm1669_vm0, %v1668_v21, %v1670_v3  ;;  %v1700_v29 = vadd.f32 %v1699_v14, %v1696_v1  ;;  %v1735_v51 = vadd.f32 %v1734_v24, %v1731_v18  ;;  %v1773_v28 = vadd.f32 %v1772_v11, %v1769_v56 }
 0x2a4   : > { %v1672_v50 = vadd.f32 1.0, %v1671_v31  ;;  %v1811_v7 = vadd.f32 %v1810_v9, %v1807_v22 }
 0x2a6   : > { %v1673_v12 = vmul.f32 %v1672_v50, %v1634_v38 }
 0x2a8   : > { %v1703_v43 = vmul.f32 %v1702_v34, %v1673_v12  ;;  %v1738_v8 = vmul.f32 %v1737_v58, %v1673_v12  ;;  %v1776_v53 = vmul.f32 %v1775_v63, %v1673_v12  ;;  %v1814_v32 = vmul.f32 %v1813_v30, %v1673_v12 }
 0x2aa   : > { %v1704_v47 = vadd.f32 %v1703_v43, %v1700_v29  ;;  %v1739_v37 = vadd.f32 %v1738_v8, %v1735_v51  ;;  %v1777_v25 = vadd.f32 %v1776_v53, %v1773_v28  ;;  %v1815_v57 = vadd.f32 %v1814_v32, %v1811_v7 }
 0x2ac   : > { %v1705_v52 = vadd.f32 %v1704_v47, %v2896_v54  ;;  %v1741_v20 = vrot.slane %v1739_v37, 7  ;;  %v1779_v13 = vrot.slane %v1777_v25, 6  ;;  %v1817_v26 = vrot.slane %v1815_v57, 5 }
 0x2ae   : > { %v1708_v17 = vadd.f32 %v1707_v41, %v1705_v52  ;;  %v1743_v61 = vadd.f32 %v1741_v20, %v2898_v60  ;;  %v1781_v2 = vadd.f32 %v1779_v13, %v2900_v16  ;;  %v1819_v49 = vadd.f32 %v1817_v26, %v2902_v4 }
 0x2b0   : > { %v1746_v36 = vadd.f32 %v1745_v42, %v1743_v61  ;;  %v1784_v48 = vadd.f32 %v1783_v44, %v1781_v2  ;;  %v1822_v0 = vadd.f32 %v1821_v46, %v1819_v49  ;;  %1823 = vst [vmem:[%s2523_s10] sm:$0x1] %v1708_v17 }
 0x2b2   : > { %1824 = vst [vmem:[%s2523_s10] sm:$0x2] %v1746_v36 }
 0x2b3   : > { %1825 = vst [vmem:[%s2523_s10] sm:$0x4] %v1784_v48 }
 0x2b4   : > { %1826 = vst [vmem:[%s2523_s10] sm:$0x8] %v1822_v0 }
 0x2b5 PF: > { %s17_s24 = sadd.s32 1, %s2396_s24   ;;  %s3636_s18 = sld [smem:[#allocation10_spill]] }
 0x2b6   : > { %p14_p1 = scmp.ge.s32.totalorder %s17_s24, 10   ;;  %s3637_s19 = sld [smem:[#allocation11_spill]] }
 0x2b7   : > { %s3638_s20 = sld [smem:[#allocation12_spill]] }
 0x2b8   : > { %s3639_s21 = sld [smem:[#allocation13_spill]]  ;;  %16 = sbr.rel (!%p14_p1) target bundleno = 12 (0xc), region = 93 }
 0x2b9   : > { %s3640_s22 = sld [smem:[#allocation14_spill]] }
 0x2ba   : > { %s3641_s23 = sld [smem:[#allocation15_spill]] }
 0x2bd   :  { %1856 = vsyncpa [#allocation5], 1 }
 0x2be   :  { %1858 = vsyncpa [#allocation5 + $0x1], 1 }
 0x2bf   :  { %1859 = vsyncpa [#allocation7], 1 }

</bundles_post_ra>
